<compile_context>
chip_gen: v7x
topology: tpu7x:2x2x1
jax: 0.10.0
libtpu: 0.0.40
codegen_flags: <defaults>
</compile_context>

<pallas_src>
import functools
import math

import jax
import jax.numpy as jnp
from jax import lax
from jax.experimental import pallas as pl
from jax.experimental.pallas import tpu as pltpu

LN_EPS = 1e-5
NEG_INF = -1e30  # finite mask value keeps the running-max math NaN-free


def _layernorm(x, g, b):
    mu = jnp.mean(x, axis=-1, keepdims=True)
    var = jnp.mean((x - mu) ** 2, axis=-1, keepdims=True)
    return (x - mu) * lax.rsqrt(var + LN_EPS) * g + b


def _new_gelu(x):
    # nanoGPT tanh-approx GELU
    return 0.5 * x * (1.0 + jnp.tanh(
        math.sqrt(2.0 / math.pi) * (x + 0.044715 * x * x * x)))


# --------------------------- pass 1: LN1 + fused QKV -------------------------
def qkv_kernel(x_ref, g_ref, b_ref, wqkv_ref, bqkv_ref, q_ref, k_ref, v_ref):
    n_embd = q_ref.shape[-1]
    h = _layernorm(x_ref[...], g_ref[...], b_ref[...])            # (tq1, C) f32
    qkv = jnp.dot(h.astype(jnp.bfloat16), wqkv_ref[...],
                  preferred_element_type=jnp.float32) + bqkv_ref[...]
    qkv = qkv.astype(jnp.bfloat16)                                # (tq1, 3C)
    # Lane-block slices (C multiple of 128) -> free splits, no host transpose.
    q_ref[...] = qkv[:, :n_embd]
    k_ref[...] = qkv[:, n_embd:2 * n_embd]
    v_ref[...] = qkv[:, 2 * n_embd:]


# -------- pass 2: flash attention + out-proj + residual + LN2 + MLP ----------
def attn_mlp_kernel(x_ref, q_ref, k_hbm, v_hbm,
                    wo_ref, bo_ref, ln2_g_ref, ln2_b_ref,
                    wfc_ref, bfc_ref, wproj_ref, bproj_ref,
                    out_ref,
                    kbuf, vbuf, sem, m_sc, l_sc, acc_sc,
                    *, tkv, n_head, head_dim):
    b_idx = pl.program_id(0)
    qi = pl.program_id(1)
    tq = q_ref.shape[0]                       # q_ref block is (tq, C)

    q_row0 = qi * tq
    q_row_last = q_row0 + tq - 1
    num_kv = q_row_last // tkv + 1            # KV tiles overlapping causal region
    num_full = q_row0 // tkv                  # KV tiles fully below the diagonal

    m_sc[...] = jnp.full_like(m_sc, NEG_INF)
    l_sc[...] = jnp.zeros_like(l_sc)
    acc_sc[...] = jnp.zeros_like(acc_sc)

    # ---- manual double-buffered K/V streaming from HBM (O(tkv*C) VMEM) ----
    def fetch(j, slot):
        start = pl.multiple_of(j * tkv, tkv)
        pltpu.make_async_copy(k_hbm.at[b_idx, pl.ds(start, tkv), :],
                              kbuf.at[slot], sem.at[0, slot]).start()
        pltpu.make_async_copy(v_hbm.at[b_idx, pl.ds(start, tkv), :],
                              vbuf.at[slot], sem.at[1, slot]).start()

    fetch(0, 0)

    def process(j, mask):
        slot = j & 1
        # Wait for the current tile (shape-matching descriptors for the wait).
        pltpu.make_async_copy(k_hbm.at[b_idx, pl.ds(0, tkv), :],
                              kbuf.at[slot], sem.at[0, slot]).wait()
        pltpu.make_async_copy(v_hbm.at[b_idx, pl.ds(0, tkv), :],
                              vbuf.at[slot], sem.at[1, slot]).wait()

        @pl.when(j + 1 < num_kv)
        def _():
            fetch(j + 1, 1 - slot)

        # One head at a time: only one (tq, tkv) score/prob tile is live,
        # bounding vreg pressure (prerequisite for larger tkv on v6e/v7x).
        for h in range(n_head):
            hs = slice(h * head_dim, (h + 1) * head_dim)
            q_h = q_ref[:, hs]                        # (tq, hd) bf16, pre-scaled
            k_h = kbuf[slot, :, hs]                   # (tkv, hd) bf16
            v_h = vbuf[slot, :, hs]
            s = lax.dot_general(q_h, k_h, (((1,), (1,)), ((), ())),
                                preferred_element_type=jnp.float32)  # (tq, tkv)
            if mask is not None:
                s = jnp.where(mask, s, NEG_INF)
            m_prev = m_sc[h]
            m_new = jnp.maximum(m_prev, jnp.max(s, axis=-1, keepdims=True))
            alpha = jnp.exp(m_prev - m_new)
            p = jnp.exp(s - m_new)
            l_sc[h] = alpha * l_sc[h] + jnp.sum(p, axis=-1, keepdims=True)
            acc_sc[h] = alpha * acc_sc[h] + jnp.dot(
                p.astype(jnp.bfloat16), v_h, preferred_element_type=jnp.float32)
            m_sc[h] = m_new

    # Fully-unmasked KV tiles: no iota / compare / select work at all.
    @pl.loop(0, num_full)
    def _(j):
        process(j, None)

    # Diagonal KV tile(s): causal mask applied (rows iota hoisted out of loop).
    rows = q_row0 + lax.broadcasted_iota(jnp.int32, (tq, tkv), 0)

    @pl.loop(num_full, num_kv)
    def _(j):
        start = pl.multiple_of(j * tkv, tkv)
        cols = start + lax.broadcasted_iota(jnp.int32, (tq, tkv), 1)
        process(j, rows >= cols)

    # ---- finalize attention, out-proj (K = C fills the MXU), residual ----
    y_heads = []
    for h in range(n_head):
        inv_l = pl.reciprocal(l_sc[h], approx=True)               # (tq, 1)
        y_heads.append((acc_sc[h] * inv_l).astype(jnp.bfloat16))  # (tq, hd)
    y = jnp.concatenate(y_heads, axis=-1)                          # (tq, C)

    x = x_ref[...]                                                 # (tq, C) f32
    att = jnp.dot(y, wo_ref[...],
                  preferred_element_type=jnp.float32) + bo_ref[...]
    x1 = x + att                                                   # residual 1

    h2 = _layernorm(x1, ln2_g_ref[...], ln2_b_ref[...])
    f = jnp.dot(h2.astype(jnp.bfloat16), wfc_ref[...],
                preferred_element_type=jnp.float32) + bfc_ref[...]
    f = _new_gelu(f)
    proj = jnp.dot(f.astype(jnp.bfloat16), wproj_ref[...],
                   preferred_element_type=jnp.float32) + bproj_ref[...]
    out_ref[...] = x1 + proj                                       # residual 2


# ------------------------------- wrapper -------------------------------------
def _vmem_limit_bytes():
    cap = 128 * 1024 * 1024
    try:
        info = pltpu.get_tpu_info()
        cap = int(getattr(info, "vmem_capacity_bytes", cap))
    except Exception:
        pass
    # ~100 MiB on 128-MiB parts (v5e/v6e); ~56 MiB on the 64-MiB/TC v7x.
    return int(min(cap - 8 * 1024 * 1024, 100 * 1024 * 1024))


def block_forward(x, params, n_head, *, tq=128, tkv=None, tq_proj=None,
                  vmem_limit_bytes=None):
    B, T, C = x.shape
    H = n_head
    assert C % H == 0, "n_embd must be divisible by n_head"
    hd = C // H
    assert C % 128 == 0, "n_embd must be a multiple of 128"
    assert hd % 128 == 0, "head_dim must be lane-aligned (demo uses hd=128)"
    if tkv is None:                       # 256 fills v6e/v7x's 256-wide MXU
        tkv = 256 if T % 256 == 0 else 128
    if tq_proj is None:                   # bigger row tiles for dense matmuls
        tq_proj = 256 if T % 256 == 0 else 128
    assert T % tq == 0 and T % tkv == 0 and T % tq_proj == 0
    if vmem_limit_bytes is None:
        vmem_limit_bytes = _vmem_limit_bytes()

    f32, bf16 = jnp.float32, jnp.bfloat16
    scale = 1.0 / math.sqrt(hd)

    # Host-side layout plumbing (done once, outside the kernels):
    #  * fuse Q/K/V into one (C, 3C) weight, pre-transposed to [in, out]
    #  * fold the 1/sqrt(hd) attention scale into the Q weight & bias
    #  * pre-transpose wo / wfc / wproj; cast all matmul weights to bf16
    wqkv = jnp.concatenate(
        [params["wq"].T * scale, params["wk"].T, params["wv"].T], axis=1
    ).astype(bf16)                                           # (C, 3C)
    bqkv = jnp.concatenate(
        [params["bq"] * scale, params["bk"], params["bv"]], axis=1
    ).astype(f32)                                            # (1, 3C)
    wo_t = params["wo"].T.astype(bf16)                       # (C, C)
    wfc_t = params["wfc"].T.astype(bf16)                     # (C, 4C)
    wproj_t = params["wproj"].T.astype(bf16)                 # (4C, C)

    cparams = pltpu.CompilerParams(
        dimension_semantics=("parallel", "parallel"),
        vmem_limit_bytes=vmem_limit_bytes)

    # ---------------- pass 1: LN1 + fused QKV projection ----------------
    q, k, v = pl.pallas_call(
        qkv_kernel,
        out_shape=(jax.ShapeDtypeStruct((B, T, C), bf16),
                   jax.ShapeDtypeStruct((B, T, C), bf16),
                   jax.ShapeDtypeStruct((B, T, C), bf16)),
        grid_spec=pltpu.PrefetchScalarGridSpec(
            num_scalar_prefetch=0,
            grid=(B, T // tq_proj),
            in_specs=[
                pl.BlockSpec((None, tq_proj, C), lambda b, i: (b, i, 0)),   # x
                pl.BlockSpec((1, C), lambda b, i: (0, 0)),                  # ln1_g
                pl.BlockSpec((1, C), lambda b, i: (0, 0)),                  # ln1_b
                pl.BlockSpec((C, 3 * C), lambda b, i: (0, 0)),              # wqkv
                pl.BlockSpec((1, 3 * C), lambda b, i: (0, 0)),              # bqkv
            ],
            out_specs=[
                pl.BlockSpec((None, tq_proj, C), lambda b, i: (b, i, 0)),   # q
                pl.BlockSpec((None, tq_proj, C), lambda b, i: (b, i, 0)),   # k
                pl.BlockSpec((None, tq_proj, C), lambda b, i: (b, i, 0)),   # v
            ],
        ),
        compiler_params=cparams,
    )(x, params["ln1_g"], params["ln1_b"], wqkv, bqkv)

    # -------- pass 2: flash attention + out-proj + LN2 + MLP + residuals -----
    out = pl.pallas_call(
        functools.partial(attn_mlp_kernel, tkv=tkv, n_head=H, head_dim=hd),
        out_shape=jax.ShapeDtypeStruct((B, T, C), f32),
        grid_spec=pltpu.PrefetchScalarGridSpec(
            num_scalar_prefetch=0,
            grid=(B, T // tq),
            in_specs=[
                pl.BlockSpec((None, tq, C), lambda b, i: (b, i, 0)),        # x
                pl.BlockSpec((None, tq, C), lambda b, i: (b, i, 0)),        # q
                pl.BlockSpec(memory_space=pl.ANY),                          # k (HBM)
                pl.BlockSpec(memory_space=pl.ANY),                          # v (HBM)
                pl.BlockSpec((C, C), lambda b, i: (0, 0)),                  # wo
                pl.BlockSpec((1, C), lambda b, i: (0, 0)),                  # bo
                pl.BlockSpec((1, C), lambda b, i: (0, 0)),                  # ln2_g
                pl.BlockSpec((1, C), lambda b, i: (0, 0)),                  # ln2_b
                pl.BlockSpec((C, 4 * C), lambda b, i: (0, 0)),              # wfc
                pl.BlockSpec((1, 4 * C), lambda b, i: (0, 0)),              # bfc
                pl.BlockSpec((4 * C, C), lambda b, i: (0, 0)),              # wproj
                pl.BlockSpec((1, C), lambda b, i: (0, 0)),                  # bproj
            ],
            out_specs=pl.BlockSpec((None, tq, C), lambda b, i: (b, i, 0)),
            scratch_shapes=[
                pltpu.VMEM((2, tkv, C), bf16),          # K tile double buffer
                pltpu.VMEM((2, tkv, C), bf16),          # V tile double buffer
                pltpu.SemaphoreType.DMA((2, 2)),        # [k/v, slot] DMA sems
                pltpu.VMEM((H, tq, 1), jnp.float32),    # running max
                pltpu.VMEM((H, tq, 1), jnp.float32),    # running sum
                pltpu.VMEM((H, tq, hd), jnp.float32),   # attention accumulator
            ],
        ),
        compiler_params=cparams,
    )(x, q, k, v, wo_t, params["bo"], params["ln2_g"], params["ln2_b"],
      wfc_t, params["bfc"], wproj_t, params["bproj"])
    return out


# -------------------- pure-JAX reference (for verification) ------------------
def block_reference(x, params, n_head):
    B, T, C = x.shape
    hd = C // n_head

    def ln(h, g, b):
        mu = jnp.mean(h, -1, keepdims=True)
        var = jnp.mean((h - mu) ** 2, -1, keepdims=True)
        return (h - mu) / jnp.sqrt(var + LN_EPS) * g + b

    h = ln(x, params["ln1_g"], params["ln1_b"])
    q = h @ params["wq"].T + params["bq"]
    k = h @ params["wk"].T + params["bk"]
    v = h @ params["wv"].T + params["bv"]
    q = q.reshape(B, T, n_head, hd).transpose(0, 2, 1, 3)
    k = k.reshape(B, T, n_head, hd).transpose(0, 2, 1, 3)
    v = v.reshape(B, T, n_head, hd).transpose(0, 2, 1, 3)
    att = jnp.einsum("bhtd,bhsd->bhts", q, k) / math.sqrt(hd)
    mask = jnp.tril(jnp.ones((T, T), bool))
    att = jnp.where(mask, att, -jnp.inf)
    att = jax.nn.softmax(att, -1)
    y = jnp.einsum("bhts,bhsd->bhtd", att, v)
    y = y.transpose(0, 2, 1, 3).reshape(B, T, C)
    y = y @ params["wo"].T + params["bo"]
    x = x + y
    h2 = ln(x, params["ln2_g"], params["ln2_b"])
    f = h2 @ params["wfc"].T + params["bfc"]
    f = _new_gelu(f)
    p = f @ params["wproj"].T + params["bproj"]
    return x + p


def init_params(key, n_embd, n_head):
    ks = jax.random.split(key, 8)
    s = 0.02
    C = n_embd
    return {
        "ln1_g": jnp.ones((1, C), jnp.float32),
        "ln1_b": jnp.zeros((1, C), jnp.float32),
        "wq": s * jax.random.normal(ks[0], (C, C), jnp.float32),
        "bq": jnp.zeros((1, C), jnp.float32),
        "wk": s * jax.random.normal(ks[1], (C, C), jnp.float32),
        "bk": jnp.zeros((1, C), jnp.float32),
        "wv": s * jax.random.normal(ks[2], (C, C), jnp.float32),
        "bv": jnp.zeros((1, C), jnp.float32),
        "wo": s * jax.random.normal(ks[3], (C, C), jnp.float32),
        "bo": jnp.zeros((1, C), jnp.float32),
        "ln2_g": jnp.ones((1, C), jnp.float32),
        "ln2_b": jnp.zeros((1, C), jnp.float32),
        "wfc": s * jax.random.normal(ks[4], (4 * C, C), jnp.float32),
        "bfc": jnp.zeros((1, 4 * C), jnp.float32),
        "wproj": s * jax.random.normal(ks[5], (C, 4 * C), jnp.float32),
        "bproj": jnp.zeros((1, C), jnp.float32),
    }


if __name__ == "__main__":
    # Small shapes consistent with the module: [B, T, C], lane-aligned head_dim
    # (hd = 128), C a multiple of 128, T a multiple of the row/KV tiles.
    # T=512 with tkv=256 exercises both the unmasked and the diagonal KV loops
    # and the double-buffered K/V prefetch.
    B, T, C, n_head = 2, 512, 256, 2
    key = jax.random.PRNGKey(0)
    kx, kp = jax.random.split(key)
    x = jax.random.normal(kx, (B, T, C), jnp.float32)
    params = init_params(kp, C, n_head)

    out = block_forward(x, params, n_head)
    out = jax.block_until_ready(out)

    ref = block_reference(x, params, n_head)
    assert out.shape == (B, T, C)
    max_err = float(jnp.max(jnp.abs(out - ref)))
    # bf16 MXU operands (f32 accumulation) -> compare with a bf16-level tolerance
    assert jnp.allclose(out, ref, rtol=2e-2, atol=2e-2), \
        f"mismatch vs reference (max abs err {max_err})"

    print("KERNEL_OK")
</pallas_src>

<mosaic_0001>
module attributes {stable_mosaic.version = 11 : i64} {
  func.func @qkv_kernel(%arg0: i32, %arg1: i32, %arg2: memref<1x256x256xf32, #tpu.memory_space<vmem>>, %arg3: memref<1x256xf32, #tpu.memory_space<vmem>>, %arg4: memref<1x256xf32, #tpu.memory_space<vmem>>, %arg5: memref<256x768xbf16, #tpu.memory_space<vmem>>, %arg6: memref<1x768xf32, #tpu.memory_space<vmem>>, %arg7: memref<1x256x256xbf16, #tpu.memory_space<vmem>>, %arg8: memref<1x256x256xbf16, #tpu.memory_space<vmem>>, %arg9: memref<1x256x256xbf16, #tpu.memory_space<vmem>>) attributes {dimension_semantics = [#tpu.dimension_semantics<parallel>, #tpu.dimension_semantics<parallel>], iteration_bounds = array<i64: 2, 2>, scalar_prefetch = 0 : i64, scratch_operands = 0 : i64, tpu.core_type = #tpu.core_type<tc>, window_params = [{transform_indices = @transform_0, window_bounds = array<i64: 1, 256, 256>}, {pipeline_mode = #tpu.pipeline_mode<synchronous>, transform_indices = @transform_1, window_bounds = array<i64: 1, 256>}, {pipeline_mode = #tpu.pipeline_mode<synchronous>, transform_indices = @transform_2, window_bounds = array<i64: 1, 256>}, {pipeline_mode = #tpu.pipeline_mode<synchronous>, transform_indices = @transform_3, window_bounds = array<i64: 256, 768>}, {pipeline_mode = #tpu.pipeline_mode<synchronous>, transform_indices = @transform_4, window_bounds = array<i64: 1, 768>}, {transform_indices = @transform_5, window_bounds = array<i64: 1, 256, 256>}, {transform_indices = @transform_6, window_bounds = array<i64: 1, 256, 256>}, {transform_indices = @transform_7, window_bounds = array<i64: 1, 256, 256>}]} {
    %c0 = arith.constant 0 : index
    %c0_0 = arith.constant 0 : index
    %c0_1 = arith.constant 0 : index
    %0 = vector.load %arg2[%c0, %c0_0, %c0_1] : memref<1x256x256xf32, #tpu.memory_space<vmem>>, vector<1x256x256xf32>
    %1 = vector.shape_cast %0 : vector<1x256x256xf32> to vector<256x256xf32>
    %c0_2 = arith.constant 0 : index
    %c0_3 = arith.constant 0 : index
    %2 = vector.load %arg3[%c0_2, %c0_3] : memref<1x256xf32, #tpu.memory_space<vmem>>, vector<1x256xf32>
    %c0_4 = arith.constant 0 : index
    %c0_5 = arith.constant 0 : index
    %3 = vector.load %arg4[%c0_4, %c0_5] : memref<1x256xf32, #tpu.memory_space<vmem>>, vector<1x256xf32>
    %cst = arith.constant dense<0.000000e+00> : vector<256xf32>
    %4 = vector.multi_reduction <add>, %1, %cst [1] : vector<256x256xf32> to vector<256xf32>
    %5 = vector.shape_cast %4 : vector<256xf32> to vector<256x1xf32>
    %cst_6 = arith.constant 2.560000e+02 : f32
    %6 = vector.broadcast %cst_6 : f32 to vector<256x1xf32>
    %7 = arith.divf %5, %6 : vector<256x1xf32>
    %8 = vector.broadcast %7 : vector<256x1xf32> to vector<256x256xf32>
    %9 = arith.subf %1, %8 : vector<256x256xf32>
    %10 = arith.mulf %9, %9 : vector<256x256xf32>
    %cst_7 = arith.constant dense<0.000000e+00> : vector<256xf32>
    %11 = vector.multi_reduction <add>, %10, %cst_7 [1] : vector<256x256xf32> to vector<256xf32>
    %12 = vector.shape_cast %11 : vector<256xf32> to vector<256x1xf32>
    %cst_8 = arith.constant 2.560000e+02 : f32
    %13 = vector.broadcast %cst_8 : f32 to vector<256x1xf32>
    %14 = arith.divf %12, %13 : vector<256x1xf32>
    %15 = vector.broadcast %7 : vector<256x1xf32> to vector<256x256xf32>
    %16 = arith.subf %1, %15 : vector<256x256xf32>
    %cst_9 = arith.constant 9.99999974E-6 : f32
    %17 = vector.broadcast %cst_9 : f32 to vector<256x1xf32>
    %18 = arith.addf %14, %17 : vector<256x1xf32>
    %19 = math.rsqrt %18 : vector<256x1xf32>
    %20 = vector.broadcast %19 : vector<256x1xf32> to vector<256x256xf32>
    %21 = arith.mulf %16, %20 : vector<256x256xf32>
    %22 = vector.broadcast %2 : vector<1x256xf32> to vector<256x256xf32>
    %23 = arith.mulf %21, %22 : vector<256x256xf32>
    %24 = vector.broadcast %3 : vector<1x256xf32> to vector<256x256xf32>
    %25 = arith.addf %23, %24 : vector<256x256xf32>
    %26 = arith.truncf %25 : vector<256x256xf32> to vector<256x256xbf16>
    %c0_10 = arith.constant 0 : index
    %c0_11 = arith.constant 0 : index
    %27 = vector.load %arg5[%c0_10, %c0_11] : memref<256x768xbf16, #tpu.memory_space<vmem>>, vector<256x768xbf16>
    %cst_12 = arith.constant dense<0.000000e+00> : vector<256x768xf32>
    %28 = tpu.matmul %26, %27, %cst_12 {dimension_numbers = #tpu.dot_dimension_numbers<[1], [0], [0], [1], [0, 0, 1, 1], [], []>} : vector<256x256xbf16>, vector<256x768xbf16>, vector<256x768xf32> -> vector<256x768xf32>
    %c0_13 = arith.constant 0 : index
    %c0_14 = arith.constant 0 : index
    %29 = vector.load %arg6[%c0_13, %c0_14] : memref<1x768xf32, #tpu.memory_space<vmem>>, vector<1x768xf32>
    %30 = vector.broadcast %29 : vector<1x768xf32> to vector<256x768xf32>
    %31 = arith.addf %28, %30 : vector<256x768xf32>
    %32 = arith.truncf %31 : vector<256x768xf32> to vector<256x768xbf16>
    %33 = vector.extract_strided_slice %32 {offsets = [0, 0], sizes = [256, 256], strides = [1, 1]} : vector<256x768xbf16> to vector<256x256xbf16>
    %c0_15 = arith.constant 0 : index
    %c0_16 = arith.constant 0 : index
    %c0_17 = arith.constant 0 : index
    %34 = vector.load %arg7[%c0_15, %c0_16, %c0_17] : memref<1x256x256xbf16, #tpu.memory_space<vmem>>, vector<1x256x256xbf16>
    %35 = vector.shape_cast %34 : vector<1x256x256xbf16> to vector<256x256xbf16>
    %36 = vector.shape_cast %33 : vector<256x256xbf16> to vector<1x256x256xbf16>
    tpu.vector_store %arg7[%c0_15, %c0_16, %c0_17], %36 {strides = array<i32>} : memref<1x256x256xbf16, #tpu.memory_space<vmem>>, vector<1x256x256xbf16>,
    %37 = vector.extract_strided_slice %32 {offsets = [0, 256], sizes = [256, 256], strides = [1, 1]} : vector<256x768xbf16> to vector<256x256xbf16>
    %c0_18 = arith.constant 0 : index
    %c0_19 = arith.constant 0 : index
    %c0_20 = arith.constant 0 : index
    %38 = vector.load %arg8[%c0_18, %c0_19, %c0_20] : memref<1x256x256xbf16, #tpu.memory_space<vmem>>, vector<1x256x256xbf16>
    %39 = vector.shape_cast %38 : vector<1x256x256xbf16> to vector<256x256xbf16>
    %40 = vector.shape_cast %37 : vector<256x256xbf16> to vector<1x256x256xbf16>
    tpu.vector_store %arg8[%c0_18, %c0_19, %c0_20], %40 {strides = array<i32>} : memref<1x256x256xbf16, #tpu.memory_space<vmem>>, vector<1x256x256xbf16>,
    %41 = vector.extract_strided_slice %32 {offsets = [0, 512], sizes = [256, 256], strides = [1, 1]} : vector<256x768xbf16> to vector<256x256xbf16>
    %c0_21 = arith.constant 0 : index
    %c0_22 = arith.constant 0 : index
    %c0_23 = arith.constant 0 : index
    %42 = vector.load %arg9[%c0_21, %c0_22, %c0_23] : memref<1x256x256xbf16, #tpu.memory_space<vmem>>, vector<1x256x256xbf16>
    %43 = vector.shape_cast %42 : vector<1x256x256xbf16> to vector<256x256xbf16>
    %44 = vector.shape_cast %41 : vector<256x256xbf16> to vector<1x256x256xbf16>
    tpu.vector_store %arg9[%c0_21, %c0_22, %c0_23], %44 {strides = array<i32>} : memref<1x256x256xbf16, #tpu.memory_space<vmem>>, vector<1x256x256xbf16>,
    return
  }
  func.func @transform_0(%arg0: i32, %arg1: i32) -> (i32, i32, i32) {
    %c0_i32 = arith.constant 0 : i32
    %c0_i32_0 = arith.constant 0 : i32
    return %arg0, %arg1, %c0_i32 : i32, i32, i32
  }
  func.func @transform_1(%arg0: i32, %arg1: i32) -> (i32, i32) {
    %c0_i32 = arith.constant 0 : i32
    %c0_i32_0 = arith.constant 0 : i32
    %c0_i32_1 = arith.constant 0 : i32
    return %c0_i32, %c0_i32_0 : i32, i32
  }
  func.func @transform_2(%arg0: i32, %arg1: i32) -> (i32, i32) {
    %c0_i32 = arith.constant 0 : i32
    %c0_i32_0 = arith.constant 0 : i32
    %c0_i32_1 = arith.constant 0 : i32
    return %c0_i32, %c0_i32_0 : i32, i32
  }
  func.func @transform_3(%arg0: i32, %arg1: i32) -> (i32, i32) {
    %c0_i32 = arith.constant 0 : i32
    %c0_i32_0 = arith.constant 0 : i32
    %c0_i32_1 = arith.constant 0 : i32
    return %c0_i32, %c0_i32_0 : i32, i32
  }
  func.func @transform_4(%arg0: i32, %arg1: i32) -> (i32, i32) {
    %c0_i32 = arith.constant 0 : i32
    %c0_i32_0 = arith.constant 0 : i32
    %c0_i32_1 = arith.constant 0 : i32
    return %c0_i32, %c0_i32_0 : i32, i32
  }
  func.func @transform_5(%arg0: i32, %arg1: i32) -> (i32, i32, i32) {
    %c0_i32 = arith.constant 0 : i32
    %c0_i32_0 = arith.constant 0 : i32
    return %arg0, %arg1, %c0_i32 : i32, i32, i32
  }
  func.func @transform_6(%arg0: i32, %arg1: i32) -> (i32, i32, i32) {
    %c0_i32 = arith.constant 0 : i32
    %c0_i32_0 = arith.constant 0 : i32
    return %arg0, %arg1, %c0_i32 : i32, i32, i32
  }
  func.func @transform_7(%arg0: i32, %arg1: i32) -> (i32, i32, i32) {
    %c0_i32 = arith.constant 0 : i32
    %c0_i32_0 = arith.constant 0 : i32
    return %arg0, %arg1, %c0_i32 : i32, i32, i32
  }
}

</mosaic_0001>

<bundles_post_ra>
// kernel: tpu_custom_call.1
= control target key start
LH: loop header
LB: loop body
LE: loop exit
PB: predicated region body
PF: predicated region fallthrough
CT: control target
= control target key end

     0   :  { %s6076_s0 = inlined_call_operand.hbm [shape: f32[2,512,256], index: 0, kind: input, shape index: {}]   ;;  %s6077_s1 = inlined_call_operand.hbm [shape: f32[1,256], index: 1, kind: input, shape index: {}]   ;;  %s6078_s2 = inlined_call_operand.hbm [shape: f32[1,256], index: 2, kind: input, shape index: {}]   ;;  %s6079_s3 = inlined_call_operand.hbm [shape: bf16[256,768], index: 3, kind: input, shape index: {}]   ;;  %s6080_s4 = inlined_call_operand.hbm [shape: f32[1,768], index: 4, kind: input, shape index: {}]   ;;  %s6081_s5 = inlined_call_operand.hbm [shape: bf16[2,512,256], index: 5, kind: output, shape index: {0}]   ;;  %s6082_s6 = inlined_call_operand.hbm [shape: bf16[2,512,256], index: 6, kind: output, shape index: {1}]   ;;  %s6083_s7 = inlined_call_operand.hbm [shape: bf16[2,512,256], index: 7, kind: output, shape index: {2}]  }
   0x1   :  { %6138 = sst [smem:[#allocation53_spill]] %s6077_s1 }
   0x2   :  { %6139 = sst [smem:[#allocation54_spill]] %s6078_s2 }
   0x3   :  { %6140 = sst [smem:[#allocation55_spill]] %s6079_s3 }
   0x4   :  { %6141 = sst [smem:[#allocation56_spill]] %s6080_s4 }
   0x5   :  { %6142 = sst [smem:[#allocation57_spill]] %s6082_s6 }
   0x6   :  { %6143 = sst [smem:[#allocation58_spill]] %s6083_s7 }
   0x7   :  { %13 = vsyncpa [#allocation3], 0 }
   0x8   :  { %15 = vsyncpa [#allocation3 + $0x1], 0 }
   0x9   :  { %16 = vsyncpa [#allocation6], 0 }
   0xa   :  { %17 = vsyncpa [#allocation9], 0 }
   0xb   :  { %18 = vsyncpa [#allocation4], 0 }
   0xc   :  { %20 = vsyncpa [#allocation4 + $0x1], 0 }
   0xd   :  { %21 = vsyncpa [#allocation13], 0 }
   0xe   :  { %23 = vsyncpa [#allocation13 + $0x1], 0  ;;  %s4344_s24 = smov 0   ;;  %s4346_s25 = smov 0  }
   0xf   :  { %s4348_s26 = smov 0   ;;  %s4350_s27 = smov 0  }
  0x10   :  { %s4352_s28 = smov 0   ;;  %s4354_s29 = smov 0  }
  0x11   :  { %s4356_s30 = smov 0   ;;  %s4358_s8 = smov 0  }
  0x12 LB: > { %6144 = sst [smem:[#allocation20_spill]] %s4260_s24  ;;  %s4385_s9 = sadd.s32 4294967295, %s4288_s8   ;;  %s4288_s8 = sphi %s4358_s8, %s29_s8   ;;  %s4284_s30 = sphi %s4356_s30, %s6266_s30   ;;  %s4280_s29 = sphi %s4354_s29, %s6265_s29   ;;  %s4276_s28 = sphi %s4352_s28, %s6264_s28   ;;  %s4272_s27 = sphi %s4350_s27, %s6263_s27   ;;  %s4268_s26 = sphi %s4348_s26, %s6262_s26   ;;  %s4264_s25 = sphi %s4346_s25, %s6261_s25   ;;  %s4260_s24 = sphi %s4344_s24, %s6260_s24  }
  0x13   : > { %s6084_s10 = sadd.s32 4294967294, %s4288_s8   ;;  %p63_p0 = scmp.ne.s32.totalorder %s4264_s25, %s4260_s24 }
  0x14   : > { %p6086_p1 = scmp.eq.s32.totalorder %s4385_s9, 0  ;;  %p179_p3 = scmp.eq.s32.totalorder %s6084_s10, 3 }
  0x15   : > { %p3276_p5 = scmp.ge.s32.totalorder %s4288_s8, 1  ;;  %p242_p7 = scmp.lt.s32.totalorder %s4288_s8, 5 }
  0x16   : > { %p4396_p4 = por %p6086_p1, %p63_p0  ;;  %p4401_p6 = por %p179_p3, %p63_p0 }
  0x17   : > { %p4406_p8 = pnand %p3276_p5, %p242_p7  ;;  %s4290_s14 = smov [#allocation5]  }
  0x18   : > { %s6145_s11 = scalar_select %p4396_p4, 1, 0 }
  0x19   : > { %s6146_s12 = scalar_select %p4401_p6, 1, 0 }
  0x1a   : > { %s6148_s13 = scalar_select %p4406_p8, 1, 0 }
  0x1b   : > { %6147 = sst [smem:[#allocation21_spill]] %s6146_s12  ;;  %s255_s15 = sshll.u32 %s4290_s14, 4  ;;  %s256_s15 = int_to_ptr.vmem [resolvable:$true] %s255_s15 }
  0x1c   : > { %p3661_p9 = pneg %p4406_p8  ;;  %s4291_s16 = smov [#allocation8]  }
  0x1d   : > { %s276_s17 = sshll.u32 %s4291_s16, 4  ;;  %s4292_s19 = smov [#allocation7]   ;;  %s4418_s17 = int_to_ptr.vmem [resolvable:$true] %s276_s17 }
  0x1e   : > { %p4414_p10 = pnand %p3661_p9, %p6086_p1  ;;  %s4420_s20 = sshll.u32 %s4292_s19, 4  ;;  %s267_s20 = int_to_ptr.vmem [resolvable:$true] %s4420_s20 }
  0x1f   : > { %s6150_s1 = sld [smem:[#allocation53_spill]] }
  0x20   : > { %p4430_p12 = pneg %p4414_p10 }
  0x25   : > { %s3980_s23 = scalar_lea.hbm %s6150_s1, 32 }
  0x26   : > { %p3981_p11 = scmp.ne.s32.totalorder %s6150_s1, %s3980_s23  ;;  %p3987_p3 = scmp.lt.u32.totalorder %s3980_s23, %s6150_s1 }
  0x28   : > { %p3983_p13 = pnand %p4430_p12, %p3981_p11 }
  0x2a   : > { %p3984_p0 = pneg %p3983_p13 }
  0x2c   : > { %p3989_p5 = pnand %p3987_p3, %p3984_p0 }
  0x2e   : > { %3992 = shalt.err (!%p3989_p5)
}
  0x2f   : > { %s3993_s21 = scalar_lea.vmem %s256_s15, 32  ;;  %p4001_p2 = scmp.lt.s32.totalorder %s256_s15, %s256_s15 }
  0x30   : > { %p3994_p7 = scmp.ne.s32.totalorder %s256_s15, %s3993_s21  ;;  %p4002_p6 = scmp.lt.s32.totalorder %s3993_s21, %s3993_s21 }
  0x32   : > { %p3996_p9 = pnand %p3994_p7, %p4430_p12  ;;  %p4003_p4 = por %p4002_p6, %p4001_p2 }
  0x34   : > { %p3997_p1 = pneg %p3996_p9 }
  0x36   : > { %p4004_p8 = pnand %p4003_p4, %p3997_p1 }
  0x38   : > { %4007 = shalt.err (!%p4004_p8)
}
  0x39   : > { %3664 = dma.hbm_to_vmem [thread:$0]  (!%p4414_p10), %s6150_s1, 32, %s256_s15, [#allocation6]  }
  0x3a   : > { %s6152_s3 = sld [smem:[#allocation55_spill]] }
  0x40   : > { %s4008_s14 = scalar_lea.hbm %s6152_s3, 12288 }
  0x41   : > { %p4009_p11 = scmp.ne.s32.totalorder %s6152_s3, %s4008_s14  ;;  %p4015_p1 = scmp.lt.u32.totalorder %s4008_s14, %s6152_s3 }
  0x43   : > { %p4011_p13 = pnand %p4009_p11, %p4430_p12 }
  0x45   : > { %p4012_p2 = pneg %p4011_p13 }
  0x47   : > { %p4017_p4 = pnand %p4015_p1, %p4012_p2 }
  0x49   : > { %4020 = shalt.err (!%p4017_p4)
}
  0x4a   : > { %s4021_s15 = scalar_lea.vmem %s4418_s17, 12288  ;;  %p4029_p3 = scmp.lt.s32.totalorder %s4418_s17, %s4418_s17 }
  0x4b   : > { %p4022_p6 = scmp.ne.s32.totalorder %s4418_s17, %s4021_s15  ;;  %p4030_p5 = scmp.lt.s32.totalorder %s4021_s15, %s4021_s15 }
  0x4d   : > { %p4024_p8 = pnand %p4022_p6, %p4430_p12  ;;  %p4031_p7 = por %p4030_p5, %p4029_p3 }
  0x4f   : > { %p4025_p0 = pneg %p4024_p8 }
  0x51   : > { %p4032_p9 = pnand %p4031_p7, %p4025_p0 }
  0x53   : > { %4035 = shalt.err (!%p4032_p9)
}
  0x54   : > { %s4293_s24 = smov 384   ;;  %s4294_s7 = smov 24  }
  0x55   : > { %3670 = dma.hbm_to_vmem [thread:$0]  (!%p4414_p10), %s6152_s3, 12288, %s4418_s17, [#allocation9], %s4293_s24, %s4293_s24, %s4294_s7  }
  0x56   : > { %s6153_s2 = sld [smem:[#allocation54_spill]] }
  0x5c   : > { %s4036_s14 = scalar_lea.hbm %s6153_s2, 32 }
  0x5d   : > { %p4037_p11 = scmp.ne.s32.totalorder %s6153_s2, %s4036_s14  ;;  %p4043_p1 = scmp.lt.u32.totalorder %s4036_s14, %s6153_s2 }
  0x5f   : > { %p4039_p13 = pnand %p4037_p11, %p4430_p12 }
  0x61   : > { %p4040_p2 = pneg %p4039_p13 }
  0x63   : > { %p4045_p4 = pnand %p4043_p1, %p4040_p2 }
  0x65   : > { %4048 = shalt.err (!%p4045_p4)
}
  0x66   : > { %s4049_s10 = scalar_lea.vmem %s267_s20, 32  ;;  %p4057_p3 = scmp.lt.s32.totalorder %s267_s20, %s267_s20 }
  0x67   : > { %p4050_p6 = scmp.ne.s32.totalorder %s267_s20, %s4049_s10  ;;  %p4058_p5 = scmp.lt.s32.totalorder %s4049_s10, %s4049_s10 }
  0x69   : > { %p4052_p8 = pnand %p4050_p6, %p4430_p12  ;;  %p4059_p7 = por %p4058_p5, %p4057_p3 }
  0x6b   : > { %p4053_p0 = pneg %p4052_p8 }
  0x6d   : > { %p4060_p9 = pnand %p4059_p7, %p4053_p0 }
  0x6f   : > { %4063 = shalt.err (!%p4060_p9)
}
  0x70   : > { %3667 = dma.hbm_to_vmem [thread:$0]  (!%p4414_p10), %s6153_s2, 32, %s267_s20, [#allocation6]  }
  0x71   : > { %s4295_s1 = smov [#allocation10]   ;;  %s6154_s4 = sld [smem:[#allocation56_spill]] }
  0x72   : > { %s290_s7 = sshll.u32 %s4295_s1, 4  ;;  %s291_s7 = int_to_ptr.vmem [resolvable:$true] %s290_s7 }
  0x77   : > { %s4064_s23 = scalar_lea.hbm %s6154_s4, 96 }
  0x78   : > { %p4065_p11 = scmp.ne.s32.totalorder %s6154_s4, %s4064_s23  ;;  %p4071_p1 = scmp.lt.u32.totalorder %s4064_s23, %s6154_s4 }
  0x7a   : > { %p4067_p13 = pnand %p4065_p11, %p4430_p12 }
  0x7c   : > { %p4068_p2 = pneg %p4067_p13 }
  0x7e   : > { %p4073_p4 = pnand %p4071_p1, %p4068_p2 }
  0x80   : > { %4076 = shalt.err (!%p4073_p4)
}
  0x81   : > { %s4077_s20 = scalar_lea.vmem %s291_s7, 96  ;;  %p4085_p3 = scmp.lt.s32.totalorder %s291_s7, %s291_s7 }
  0x82   : > { %p4078_p6 = scmp.ne.s32.totalorder %s291_s7, %s4077_s20  ;;  %p4086_p5 = scmp.lt.s32.totalorder %s4077_s20, %s4077_s20 }
  0x84   : > { %p4080_p8 = pnand %p4078_p6, %p4430_p12  ;;  %p4087_p7 = por %p4086_p5, %p4085_p3 }
  0x86   : > { %p4081_p0 = pneg %p4080_p8 }
  0x88   : > { %p4088_p9 = pnand %p4087_p7, %p4081_p0 }
  0x8a   : > { %4091 = shalt.err (!%p4088_p9)
}
  0x8b   : > { %3673 = dma.hbm_to_vmem [thread:$0]  (!%p4414_p10), %s6154_s4, 96, %s291_s7, [#allocation9]  }
  0x8c   : > { %s38_s16 = sadd.s32 1, %s4280_s29  ;;  %s41_s24 = sadd.s32 1, %s4284_s30 }
  0x8d   : > { %p39_p12 = scmp.ge.s32.totalorder %s38_s16, 2  ;;  %s50_s18 = sadd.s32 1, %s4268_s26 }
  0x8e   : > { %p57_p11 = scmp.ne.s32.totalorder %s4268_s26, %s4264_s25  ;;  %p58_p13 = scmp.eq.s32.totalorder %s4288_s8, 0 }
  0x8f   : > { %s6268_s16 = smov (%p39_p12, %s38_s16), 0  ;;  %s6270_s24 = smov (!%p39_p12, %s41_s24), %s4284_s30 }
  0x90   : > { %6155 = sst [smem:[#allocation22_spill]] %s6268_s16  ;;  %s46_s1 = ssub.s32 %s4280_s29, %s6268_s16 }
  0x91   : > { %p4517_p2 = por %p58_p13, %p57_p11  ;;  %p43_p10 = scmp.ge.s32.totalorder %s6270_s24, 2 }
  0x92   : > { %p6157_p1 = scmp.eq.s32.totalorder %s4385_s9, 3  ;;  %p3692_p6 = scmp.lt.s32.totalorder %s4288_s8, 4 }
  0x93   : > { %s301_s12 = sand.u32 1, %s4268_s26   ;;  %s6272_s24 = smov (%p43_p10, %s6270_s24), 0 }
  0x94   : > { %p4523_p4 = por %p6157_p1, %p57_p11  ;;  %s3282_s23 = sshll.u32 %s301_s12, 9 }
  0x95   : > { %s45_s14 = ssub.s32 %s4284_s30, %s6272_s24  ;;  %s3505_s21 = sshll.u32 %s4280_s29, 6 }
  0x96   : > { %s47_s19 = sor.u32 %s46_s1, %s45_s14  ;;  %s3285_s15 = sshll.u32 %s4284_s30, 7 }
  0x97   : > { %p48_p8 = scmp.eq.s32.totalorder %s47_s19, 0  ;;  %s312_s20 = sadd.s32 %s3505_s21, %s3285_s15 }
  0x98   : > { %s305_s10 = scalar_lea.vmem [#allocation2], %s3282_s23  ;;  %s3286_s3 = sshll.u32 %s312_s20, 7 }
  0x99   : > { %s315_s17 = sshll.u32 %s305_s10, 4  ;;  %s4543_s6 = scalar_lea.hbm %s6076_s0, %s3286_s3  ;;  %s4538_s17 = int_to_ptr.vmem [resolvable:$true] %s315_s17 }
  0x9a   : > { %s4536_s2 = scalar_select %p48_p8, %s4268_s26, %s50_s18  }
  0x9b   : > { %p4549_p0 = pnand %p3692_p6, %p4517_p2  ;;  %s4553_s18 = scalar_lea.sflag [#allocation3], %s301_s12 }
  0x9c   : > { %s4092_s23 = scalar_lea.hbm %s4543_s6, 8192  ;;  %s4097_s16 = scalar_lea.hbm %s6076_s0, 32768 }
  0x9d   : > { %p4093_p3 = scmp.ne.s32.totalorder %s4543_s6, %s4092_s23  ;;  %p4094_p5 = pneg %p4549_p0 }
  0x9e   : > { %p4098_p12 = scmp.lt.u32.totalorder %s4543_s6, %s6076_s0  ;;  %p4099_p11 = scmp.lt.u32.totalorder %s4097_s16, %s4092_s23 }
  0x9f   : > { %p4095_p7 = pnand %p4094_p5, %p4093_p3  ;;  %p4101_p2 = scmp.lt.u32.totalorder %s4092_s23, %s4543_s6 }
  0xa0   : > { %p4100_p13 = por %p4099_p11, %p4098_p12 }
  0xa1   : > { %p4096_p9 = pneg %p4095_p7 }
  0xa2   : > { %p4102_p10 = por %p4101_p2, %p4100_p13 }
  0xa4   : > { %p4103_p1 = pnand %p4102_p10, %p4096_p9 }
  0xa6   : > { %4106 = shalt.err (!%p4103_p1)
}
  0xa7   : > { %s4107_s12 = scalar_lea.vmem %s4538_s17, 8192  ;;  %s4296_s19 = smov [#allocation2]  }
  0xa8   : > { %p4108_p6 = scmp.ne.s32.totalorder %s4538_s17, %s4107_s12  ;;  %s4112_s21 = sshll.u32 %s4296_s19, 4  ;;  %s4113_s21 = int_to_ptr.vmem [resolvable:$false] %s4112_s21 }
  0xa9   : > { %s4114_s15 = scalar_lea.vmem %s4113_s21, 16384  ;;  %p4115_p7 = scmp.lt.s32.totalorder %s4538_s17, %s4113_s21 }
  0xaa   : > { %p4110_p8 = pnand %p4108_p6, %p4094_p5  ;;  %p4116_p12 = scmp.lt.s32.totalorder %s4114_s15, %s4107_s12 }
  0xac   : > { %p4111_p3 = pneg %p4110_p8  ;;  %p4117_p11 = por %p4116_p12, %p4115_p7 }
  0xae   : > { %p4118_p13 = pnand %p4117_p11, %p4111_p3 }
  0xb0   : > { %4121 = shalt.err (!%p4118_p13)
}
  0xb1   : > { %s4297_s20 = smov 256   ;;  %s4298_s10 = smov 16  }
  0xb2   : > { %3677 = dma.hbm_to_vmem [thread:$0]  (!%p4549_p0), %s4543_s6, 8192, %s4538_s17, %s4553_s18, %s4297_s20, %s4297_s20, %s4298_s10  }
  0xb3   : > { %p6160_p5 = scmp.ne.s32.totalorder %s6148_s13, 0 }
  0xb5   : > { %327 = sbr.rel (%p6160_p5) target bundleno = 974 (0x3ce), region = 40 }
  0xbc   : > { %s4584_s23 = sand.u32 1, %s4264_s25   ;;  %p6161_p9 = scmp.ne.s32.totalorder %s6145_s11, 0 }
  0xbd   : > { %s3288_s3 = sshll.u32 %s4584_s23, 9  ;;  %s330_s4 = scalar_lea.sflag [#allocation3], %s4584_s23 }
  0xbe   : > { %s4588_s16 = scalar_lea.vmem [#allocation2], %s3288_s3 }
  0xbf   : > { %4239 = dma.done.wait (%p6161_p9), %s330_s4, 8192  }
  0xc0   : > { %4241 = vsyncadd (%p6161_p9), %s330_s4, 4294959104  ;;  %p6162_p0 = scmp.eq.s32.totalorder %s4385_s9, 0 }
  0xc2   : > { %4243 = dma.done.wait (%p6162_p0), [#allocation6], 64   ;;  %p6163_p2 = pmov %p6162_p0 }
  0xc3   : > { %p6164_p10 = pmov %p6162_p0 }
  0xc4   : > { %4245 = vsyncadd (%p6163_p2), [#allocation6], 4294967232 }
  0xc5   : > { %4247 = dma.done.wait (%p6164_p10), [#allocation9], 12384   ;;  %p6165_p1 = pmov %p6162_p0 }
  0xc6   : > { %v4603_v0 = vld [vmem:[%s4588_s16 + $0x100] sm:$0xff]  ;;  %v4606_v1 = vld [vmem:[%s4588_s16 + $0x108] sm:$0xff]  ;;  %v4609_v2 = vld [vmem:[%s4588_s16 + $0x110] sm:$0xff]  ;;  %s5618_s6 = sshll.u32 %s4584_s23, 8  ;;  %s3602_s13 = sshll.u32 %s4272_s27, 6 }
  0xc7   : > { %4249 = vsyncadd (%p6165_p1), [#allocation9], 4294954912  ;;  %v508_v3 = vadd.f32 %v4606_v1, %v4603_v0  ;;  %v4614_v4 = vld [vmem:[%s4588_s16 + $0x118] sm:$0xff]  ;;  %v4617_v5 = vld [vmem:[%s4588_s16] sm:$0xff]  ;;  %s5625_s11 = scalar_lea.vmem [#allocation11], %s5618_s6  ;;  %s3493_s17 = sshll.u32 %s4276_s28, 7 }
  0xc8   : > { %v4620_v6 = vld [vmem:[%s4588_s16 + $0x8] sm:$0xff]  ;;  %v4625_v8 = vld [vmem:[%s4588_s16 + $0x10] sm:$0xff]  ;;  %v511_v9 = vadd.f32 %v4614_v4, %v4609_v2  ;;  %v4630_v10 = vld [vmem:[%s4588_s16 + $0x18] sm:$0xff]  ;;  %s5743_s1 = scalar_lea.vmem [#allocation12], %s5618_s6  ;;  %s3038_s18 = sadd.s32 %s3602_s13, %s3493_s17 }
  0xc9   : > { %v460_v7 = vadd.f32 %v4620_v6, %v4617_v5  ;;  %509 = vadd.xlane.f32.xlu0 %v508_v3  ;;  %v4633_v11 = vld [vmem:[%s4588_s16 + $0x120] sm:$0xff]  ;;  %v4636_v12 = vld [vmem:[%s4588_s16 + $0x128] sm:$0xff]  ;;  %v463_v13 = vadd.f32 %v4630_v10, %v4625_v8  ;;  %v4641_v14 = vld [vmem:[%s4588_s16 + $0x130] sm:$0xff]  ;;  %s5748_s27 = sshll.u32 %s3038_s18, 6  ;;  %s5754_s28 = scalar_lea.vmem [#allocation14], %s5618_s6 }
  0xca   : > { %v4644_v15 = vld [vmem:[%s4588_s16 + $0x138] sm:$0xff]  ;;  %v514_v16 = vadd.f32 %v4636_v12, %v4633_v11  ;;  %v4649_v17 = vld [vmem:[%s4588_s16 + $0x20] sm:$0xff]  ;;  %v4652_v18 = vld [vmem:[%s4588_s16 + $0x28] sm:$0xff]  ;;  %s5762_s12 = scalar_lea.hbm %s6081_s5, %s5748_s27  ;;  %s3041_s19 = sshll.u32 %s5625_s11, 4  ;;  %s5768_s19 = int_to_ptr.vmem [resolvable:$true] %s3041_s19 }
  0xcb   : > { %461 = vadd.xlane.f32.xlu1 %v460_v7  ;;  %v517_v19 = vadd.f32 %v4644_v15, %v4641_v14  ;;  %v4657_v20 = vld [vmem:[%s4588_s16 + $0x30] sm:$0xff]  ;;  %v4660_v21 = vld [vmem:[%s4588_s16 + $0x38] sm:$0xff]  ;;  %v466_v22 = vadd.f32 %v4652_v18, %v4649_v17  ;;  %v4665_v23 = vld [vmem:[%s4588_s16 + $0x140] sm:$0xff]  ;;  %s3015_s21 = scalar_lea.sflag [#allocation4], %s4584_s23  ;;  %s4122_s15 = scalar_lea.vmem %s5768_s19, 4096 }
  0xcc   : > { %v4668_v24 = vld [vmem:[%s4588_s16 + $0x148] sm:$0xff]  ;;  %v469_v25 = vadd.f32 %v4660_v21, %v4657_v20  ;;  %v4673_v26 = vld [vmem:[%s4588_s16 + $0x150] sm:$0xff]  ;;  %v4676_v27 = vld [vmem:[%s4588_s16 + $0x158] sm:$0xff]  ;;  %p4123_p6 = scmp.ne.s32.totalorder %s5768_s19, %s4122_s15  ;;  %s4299_s20 = smov [#allocation11]  }
  0xcd   : > { %512 = vadd.xlane.f32.xlu0 %v511_v9  ;;  %v520_v28 = vadd.f32 %v4668_v24, %v4665_v23  ;;  %v4681_v29 = vld [vmem:[%s4588_s16 + $0x40] sm:$0xff]  ;;  %v4684_v30 = vld [vmem:[%s4588_s16 + $0x48] sm:$0xff]  ;;  %v523_v31 = vadd.f32 %v4676_v27, %v4673_v26  ;;  %v4689_v32 = vld [vmem:[%s4588_s16 + $0x50] sm:$0xff]  ;;  %s4126_s10 = sshll.u32 %s4299_s20, 4  ;;  %s4127_s10 = int_to_ptr.vmem [resolvable:$false] %s4126_s10 }
  0xce   : > { %v4692_v33 = vld [vmem:[%s4588_s16 + $0x58] sm:$0xff]  ;;  %v472_v34 = vadd.f32 %v4684_v30, %v4681_v29  ;;  %v4697_v35 = vld [vmem:[%s4588_s16 + $0x160] sm:$0xff]  ;;  %v4700_v36 = vld [vmem:[%s4588_s16 + $0x168] sm:$0xff]  ;;  %p4124_p8 = pnand %p4123_p6, %p4523_p4  ;;  %s4128_s3 = scalar_lea.vmem %s4127_s10, 8192 }
  0xcf   : > { %464 = vadd.xlane.f32.xlu1 %v463_v13  ;;  %v475_v37 = vadd.f32 %v4692_v33, %v4689_v32  ;;  %v4705_v38 = vld [vmem:[%s4588_s16 + $0x170] sm:$0xff]  ;;  %v4708_v39 = vld [vmem:[%s4588_s16 + $0x178] sm:$0xff]  ;;  %v4711_v40 = vld [vmem:[%s4588_s16 + $0x60] sm:$0xff]  ;;  %v526_v42 = vadd.f32 %v4700_v36, %v4697_v35  ;;  %p4129_p7 = scmp.lt.s32.totalorder %s5768_s19, %s4127_s10  ;;  %p4130_p12 = scmp.lt.s32.totalorder %s4128_s3, %s4122_s15 }
  0xd0   : > { %v4714_v41 = vld [vmem:[%s4588_s16 + $0x68] sm:$0xff]  ;;  %v4719_v43 = vld [vmem:[%s4588_s16 + $0x70] sm:$0xff]  ;;  %v4722_v44 = vld [vmem:[%s4588_s16 + $0x78] sm:$0xff]  ;;  %v529_v45 = vadd.f32 %v4708_v39, %v4705_v38  ;;  %p4125_p3 = pneg %p4124_p8 }
  0xd1   : > { %515 = vadd.xlane.f32.xlu0 %v514_v16  ;;  %v4727_v46 = vld [vmem:[%s4588_s16 + $0x180] sm:$0xff]  ;;  %v4730_v47 = vld [vmem:[%s4588_s16 + $0x188] sm:$0xff]  ;;  %v478_v48 = vadd.f32 %v4714_v41, %v4711_v40  ;;  %v4735_v49 = vld [vmem:[%s4588_s16 + $0x190] sm:$0xff]  ;;  %v481_v51 = vadd.f32 %v4722_v44, %v4719_v43  ;;  %p4131_p11 = por %p4130_p12, %p4129_p7 }
  0xd2   : > { %v4738_v50 = vld [vmem:[%s4588_s16 + $0x198] sm:$0xff]  ;;  %v4743_v52 = vld [vmem:[%s4588_s16 + $0x80] sm:$0xff]  ;;  %v4746_v53 = vld [vmem:[%s4588_s16 + $0x88] sm:$0xff]  ;;  %v532_v54 = vadd.f32 %v4730_v47, %v4727_v46 }
  0xd3   : > { %518 = vadd.xlane.f32.xlu1 %v517_v19  ;;  %v4751_v55 = vld [vmem:[%s4588_s16 + $0x90] sm:$0xff]  ;;  %v4754_v56 = vld [vmem:[%s4588_s16 + $0x98] sm:$0xff]  ;;  %v535_v57 = vadd.f32 %v4738_v50, %v4735_v49  ;;  %v4759_v58 = vld [vmem:[%s4588_s16 + $0x1a0] sm:$0xff]  ;;  %v484_v60 = vadd.f32 %v4746_v53, %v4743_v52  ;;  %p4132_p13 = pnand %p4131_p11, %p4125_p3 }
  0xd4   : > { %v4762_v59 = vld [vmem:[%s4588_s16 + $0x1a8] sm:$0xff]  ;;  %v4767_v61 = vld [vmem:[%s4588_s16 + $0x1b0] sm:$0xff]  ;;  %v4770_v62 = vld [vmem:[%s4588_s16 + $0x1b8] sm:$0xff]  ;;  %v487_v63 = vadd.f32 %v4754_v56, %v4751_v55 }
  0xd5   : > { %467 = vadd.xlane.f32.xlu0 %v466_v22  ;;  %v4775_v3 = vld [vmem:[%s4588_s16 + $0xa0] sm:$0xff]  ;;  %v4778_v7 = vld [vmem:[%s4588_s16 + $0xa8] sm:$0xff]  ;;  %v538_v9 = vadd.f32 %v4762_v59, %v4759_v58  ;;  %v4783_v13 = vld [vmem:[%s4588_s16 + $0xb0] sm:$0xff]  ;;  %v541_v19 = vadd.f32 %v4770_v62, %v4767_v61 }
  0xd6   : > { %v4786_v16 = vld [vmem:[%s4588_s16 + $0xb8] sm:$0xff]  ;;  %v4791_v22 = vld [vmem:[%s4588_s16 + $0x1c0] sm:$0xff] }
  0xd7   : > { %470 = vadd.xlane.f32.xlu1 %v469_v25  ;;  %v4794_v25 = vld [vmem:[%s4588_s16 + $0x1c8] sm:$0xff] }
  0xd8   : > { %6166 = vst [vmem:[#allocation23_spill] sm:$0xff] %v4794_v25 }
  0xd9   : > { %521 = vadd.xlane.f32.xlu0 %v520_v28  ;;  %v490_v28 = vadd.f32 %v4778_v7, %v4775_v3 }
  0xdb   : > { %524 = vadd.xlane.f32.xlu1 %v523_v31  ;;  %v4799_v31 = vld [vmem:[%s4588_s16 + $0x1d0] sm:$0xff] }
  0xdc   : > { %6167 = vst [vmem:[#allocation24_spill] sm:$0xff] %v4799_v31 }
  0xdd   : > { %473 = vadd.xlane.f32.xlu0 %v472_v34  ;;  %v4802_v34 = vld [vmem:[%s4588_s16 + $0x1d8] sm:$0xff] }
  0xde   : > { %6168 = vst [vmem:[#allocation25_spill] sm:$0xff] %v4802_v34 }
  0xdf   : > { %476 = vadd.xlane.f32.xlu1 %v475_v37  ;;  %v493_v37 = vadd.f32 %v4786_v16, %v4783_v13 }
  0xe1   : > { %527 = vadd.xlane.f32.xlu0 %v526_v42  ;;  %v4807_v42 = vld [vmem:[%s4588_s16 + $0xc0] sm:$0xff] }
  0xe3   : > { %530 = vadd.xlane.f32.xlu1 %v529_v45  ;;  %v4810_v45 = vld [vmem:[%s4588_s16 + $0xc8] sm:$0xff] }
  0xe4   : > { %6169 = vst [vmem:[#allocation26_spill] sm:$0xff] %v4810_v45 }
  0xe5   : > { %479 = vadd.xlane.f32.xlu0 %v478_v48  ;;  %v544_v48 = vadd.f32 %v4794_v25, %v4791_v22  ;;  %v4844_v25 = vld [vmem:[%s4588_s16 + $0xe8] sm:$0xff] }
  0xe6   : > { %6175 = vst [vmem:[#allocation32_spill] sm:$0xff] %v4844_v25 }
  0xe7   : > { %482 = vadd.xlane.f32.xlu1 %v481_v51  ;;  %v4815_v51 = vld [vmem:[%s4588_s16 + $0xd0] sm:$0xff] }
  0xe9   : > { %533 = vadd.xlane.f32.xlu0 %v532_v54  ;;  %v4818_v54 = vld [vmem:[%s4588_s16 + $0xd8] sm:$0xff] }
  0xea   : > { %6170 = vst [vmem:[#allocation27_spill] sm:$0xff] %v4818_v54 }
  0xeb   : > { %536 = vadd.xlane.f32.xlu1 %v535_v57  ;;  %v547_v57 = vadd.f32 %v4802_v34, %v4799_v31  ;;  %v4841_v31 = vld [vmem:[%s4588_s16 + $0xe0] sm:$0xff] }
  0xec   : > { %6174 = vst [vmem:[#allocation31_spill] sm:$0xff] %v4841_v31 }
  0xed   : > { %485 = vadd.xlane.f32.xlu0 %v484_v60  ;;  %v4823_v60 = vld [vmem:[%s4588_s16 + $0x1e0] sm:$0xff] }
  0xee   : > { %6171 = vst [vmem:[#allocation28_spill] sm:$0xff] %v4823_v60 }
  0xef   : > { %488 = vadd.xlane.f32.xlu1 %v487_v63  ;;  %v4826_v63 = vld [vmem:[%s4588_s16 + $0x1e8] sm:$0xff] }
  0xf0   : > { %6172 = vst [vmem:[#allocation29_spill] sm:$0xff] %v4826_v63  ;;  %v550_v34 = vadd.f32 %v4826_v63, %v4823_v60  ;;  %v3774_v63 = vld [vmem:[#allocation8] ss:$24 sps:$4 sm:$0xff]   ;;  %v3775_v60 = vld [vmem:[#allocation8 + $0x34] ss:$24 sps:$4 sm:$0xff]  }
  0xf1   : > { %539 = vadd.xlane.f32.xlu0 %v538_v9  ;;  %v496_v9 = vadd.f32 %v4810_v45, %v4807_v42  ;;  %v4852_v45 = vld [vmem:[%s4588_s16 + $0xf8] sm:$0xff] }
  0xf2   : > { %6177 = vst [vmem:[#allocation34_spill] sm:$0xff] %v4852_v45 }
  0xf3   : > { %542 = vadd.xlane.f32.xlu1 %v541_v19  ;;  %v499_v19 = vadd.f32 %v4818_v54, %v4815_v51  ;;  %v502_v54 = vadd.f32 %v4844_v25, %v4841_v31  ;;  %v3780_v25 = vld [vmem:[#allocation8 + $0x60] ss:$24 sps:$4 sm:$0xff]  }
  0xf5   : > { %491 = vadd.xlane.f32.xlu0 %v490_v28  ;;  %v4833_v28 = vld [vmem:[%s4588_s16 + $0x1f0] sm:$0xff] }
  0xf7   : > { %494 = vadd.xlane.f32.xlu1 %v493_v37  ;;  %v4836_v37 = vld [vmem:[%s4588_s16 + $0x1f8] sm:$0xff] }
  0xf8   : > { %6173 = vst [vmem:[#allocation30_spill] sm:$0xff] %v4836_v37 }
  0xf9   : > { %545 = vadd.xlane.f32.xlu0 %v544_v48  ;;  %v553_v48 = vadd.f32 %v4836_v37, %v4833_v28  ;;  %v3777_v37 = vld [vmem:[#allocation8 + $0x30] ss:$24 sps:$4 sm:$0xff]  }
  0xfb   : > { %548 = vadd.xlane.f32.xlu1 %v547_v57  ;;  %v4849_v57 = vld [vmem:[%s4588_s16 + $0xf0] sm:$0xff] }
  0xfc   : > { %6176 = vst [vmem:[#allocation33_spill] sm:$0xff] %v4849_v57 }
  0xfd   : > { %497 = vadd.xlane.f32.xlu0 %v496_v9  ;;  %v505_v9 = vadd.f32 %v4852_v45, %v4849_v57 }
  0xff   : > { %500 = vadd.xlane.f32.xlu1 %v499_v19  ;;  %v3772_v19 = vld [vmem:[#allocation8 + $0x4] ss:$24 sps:$4 sm:$0xff]  }
 0x100   : > { %3605 = vmatprep.subr.bf16.mxu1 %v3772_v19  ;;  %1763 = vmatprep.subr.bf16.mxu0 %v3772_v19  ;;  %v3786_v19 = vld [vmem:[#allocation8 + $0xc0] ss:$24 sps:$4 sm:$0xff]  }
 0x101   : > { %551 = vadd.xlane.f32.xlu0 %v550_v34  ;;  %3621 = vmatpush1.bf16.msra.mxu1 %v3774_v63  ;;  %v3778_v34 = vld [vmem:[#allocation8 + $0x64] ss:$24 sps:$4 sm:$0xff]  }
 0x102   : > { %1764 = vmatpush1.bf16.msra.mxu0 %v3774_v63  ;;  %3606 = vmatprep.subr.bf16.mxu1 %v3775_v60  ;;  %v3787_v63 = vld [vmem:[#allocation8 + $0xf4] ss:$24 sps:$4 sm:$0xff]  }
 0x103   : > { %554 = vadd.xlane.f32.xlu1 %v553_v48  ;;  %1765 = vmatprep.subr.bf16.mxu0 %v3775_v60  ;;  %v3781_v48 = vld [vmem:[#allocation8 + $0x94] ss:$24 sps:$4 sm:$0xff]   ;;  %v3789_v60 = vld [vmem:[#allocation8 + $0xf0] ss:$24 sps:$4 sm:$0xff]  }
 0x105   : > { %503 = vadd.xlane.f32.xlu0 %v502_v54  ;;  %3622 = vmatpush1.bf16.msra.mxu1 %v3777_v37  ;;  %v3783_v54 = vld [vmem:[#allocation8 + $0x90] ss:$24 sps:$4 sm:$0xff]  }
 0x106   : > { %1766 = vmatpush1.bf16.msra.mxu0 %v3777_v37  ;;  %3607 = vmatprep.subr.bf16.mxu1 %v3778_v34  ;;  %v3790_v37 = vld [vmem:[#allocation8 + $0x124] ss:$24 sps:$4 sm:$0xff]  }
 0x107   : > { %506 = vadd.xlane.f32.xlu1 %v505_v9  ;;  %1767 = vmatprep.subr.bf16.mxu0 %v3778_v34  ;;  %v3784_v9 = vld [vmem:[#allocation8 + $0xc4] ss:$24 sps:$4 sm:$0xff]   ;;  %v3792_v34 = vld [vmem:[#allocation8 + $0x120] ss:$24 sps:$4 sm:$0xff]  }
 0x109   : > { %3623 = vmatpush1.bf16.msra.mxu1 %v3780_v25 }
 0x10a   : > { %1768 = vmatpush1.bf16.msra.mxu0 %v3780_v25  ;;  %3608 = vmatprep.subr.bf16.mxu1 %v3781_v48  ;;  %v3793_v25 = vld [vmem:[#allocation8 + $0x154] ss:$24 sps:$4 sm:$0xff]  }
 0x10b   : > { %1769 = vmatprep.subr.bf16.mxu0 %v3781_v48  ;;  %v3795_v48 = vld [vmem:[#allocation8 + $0x150] ss:$24 sps:$4 sm:$0xff]  }
 0x10d   : > { %3624 = vmatpush1.bf16.msra.mxu1 %v3783_v54 }
 0x10e   : > { %1770 = vmatpush1.bf16.msra.mxu0 %v3783_v54  ;;  %3609 = vmatprep.subr.bf16.mxu1 %v3784_v9  ;;  %v3796_v54 = vld [vmem:[#allocation8 + $0x184] ss:$24 sps:$4 sm:$0xff]  }
 0x10f   : > { %1771 = vmatprep.subr.bf16.mxu0 %v3784_v9  ;;  %v3798_v9 = vld [vmem:[#allocation8 + $0x180] ss:$24 sps:$4 sm:$0xff]  }
 0x111   : > { %3625 = vmatpush1.bf16.msra.mxu1 %v3786_v19 }
 0x112   : > { %1772 = vmatpush1.bf16.msra.mxu0 %v3786_v19  ;;  %3610 = vmatprep.subr.bf16.mxu1 %v3787_v63 }
 0x113   : > { %1773 = vmatprep.subr.bf16.mxu0 %v3787_v63 }
 0x115   : > { %3626 = vmatpush1.bf16.msra.mxu1 %v3789_v60 }
 0x116   : > { %1774 = vmatpush1.bf16.msra.mxu0 %v3789_v60  ;;  %3611 = vmatprep.subr.bf16.mxu1 %v3790_v37 }
 0x117   : > { %1775 = vmatprep.subr.bf16.mxu0 %v3790_v37 }
 0x119   : > { %3627 = vmatpush1.bf16.msra.mxu1 %v3792_v34 }
 0x11a   : > { %1776 = vmatpush1.bf16.msra.mxu0 %v3792_v34  ;;  %3612 = vmatprep.subr.bf16.mxu1 %v3793_v25 }
 0x11b   : > { %1777 = vmatprep.subr.bf16.mxu0 %v3793_v25 }
 0x11d   : > { %3628 = vmatpush1.bf16.msra.mxu1 %v3795_v48 }
 0x11e   : > { %1778 = vmatpush1.bf16.msra.mxu0 %v3795_v48  ;;  %3613 = vmatprep.subr.bf16.mxu1 %v3796_v54 }
 0x11f   : > { %1779 = vmatprep.subr.bf16.mxu0 %v3796_v54 }
 0x121   : > { %3629 = vmatpush1.bf16.msra.mxu1 %v3798_v9 }
 0x122   : > { %1780 = vmatpush1.bf16.msra.mxu0 %v3798_v9 }
 0x156   : > { %v510_v19 = vpop.xlane.xlu0 %509 }
 0x157   : > { %v573_v63 = vmul.f32 0.00390625, %v510_v19 }
 0x158   : > { %v462_v60 = vpop.xlane.xlu1 %461 }
 0x159   : > { %v557_v45 = vmul.f32 0.00390625, %v462_v60  ;;  %v4859_v37 = vsub.f32 %v4603_v0, %v573_v63  ;;  %v4862_v34 = vsub.f32 %v4606_v1, %v573_v63 }
 0x15a   : > { %v513_v57 = vpop.xlane.xlu0 %512 }
 0x15b   : > { %6178 = vst [vmem:[#allocation35_spill] sm:$0xff] %v4859_v37  ;;  %6179 = vst [vmem:[#allocation36_spill] sm:$0xff] %v4862_v34  ;;  %v4865_v25 = vsub.f32 %v4617_v5, %v557_v45  ;;  %v4868_v48 = vsub.f32 %v4620_v6, %v557_v45  ;;  %v574_v54 = vmul.f32 0.00390625, %v513_v57  ;;  %v685_v9 = vmul.f32 %v4859_v37, %v4859_v37 }
 0x15c   : > { %v465_v31 = vpop.xlane.xlu1 %464  ;;  %v686_v19 = vmul.f32 %v4862_v34, %v4862_v34 }
 0x15d   : > { %6180 = vst [vmem:[#allocation37_spill] sm:$0xff] %v4865_v25  ;;  %6181 = vst [vmem:[#allocation38_spill] sm:$0xff] %v4868_v48  ;;  %v558_v0 = vmul.f32 0.00390625, %v465_v31  ;;  %v653_v1 = vmul.f32 %v4865_v25, %v4865_v25  ;;  %v654_v63 = vmul.f32 %v4868_v48, %v4868_v48  ;;  %v4879_v5 = vsub.f32 %v4609_v2, %v574_v54 }
 0x15e   : > { %v4882_v6 = vsub.f32 %v4614_v4, %v574_v54  ;;  %v765_v45 = vadd.f32 %v686_v19, %v685_v9  ;;  %v516_v57 = vpop.xlane.xlu0 %515 }
 0x15f   : > { %v4885_v60 = vsub.f32 %v4625_v8, %v558_v0  ;;  %v4888_v37 = vsub.f32 %v4630_v10, %v558_v0  ;;  %v575_v31 = vmul.f32 0.00390625, %v516_v57  ;;  %v687_v48 = vmul.f32 %v4879_v5, %v4879_v5 }
 0x160   : > { %766 = vadd.xlane.f32.xlu0 %v765_v45  ;;  %v519_v25 = vpop.xlane.xlu1 %518  ;;  %v688_v2 = vmul.f32 %v4882_v6, %v4882_v6  ;;  %v717_v34 = vadd.f32 %v654_v63, %v653_v1 }
 0x161   : > { %v576_v4 = vmul.f32 0.00390625, %v519_v25  ;;  %v655_v54 = vmul.f32 %v4885_v60, %v4885_v60  ;;  %v656_v8 = vmul.f32 %v4888_v37, %v4888_v37  ;;  %v4899_v10 = vsub.f32 %v4633_v11, %v575_v31 }
 0x162   : > { %v4902_v9 = vsub.f32 %v4636_v12, %v575_v31  ;;  %v768_v19 = vadd.f32 %v688_v2, %v687_v48  ;;  %v468_v0 = vpop.xlane.xlu0 %467 }
 0x163   : > { %v4905_v45 = vsub.f32 %v4641_v14, %v576_v4  ;;  %v4908_v1 = vsub.f32 %v4644_v15, %v576_v4  ;;  %v559_v25 = vmul.f32 0.00390625, %v468_v0  ;;  %v689_v57 = vmul.f32 %v4899_v10, %v4899_v10 }
 0x164   : > { %769 = vadd.xlane.f32.xlu1 %v768_v19  ;;  %718 = vadd.xlane.f32.xlu0 %v717_v34  ;;  %v471_v63 = vpop.xlane.xlu1 %470  ;;  %v690_v11 = vmul.f32 %v4902_v9, %v4902_v9  ;;  %v720_v12 = vadd.f32 %v656_v8, %v655_v54 }
 0x165   : > { %v560_v31 = vmul.f32 0.00390625, %v471_v63  ;;  %v691_v48 = vmul.f32 %v4905_v45, %v4905_v45  ;;  %v692_v14 = vmul.f32 %v4908_v1, %v4908_v1  ;;  %v4919_v15 = vsub.f32 %v4649_v17, %v559_v25 }
 0x166   : > { %v4922_v34 = vsub.f32 %v4652_v18, %v559_v25  ;;  %v771_v2 = vadd.f32 %v690_v11, %v689_v57  ;;  %v522_v4 = vpop.xlane.xlu0 %521 }
 0x167   : > { %v4925_v19 = vsub.f32 %v4657_v20, %v560_v31  ;;  %v4928_v54 = vsub.f32 %v4660_v21, %v560_v31  ;;  %v577_v8 = vmul.f32 0.00390625, %v522_v4  ;;  %v657_v63 = vmul.f32 %v4919_v15, %v4919_v15 }
 0x168   : > { %772 = vadd.xlane.f32.xlu0 %v771_v2  ;;  %721 = vadd.xlane.f32.xlu1 %v720_v12  ;;  %v525_v0 = vpop.xlane.xlu1 %524  ;;  %v658_v17 = vmul.f32 %v4922_v34, %v4922_v34  ;;  %v774_v18 = vadd.f32 %v692_v14, %v691_v48 }
 0x169   : > { %v578_v25 = vmul.f32 0.00390625, %v525_v0  ;;  %v659_v57 = vmul.f32 %v4925_v19, %v4925_v19  ;;  %v660_v20 = vmul.f32 %v4928_v54, %v4928_v54  ;;  %v4939_v21 = vsub.f32 %v4665_v23, %v577_v8 }
 0x16a   : > { %v4942_v11 = vsub.f32 %v4668_v24, %v577_v8  ;;  %v723_v12 = vadd.f32 %v658_v17, %v657_v63  ;;  %v474_v31 = vpop.xlane.xlu0 %473  ;;  %v3799_v8 = vld [vmem:[#allocation8 + $0x1b4] ss:$24 sps:$4 sm:$0xff]   ;;  %v3801_v17 = vld [vmem:[#allocation8 + $0x1b0] ss:$24 sps:$4 sm:$0xff]  }
 0x16b   : > { %v4945_v2 = vsub.f32 %v4673_v26, %v578_v25  ;;  %v4948_v48 = vsub.f32 %v4676_v27, %v578_v25  ;;  %v561_v14 = vmul.f32 0.00390625, %v474_v31  ;;  %v693_v0 = vmul.f32 %v4939_v21, %v4939_v21  ;;  %3614 = vmatprep.subr.bf16.mxu1 %v3799_v8  ;;  %1781 = vmatprep.subr.bf16.mxu0 %v3799_v8  ;;  %v3802_v8 = vld [vmem:[#allocation8 + $0x1e4] ss:$24 sps:$4 sm:$0xff]  }
 0x16c   : > { %724 = vadd.xlane.f32.xlu0 %v723_v12  ;;  %775 = vadd.xlane.f32.xlu1 %v774_v18  ;;  %v477_v4 = vpop.xlane.xlu1 %476  ;;  %v694_v23 = vmul.f32 %v4942_v11, %v4942_v11  ;;  %v726_v24 = vadd.f32 %v660_v20, %v659_v57 }
 0x16d   : > { %v562_v63 = vmul.f32 0.00390625, %v477_v4  ;;  %v695_v26 = vmul.f32 %v4945_v2, %v4945_v2  ;;  %v696_v27 = vmul.f32 %v4948_v48, %v4948_v48  ;;  %v4959_v25 = vsub.f32 %v4681_v29, %v561_v14  ;;  %3630 = vmatpush1.bf16.msra.mxu1 %v3801_v17  ;;  %1782 = vmatpush1.bf16.msra.mxu0 %v3801_v17 }
 0x16e   : > { %v4962_v18 = vsub.f32 %v4684_v30, %v561_v14  ;;  %v777_v12 = vadd.f32 %v694_v23, %v693_v0  ;;  %v528_v31 = vpop.xlane.xlu0 %527  ;;  %3615 = vmatprep.subr.bf16.mxu1 %v3802_v8  ;;  %1783 = vmatprep.subr.bf16.mxu0 %v3802_v8 }
 0x16f   : > { %6182 = vst [vmem:[#allocation39_spill] sm:$0xff] %v4959_v25  ;;  %v4965_v57 = vsub.f32 %v4689_v32, %v562_v63  ;;  %v4968_v20 = vsub.f32 %v4692_v33, %v562_v63  ;;  %v579_v4 = vmul.f32 0.00390625, %v528_v31  ;;  %v661_v30 = vmul.f32 %v4959_v25, %v4959_v25 }
 0x170   : > { %778 = vadd.xlane.f32.xlu0 %v777_v12  ;;  %727 = vadd.xlane.f32.xlu1 %v726_v24  ;;  %v531_v29 = vpop.xlane.xlu1 %530  ;;  %v662_v14 = vmul.f32 %v4962_v18, %v4962_v18  ;;  %v780_v0 = vadd.f32 %v696_v27, %v695_v26  ;;  %v3804_v12 = vld [vmem:[#allocation8 + $0x1e0] ss:$24 sps:$4 sm:$0xff]  }
 0x171   : > { %v580_v23 = vmul.f32 0.00390625, %v531_v29  ;;  %v663_v32 = vmul.f32 %v4965_v57, %v4965_v57  ;;  %v664_v33 = vmul.f32 %v4968_v20, %v4968_v20  ;;  %v4979_v63 = vsub.f32 %v4697_v35, %v579_v4  ;;  %3631 = vmatpush1.bf16.msra.mxu1 %v3804_v12  ;;  %1784 = vmatpush1.bf16.msra.mxu0 %v3804_v12 }
 0x172   : > { %v4982_v24 = vsub.f32 %v4700_v36, %v579_v4  ;;  %v729_v17 = vadd.f32 %v662_v14, %v661_v30  ;;  %v480_v31 = vpop.xlane.xlu0 %479  ;;  %v3805_v14 = vld [vmem:[#allocation8 + $0x214] ss:$24 sps:$4 sm:$0xff]  }
 0x173   : > { %v4985_v25 = vsub.f32 %v4705_v38, %v580_v23  ;;  %v4988_v26 = vsub.f32 %v4708_v39, %v580_v23  ;;  %v563_v27 = vmul.f32 0.00390625, %v480_v31  ;;  %v697_v35 = vmul.f32 %v4979_v63, %v4979_v63  ;;  %3616 = vmatprep.subr.bf16.mxu1 %v3805_v14  ;;  %1785 = vmatprep.subr.bf16.mxu0 %v3805_v14 }
 0x174   : > { %730 = vadd.xlane.f32.xlu0 %v729_v17  ;;  %781 = vadd.xlane.f32.xlu1 %v780_v0  ;;  %v483_v29 = vpop.xlane.xlu1 %482  ;;  %v698_v36 = vmul.f32 %v4982_v24, %v4982_v24  ;;  %v732_v4 = vadd.f32 %v664_v33, %v663_v32  ;;  %v3807_v17 = vld [vmem:[#allocation8 + $0x210] ss:$24 sps:$4 sm:$0xff]  }
 0x175   : > { %v564_v30 = vmul.f32 0.00390625, %v483_v29  ;;  %v699_v38 = vmul.f32 %v4985_v25, %v4985_v25  ;;  %v700_v39 = vmul.f32 %v4988_v26, %v4988_v26  ;;  %v4999_v0 = vsub.f32 %v4711_v40, %v563_v27  ;;  %3632 = vmatpush1.bf16.msra.mxu1 %v3807_v17  ;;  %1786 = vmatpush1.bf16.msra.mxu0 %v3807_v17 }
 0x176   : > { %v5002_v23 = vsub.f32 %v4714_v41, %v563_v27  ;;  %v783_v8 = vadd.f32 %v698_v36, %v697_v35  ;;  %v534_v31 = vpop.xlane.xlu0 %533  ;;  %v3808_v36 = vld [vmem:[#allocation8 + $0x244] ss:$24 sps:$4 sm:$0xff]  }
 0x177   : > { %v5005_v32 = vsub.f32 %v4719_v43, %v564_v30  ;;  %v5008_v33 = vsub.f32 %v4722_v44, %v564_v30  ;;  %v581_v29 = vmul.f32 0.00390625, %v534_v31  ;;  %v665_v40 = vmul.f32 %v4999_v0, %v4999_v0  ;;  %3617 = vmatprep.subr.bf16.mxu1 %v3808_v36  ;;  %1787 = vmatprep.subr.bf16.mxu0 %v3808_v36 }
 0x178   : > { %784 = vadd.xlane.f32.xlu0 %v783_v8  ;;  %733 = vadd.xlane.f32.xlu1 %v732_v4  ;;  %v537_v12 = vpop.xlane.xlu1 %536  ;;  %v666_v41 = vmul.f32 %v5002_v23, %v5002_v23  ;;  %v786_v27 = vadd.f32 %v700_v39, %v699_v38  ;;  %v3810_v8 = vld [vmem:[#allocation8 + $0x240] ss:$24 sps:$4 sm:$0xff]  }
 0x179   : > { %v582_v35 = vmul.f32 0.00390625, %v537_v12  ;;  %v667_v43 = vmul.f32 %v5005_v32, %v5005_v32  ;;  %v668_v44 = vmul.f32 %v5008_v33, %v5008_v33  ;;  %v5019_v4 = vsub.f32 %v4727_v46, %v581_v29  ;;  %3633 = vmatpush1.bf16.msra.mxu1 %v3810_v8  ;;  %1788 = vmatpush1.bf16.msra.mxu0 %v3810_v8 }
 0x17a   : > { %v5022_v30 = vsub.f32 %v4730_v47, %v581_v29  ;;  %v735_v14 = vadd.f32 %v666_v41, %v665_v40  ;;  %v486_v31 = vpop.xlane.xlu0 %485  ;;  %v3811_v41 = vld [vmem:[#allocation8 + $0x274] ss:$24 sps:$4 sm:$0xff]  }
 0x17b   : > { %v5025_v38 = vsub.f32 %v4735_v49, %v582_v35  ;;  %v5028_v39 = vsub.f32 %v4738_v50, %v582_v35  ;;  %v565_v12 = vmul.f32 0.00390625, %v486_v31  ;;  %v701_v46 = vmul.f32 %v5019_v4, %v5019_v4  ;;  %3618 = vmatprep.subr.bf16.mxu1 %v3811_v41  ;;  %1789 = vmatprep.subr.bf16.mxu0 %v3811_v41 }
 0x17c   : > { %736 = vadd.xlane.f32.xlu0 %v735_v14  ;;  %787 = vadd.xlane.f32.xlu1 %v786_v27  ;;  %v489_v17 = vpop.xlane.xlu1 %488  ;;  %v702_v47 = vmul.f32 %v5022_v30, %v5022_v30  ;;  %v738_v29 = vadd.f32 %v668_v44, %v667_v43  ;;  %v3813_v14 = vld [vmem:[#allocation8 + $0x270] ss:$24 sps:$4 sm:$0xff]  }
 0x17d   : > { %v566_v40 = vmul.f32 0.00390625, %v489_v17  ;;  %v703_v49 = vmul.f32 %v5025_v38, %v5025_v38  ;;  %v704_v50 = vmul.f32 %v5028_v39, %v5028_v39  ;;  %v5039_v27 = vsub.f32 %v4743_v52, %v565_v12  ;;  %3634 = vmatpush1.bf16.msra.mxu1 %v3813_v14  ;;  %1790 = vmatpush1.bf16.msra.mxu0 %v3813_v14 }
 0x17e   : > { %v5042_v35 = vsub.f32 %v4746_v53, %v565_v12  ;;  %v789_v36 = vadd.f32 %v702_v47, %v701_v46  ;;  %v540_v31 = vpop.xlane.xlu0 %539  ;;  %v3814_v47 = vld [vmem:[#allocation8 + $0x2a4] ss:$24 sps:$4 sm:$0xff]  }
 0x17f   : > { %v5045_v43 = vsub.f32 %v4751_v55, %v566_v40  ;;  %v5048_v44 = vsub.f32 %v4754_v56, %v566_v40  ;;  %v583_v17 = vmul.f32 0.00390625, %v540_v31  ;;  %v669_v52 = vmul.f32 %v5039_v27, %v5039_v27  ;;  %3619 = vmatprep.subr.bf16.mxu1 %v3814_v47  ;;  %1791 = vmatprep.subr.bf16.mxu0 %v3814_v47 }
 0x180   : > { %790 = vadd.xlane.f32.xlu0 %v789_v36  ;;  %739 = vadd.xlane.f32.xlu1 %v738_v29  ;;  %v543_v8 = vpop.xlane.xlu1 %542  ;;  %v670_v53 = vmul.f32 %v5042_v35, %v5042_v35  ;;  %v792_v12 = vadd.f32 %v704_v50, %v703_v49  ;;  %v3816_v36 = vld [vmem:[#allocation8 + $0x2a0] ss:$24 sps:$4 sm:$0xff]  }
 0x181   : > { %v584_v46 = vmul.f32 0.00390625, %v543_v8  ;;  %v671_v55 = vmul.f32 %v5045_v43, %v5045_v43  ;;  %v672_v56 = vmul.f32 %v5048_v44, %v5048_v44  ;;  %v5059_v29 = vsub.f32 %v4759_v58, %v583_v17  ;;  %3635 = vmatpush1.bf16.msra.mxu1 %v3816_v36  ;;  %1792 = vmatpush1.bf16.msra.mxu0 %v3816_v36 }
 0x182   : > { %v5062_v40 = vsub.f32 %v4762_v59, %v583_v17  ;;  %v741_v41 = vadd.f32 %v670_v53, %v669_v52  ;;  %v492_v31 = vpop.xlane.xlu0 %491  ;;  %v3817_v53 = vld [vmem:[#allocation8 + $0x2d4] ss:$24 sps:$4 sm:$0xff]  }
 0x183   : > { %6183 = vst [vmem:[#allocation40_spill] sm:$0xff] %v5059_v29  ;;  %v5065_v49 = vsub.f32 %v4767_v61, %v584_v46  ;;  %v5068_v50 = vsub.f32 %v4770_v62, %v584_v46  ;;  %v567_v8 = vmul.f32 0.00390625, %v492_v31  ;;  %v705_v58 = vmul.f32 %v5059_v29, %v5059_v29  ;;  %3620 = vmatprep.subr.bf16.mxu1 %v3817_v53 }
 0x184   : > { %742 = vadd.xlane.f32.xlu0 %v741_v41  ;;  %793 = vadd.xlane.f32.xlu1 %v792_v12  ;;  %v495_v14 = vpop.xlane.xlu1 %494  ;;  %v706_v59 = vmul.f32 %v5062_v40, %v5062_v40  ;;  %v744_v17 = vadd.f32 %v672_v56, %v671_v55  ;;  %v3819_v41 = vld [vmem:[#allocation8 + $0x2d0] ss:$24 sps:$4 sm:$0xff]  }
 0x185   : > { %6184 = vst [vmem:[#allocation41_spill] sm:$0xff] %v5065_v49  ;;  %v568_v52 = vmul.f32 0.00390625, %v495_v14  ;;  %v707_v61 = vmul.f32 %v5065_v49, %v5065_v49  ;;  %v708_v62 = vmul.f32 %v5068_v50, %v5068_v50  ;;  %v5079_v12 = vsub.f32 %v4775_v3, %v567_v8  ;;  %1793 = vmatprep.subr.bf16.mxu0 %v3817_v53 }
 0x186   : > { %v5082_v46 = vsub.f32 %v4778_v7, %v567_v8  ;;  %v795_v47 = vadd.f32 %v706_v59, %v705_v58  ;;  %v546_v31 = vpop.xlane.xlu0 %545  ;;  %3636 = vmatpush1.bf16.msra.mxu1 %v3819_v41  ;;  %1794 = vmatpush1.bf16.msra.mxu0 %v3819_v41 }
 0x187   : > { %6185 = vst [vmem:[#allocation42_spill] sm:$0xff] %v5079_v12  ;;  %v5085_v55 = vsub.f32 %v4783_v13, %v568_v52  ;;  %v5088_v56 = vsub.f32 %v4786_v16, %v568_v52  ;;  %v585_v14 = vmul.f32 0.00390625, %v546_v31  ;;  %v673_v3 = vmul.f32 %v5079_v12, %v5079_v12  ;;  %v6192_v12 = vld [vmem:[#allocation24_spill] sm:$0xff] }
 0x188   : > { %6186 = vst [vmem:[#allocation43_spill] sm:$0xff] %v5082_v46  ;;  %796 = vadd.xlane.f32.xlu0 %v795_v47  ;;  %745 = vadd.xlane.f32.xlu1 %v744_v17  ;;  %v549_v36 = vpop.xlane.xlu1 %548  ;;  %v674_v7 = vmul.f32 %v5082_v46, %v5082_v46  ;;  %v798_v8 = vadd.f32 %v708_v62, %v707_v61  ;;  %v6190_v17 = vld [vmem:[#allocation23_spill] sm:$0xff]  ;;  %v6194_v62 = vld [vmem:[#allocation25_spill] sm:$0xff] }
 0x189   : > { %6187 = vst [vmem:[#allocation44_spill] sm:$0xff] %v5085_v55  ;;  %6188 = vst [vmem:[#allocation45_spill] sm:$0xff] %v5088_v56  ;;  %v586_v58 = vmul.f32 0.00390625, %v549_v36  ;;  %v675_v13 = vmul.f32 %v5085_v55, %v5085_v55  ;;  %v676_v16 = vmul.f32 %v5088_v56, %v5088_v56  ;;  %v5099_v59 = vsub.f32 %v4791_v22, %v585_v14  ;;  %v3822_v47 = vld [vmem:[#allocation8 + $0xc] ss:$24 sps:$4 sm:$0xff]  }
 0x18a   : > { %v5102_v52 = vsub.f32 %v6190_v17, %v585_v14  ;;  %v747_v53 = vadd.f32 %v674_v7, %v673_v3  ;;  %v498_v31 = vpop.xlane.xlu0 %497  ;;  %1956 = vmatprep.subr.bf16.mxu1 %v3822_v47 }
 0x18b   : > { %6189 = vst [vmem:[#allocation46_spill] sm:$0xff] %v5099_v59  ;;  %v5105_v61 = vsub.f32 %v6192_v12, %v586_v58  ;;  %v5108_v36 = vsub.f32 %v6194_v62, %v586_v58  ;;  %v569_v55 = vmul.f32 0.00390625, %v498_v31  ;;  %v709_v22 = vmul.f32 %v5099_v59, %v5099_v59  ;;  %v3825_v31 = vld [vmem:[#allocation8 + $0x14] ss:$24 sps:$4 sm:$0xff]  }
 0x18c   : > { %6191 = vst [vmem:[#allocation23_spill] sm:$0xff] %v5102_v52  ;;  %748 = vadd.xlane.f32.xlu0 %v747_v53  ;;  %799 = vadd.xlane.f32.xlu1 %v798_v8  ;;  %v501_v56 = vpop.xlane.xlu1 %500  ;;  %v710_v41 = vmul.f32 %v5102_v52, %v5102_v52  ;;  %v750_v14 = vadd.f32 %v676_v16, %v675_v13  ;;  %v6197_v8 = vld [vmem:[#allocation26_spill] sm:$0xff] }
 0x18d   : > { %6193 = vst [vmem:[#allocation24_spill] sm:$0xff] %v5105_v61  ;;  %6195 = vst [vmem:[#allocation25_spill] sm:$0xff] %v5108_v36  ;;  %v570_v3 = vmul.f32 0.00390625, %v501_v56  ;;  %v711_v7 = vmul.f32 %v5105_v61, %v5105_v61  ;;  %v712_v12 = vmul.f32 %v5108_v36, %v5108_v36  ;;  %v5119_v58 = vsub.f32 %v4807_v42, %v569_v55  ;;  %v6200_v56 = vld [vmem:[#allocation27_spill] sm:$0xff] }
 0x18e   : > { %v5122_v17 = vsub.f32 %v6197_v8, %v569_v55  ;;  %v801_v53 = vadd.f32 %v710_v41, %v709_v22  ;;  %v552_v62 = vpop.xlane.xlu0 %551  ;;  %2149 = vmatprep.subr.bf16.mxu0 %v3825_v31 }
 0x18f   : > { %6196 = vst [vmem:[#allocation47_spill] sm:$0xff] %v5119_v58  ;;  %v5125_v59 = vsub.f32 %v4815_v51, %v570_v3  ;;  %v5128_v13 = vsub.f32 %v6200_v56, %v570_v3  ;;  %v587_v16 = vmul.f32 0.00390625, %v552_v62  ;;  %v677_v42 = vmul.f32 %v5119_v58, %v5119_v58  ;;  %v6202_v3 = vld [vmem:[#allocation28_spill] sm:$0xff] }
 0x190   : > { %6198 = vst [vmem:[#allocation26_spill] sm:$0xff] %v5122_v17  ;;  %802 = vadd.xlane.f32.xlu0 %v801_v53  ;;  %751 = vadd.xlane.f32.xlu1 %v750_v14  ;;  %v555_v61 = vpop.xlane.xlu1 %554  ;;  %v678_v55 = vmul.f32 %v5122_v17, %v5122_v17  ;;  %v804_v47 = vadd.f32 %v712_v12, %v711_v7  ;;  %v6204_v14 = vld [vmem:[#allocation29_spill] sm:$0xff]  ;;  %v6207_v7 = vld [vmem:[#allocation30_spill] sm:$0xff] }
 0x191   : > { %6199 = vst [vmem:[#allocation48_spill] sm:$0xff] %v5125_v59  ;;  %6201 = vst [vmem:[#allocation27_spill] sm:$0xff] %v5128_v13  ;;  %v588_v22 = vmul.f32 0.00390625, %v555_v61  ;;  %v679_v41 = vmul.f32 %v5125_v59, %v5125_v59  ;;  %v680_v51 = vmul.f32 %v5128_v13, %v5128_v13  ;;  %v5139_v8 = vsub.f32 %v6202_v3, %v587_v16  ;;  %v6215_v13 = vld [vmem:[#allocation34_spill] sm:$0xff] }
 0x192   : > { %v5142_v53 = vsub.f32 %v6204_v14, %v587_v16  ;;  %v753_v62 = vadd.f32 %v678_v55, %v677_v42  ;;  %v504_v56 = vpop.xlane.xlu0 %503  ;;  %v6209_v55 = vld [vmem:[#allocation31_spill] sm:$0xff] }
 0x193   : > { %6203 = vst [vmem:[#allocation28_spill] sm:$0xff] %v5139_v8  ;;  %v5145_v58 = vsub.f32 %v4833_v28, %v588_v22  ;;  %v5148_v61 = vsub.f32 %v6207_v7, %v588_v22  ;;  %v571_v12 = vmul.f32 0.00390625, %v504_v56  ;;  %v713_v31 = vmul.f32 %v5139_v8, %v5139_v8  ;;  %v6213_v7 = vld [vmem:[#allocation33_spill] sm:$0xff] }
 0x194   : > { %6205 = vst [vmem:[#allocation29_spill] sm:$0xff] %v5142_v53  ;;  %754 = vadd.xlane.f32.xlu0 %v753_v62  ;;  %805 = vadd.xlane.f32.xlu1 %v804_v47  ;;  %v507_v59 = vpop.xlane.xlu1 %506  ;;  %v714_v3 = vmul.f32 %v5142_v53, %v5142_v53  ;;  %v756_v16 = vadd.f32 %v680_v51, %v679_v41  ;;  %v6211_v62 = vld [vmem:[#allocation32_spill] sm:$0xff] }
 0x195   : > { %6206 = vst [vmem:[#allocation49_spill] sm:$0xff] %v5145_v58  ;;  %6208 = vst [vmem:[#allocation30_spill] sm:$0xff] %v5148_v61  ;;  %v572_v14 = vmul.f32 0.00390625, %v507_v59  ;;  %v715_v42 = vmul.f32 %v5145_v58, %v5145_v58  ;;  %v716_v28 = vmul.f32 %v5148_v61, %v5148_v61  ;;  %v5159_v22 = vsub.f32 %v6209_v55, %v571_v12 }
 0x196   : > { %v5162_v47 = vsub.f32 %v6211_v62, %v571_v12  ;;  %v807_v56 = vadd.f32 %v714_v3, %v713_v31 }
 0x197   : > { %6210 = vst [vmem:[#allocation31_spill] sm:$0xff] %v5159_v22  ;;  %v5165_v8 = vsub.f32 %v6213_v7, %v572_v14  ;;  %v5168_v53 = vsub.f32 %v6215_v13, %v572_v14  ;;  %v681_v59 = vmul.f32 %v5159_v22, %v5159_v22  ;;  %v810_v51 = vadd.f32 %v716_v28, %v715_v42 }
 0x198   : > { %6212 = vst [vmem:[#allocation32_spill] sm:$0xff] %v5162_v47  ;;  %808 = vadd.xlane.f32.xlu0 %v807_v56  ;;  %757 = vadd.xlane.f32.xlu1 %v756_v16  ;;  %v682_v41 = vmul.f32 %v5162_v47, %v5162_v47  ;;  %v974_v7 = vlaneseq }
 0x199   : > { %6214 = vst [vmem:[#allocation33_spill] sm:$0xff] %v5165_v8  ;;  %6216 = vst [vmem:[#allocation34_spill] sm:$0xff] %v5168_v53  ;;  %v683_v12 = vmul.f32 %v5165_v8, %v5165_v8  ;;  %v684_v31 = vmul.f32 %v5168_v53, %v5168_v53 }
 0x19a   : > { %v759_v3 = vadd.f32 %v682_v41, %v681_v59  ;;  %v5178_v61 = vshrl.u32 %v974_v7, 7  ;;  %v459_v7 = vld [vmem:[#allocation7] sm:$0x3] }
 0x19b   : > { %v762_v13 = vadd.f32 %v684_v31, %v683_v12 }
 0x19c   : > { %760 = vadd.xlane.f32.xlu0 %v759_v3  ;;  %811 = vadd.xlane.f32.xlu1 %v810_v51  ;;  %6217 = vst [vmem:[#allocation50_spill] sm:$0xff] %v5178_v61 }
 0x1a0   : > { %763 = vadd.xlane.f32.xlu1 %v762_v13  ;;  %v5181_v13 = vsub.s32 1, %v5178_v61 }
 0x1a2   : > { %6218 = vst [vmem:[#allocation51_spill] sm:$0xff] %v5181_v13 }
 0x1ed   : > { %v767_v14 = vpop.xlane.xlu0 %766 }
 0x1ee   : > { %v829_v16 = vmul.f32 0.00390625, %v767_v14  ;;  %v5184_v14 = vsub.s32 0, %v5178_v61 }
 0x1f0   : > { %v861_v55 = vadd.f32 1e-05, %v829_v16  ;;  %6219 = vst [vmem:[#allocation52_spill] sm:$0xff] %v5184_v14 }
 0x1f1   : > { %v719_v62 = vpop.xlane.xlu0 %718  ;;  %v770_v56 = vpop.xlane.xlu1 %769 }
 0x1f2   : > { %3916 = vrsqrt.f32 %v861_v55  ;;  %v813_v22 = vmul.f32 0.00390625, %v719_v62  ;;  %v830_v42 = vmul.f32 0.00390625, %v770_v56  ;;  %v458_v55 = vld [vmem:[#allocation5] sm:$0x3] }
 0x1f3   : > { %v5192_v61 = vrot.slane %v458_v55, %v5184_v14 }
 0x1f4   : > { %v845_v28 = vadd.f32 1e-05, %v813_v22  ;;  %v862_v47 = vadd.f32 1e-05, %v830_v42  ;;  %v6220_v42 = vld [vmem:[#allocation36_spill] sm:$0xff] }
 0x1f5   : > { %v773_v8 = vpop.xlane.xlu0 %772  ;;  %v722_v58 = vpop.xlane.xlu1 %721 }
 0x1f6   : > { %3918 = vrsqrt.f32 %v845_v28  ;;  %v831_v59 = vmul.f32 0.00390625, %v773_v8  ;;  %v814_v41 = vmul.f32 0.00390625, %v722_v58 }
 0x1f7   : > { %3920 = vrsqrt.f32 %v862_v47 }
 0x1f8   : > { %v863_v51 = vadd.f32 1e-05, %v831_v59  ;;  %v846_v12 = vadd.f32 1e-05, %v814_v41  ;;  %v5188_v59 = vrot.slane %v458_v55, %v5181_v13  ;;  %v6221_v41 = vld [vmem:[#allocation35_spill] sm:$0xff] }
 0x1f9   : > { %v725_v31 = vpop.xlane.xlu0 %724  ;;  %v776_v3 = vpop.xlane.xlu1 %775 }
 0x1fa   : > { %3922 = vrsqrt.f32 %v863_v51  ;;  %v815_v22 = vmul.f32 0.00390625, %v725_v31  ;;  %v832_v16 = vmul.f32 0.00390625, %v776_v3 }
 0x1fb   : > { %3924 = vrsqrt.f32 %v846_v12 }
 0x1fc   : > { %v3917_v62 = vpop.eup %3916  ;;  %v847_v56 = vadd.f32 1e-05, %v815_v22  ;;  %v864_v8 = vadd.f32 1e-05, %v832_v16  ;;  %v5195_v22 = vrot.slane %v459_v7, %v5181_v13  ;;  %v5198_v16 = vrot.slane %v459_v7, %v5184_v14 }
 0x1fd   : > { %v779_v58 = vpop.xlane.xlu0 %778  ;;  %v728_v47 = vpop.xlane.xlu1 %727  ;;  %v942_v28 = vmul.f32 %v3917_v62, %v6220_v42  ;;  %v941_v53 = vmul.f32 %v3917_v62, %v6221_v41 }
 0x1fe   : > { %v833_v51 = vmul.f32 0.00390625, %v779_v58  ;;  %v816_v31 = vmul.f32 0.00390625, %v728_v47  ;;  %3926 = vrsqrt.f32 %v864_v8  ;;  %v6222_v58 = vld [vmem:[#allocation38_spill] sm:$0xff] }
 0x1ff   : > { %3928 = vrsqrt.f32 %v847_v56  ;;  %v1017_v62 = vmul.f32 %v5188_v59, %v942_v28  ;;  %v1016_v55 = vmul.f32 %v5192_v61, %v941_v53 }
 0x200   : > { %v3919_v12 = vpop.eup %3918  ;;  %v848_v3 = vadd.f32 1e-05, %v816_v31  ;;  %v865_v17 = vadd.f32 1e-05, %v833_v51  ;;  %v6223_v31 = vld [vmem:[#allocation37_spill] sm:$0xff] }
 0x201   : > { %v3921_v42 = vpop.eup %3920  ;;  %v731_v36 = vpop.xlane.xlu0 %730  ;;  %v910_v47 = vmul.f32 %v3919_v12, %v6222_v58  ;;  %v909_v13 = vmul.f32 %v3919_v12, %v6223_v31  ;;  %v3820_v31 = vld [vmem:[#allocation8 + $0x8] ss:$24 sps:$4 sm:$0xff]  }
 0x202   : > { %v782_v52 = vpop.xlane.xlu1 %781  ;;  %v817_v8 = vmul.f32 0.00390625, %v731_v36  ;;  %v944_v56 = vmul.f32 %v3921_v42, %v4882_v6  ;;  %3930 = vrsqrt.f32 %v848_v3  ;;  %v943_v7 = vmul.f32 %v3921_v42, %v4879_v5 }
 0x203   : > { %v834_v41 = vmul.f32 0.00390625, %v782_v52  ;;  %v985_v49 = vmul.f32 %v5188_v59, %v910_v47  ;;  %3932 = vrsqrt.f32 %v865_v17  ;;  %v1092_v36 = vadd.f32 %v5195_v22, %v1017_v62 }
 0x204   : > { %v3923_v14 = vpop.eup %3922  ;;  %v1019_v51 = vmul.f32 %v5188_v59, %v944_v56  ;;  %v1018_v52 = vmul.f32 %v5192_v61, %v943_v7  ;;  %v1091_v6 = vadd.f32 %v5198_v16, %v1016_v55  ;;  %v849_v12 = vadd.f32 1e-05, %v817_v8 }
 0x205   : > { %v866_v46 = vadd.f32 1e-05, %v834_v41  ;;  %v3925_v28 = vpop.eup %3924  ;;  %v785_v53 = vpop.xlane.xlu0 %784  ;;  %v984_v5 = vmul.f32 %v5192_v61, %v909_v13  ;;  %v946_v42 = vmul.f32 %v3923_v14, %v4902_v9  ;;  %v1060_v55 = vadd.f32 %v5195_v22, %v985_v49 }
 0x206   : > { %v734_v29 = vpop.xlane.xlu1 %733  ;;  %v1094_v3 = vadd.f32 %v5195_v22, %v1019_v51  ;;  %v1093_v47 = vadd.f32 %v5198_v16, %v1018_v52  ;;  %v912_v17 = vmul.f32 %v3925_v28, %v4888_v37  ;;  %v911_v41 = vmul.f32 %v3925_v28, %v4885_v60  ;;  %v3828_v52 = vld [vmem:[#allocation8 + $0x3c] ss:$24 sps:$4 sm:$0xff]  }
 0x207   : > { %v818_v58 = vmul.f32 0.00390625, %v734_v29  ;;  %3934 = vrsqrt.f32 %v866_v46  ;;  %v835_v62 = vmul.f32 0.00390625, %v785_v53  ;;  %v945_v37 = vmul.f32 %v3923_v14, %v4899_v10  ;;  %v3826_v14 = vld [vmem:[#allocation8 + $0x38] ss:$24 sps:$4 sm:$0xff]  }
 0x208   : > { %v5217_v56 = vpack.c.bf16 %v1094_v3, %v1092_v36  ;;  %v3927_v8 = vpop.eup %3926  ;;  %v5220_v13 = vpack.c.bf16 %v1093_v47, %v1091_v6  ;;  %v987_v9 = vmul.f32 %v5188_v59, %v912_v17  ;;  %v986_v29 = vmul.f32 %v5192_v61, %v911_v41 }
 0x209   : > { %v737_v7 = vpop.xlane.xlu0 %736  ;;  %v3929_v60 = vpop.eup %3928  ;;  %v1059_v28 = vadd.f32 %v5198_v16, %v984_v5  ;;  %v948_v49 = vmul.f32 %v3927_v8, %v4908_v1  ;;  %v1021_v53 = vmul.f32 %v5188_v59, %v946_v42  ;;  %v850_v36 = vadd.f32 1e-05, %v818_v58  ;;  %v3823_v1 = vld [vmem:[#allocation8 + $0x10] ss:$24 sps:$4 sm:$0xff]  }
 0x20a   : > { %v788_v51 = vpop.xlane.xlu1 %787  ;;  %6224 = vst [vmem:[#allocation36_spill] sm:$0xff] %v5220_v13  ;;  %v819_v46 = vmul.f32 0.00390625, %v737_v7  ;;  %1875 = vmatprep.mubr.bf16.mxu1 %v5217_v56  ;;  %v1062_v3 = vadd.f32 %v5195_v22, %v987_v9  ;;  %v1061_v47 = vadd.f32 %v5198_v16, %v986_v29  ;;  %3936 = vrsqrt.f32 %v849_v12  ;;  %v3834_v29 = vld [vmem:[#allocation8 + $0x6c] ss:$24 sps:$4 sm:$0xff]  }
 0x20b   : > { %v836_v6 = vmul.f32 0.00390625, %v788_v51  ;;  %1876 = vmatmul.mubr.bf16.vlgmr.msra.gmra.mrb[0].mxu1 %v5220_v13  ;;  %v867_v10 = vadd.f32 1e-05, %v835_v62  ;;  %v1023_v17 = vmul.f32 %v5188_v59, %v948_v49  ;;  %v947_v5 = vmul.f32 %v3927_v8, %v4905_v45  ;;  %v3831_v8 = vld [vmem:[#allocation8 + $0x44] ss:$24 sps:$4 sm:$0xff]  }
 0x20c   : > { %1957 = vmatpush1.bf16.msra.mxu1 %v3820_v31  ;;  %v3931_v41 = vpop.eup %3930  ;;  %v5234_v42 = vpack.c.bf16 %v1062_v3, %v1060_v55  ;;  %v5236_v51 = vpack.c.bf16 %v1061_v47, %v1059_v28  ;;  %v1020_v9 = vmul.f32 %v5192_v61, %v945_v37  ;;  %v914_v12 = vmul.f32 %v3929_v60, %v4922_v34 }
 0x20d   : > { %v791_v7 = vpop.xlane.xlu0 %790  ;;  %1958 = vmatprep.subr.bf16.mxu1 %v3828_v52  ;;  %v851_v62 = vadd.f32 1e-05, %v819_v46  ;;  %v1096_v49 = vadd.f32 %v5195_v22, %v1021_v53  ;;  %v1098_v45 = vadd.f32 %v5195_v22, %v1023_v17  ;;  %v5242_v13 = vpop.eup %3932  ;;  %3938 = vrsqrt.f32 %v850_v36  ;;  %v3832_v53 = vld [vmem:[#allocation8 + $0x68] ss:$24 sps:$4 sm:$0xff]  }
 0x20e   : > { %v740_v58 = vpop.xlane.xlu1 %739  ;;  %v837_v31 = vmul.f32 0.00390625, %v791_v7  ;;  %v868_v55 = vadd.f32 1e-05, %v836_v6  ;;  %1795 = vmatprep.mubr.bf16.mxu0 %v5234_v42  ;;  %v1022_v52 = vmul.f32 %v5192_v61, %v947_v5  ;;  %v916_v37 = vmul.f32 %v3931_v41, %v4928_v54  ;;  %v3829_v6 = vld [vmem:[#allocation8 + $0x40] ss:$24 sps:$4 sm:$0xff]  }
 0x20f   : > { %v820_v28 = vmul.f32 0.00390625, %v740_v58  ;;  %1796 = vmatmul.mubr.bf16.vlgmr.msra.gmra.mrb[0].mxu0 %v5236_v51  ;;  %v5248_v34 = vpack.c.bf16 %v1098_v45, %v1096_v49  ;;  %v1095_v46 = vadd.f32 %v5198_v16, %v1020_v9  ;;  %v989_v3 = vmul.f32 %v5188_v59, %v914_v12  ;;  %v3837_v5 = vld [vmem:[#allocation8 + $0x74] ss:$24 sps:$4 sm:$0xff]  }
 0x210   : > { %1959 = vmatpush1.bf16.msra.mxu1 %v3826_v14  ;;  %3940 = vrsqrt.f32 %v867_v10  ;;  %2150 = vmatpush1.bf16.msra.mxu0 %v3823_v1  ;;  %v1097_v17 = vadd.f32 %v5198_v16, %v1022_v52  ;;  %v991_v54 = vmul.f32 %v5188_v59, %v916_v37  ;;  %v913_v14 = vmul.f32 %v3929_v60, %v4919_v15  ;;  %v3840_v1 = vld [vmem:[#allocation8 + $0x9c] ss:$24 sps:$4 sm:$0xff]   ;;  %v3838_v60 = vld [vmem:[#allocation8 + $0x98] ss:$24 sps:$4 sm:$0xff]  }
 0x211   : > { %v743_v36 = vpop.xlane.xlu0 %742  ;;  %1960 = vmatprep.subr.bf16.mxu1 %v3834_v29  ;;  %v3935_v7 = vpop.eup %3934  ;;  %3942 = vrsqrt.f32 %v851_v62  ;;  %v869_v58 = vadd.f32 1e-05, %v837_v31  ;;  %1885 = vmatprep.mubr.bf16.mxu1 %v5248_v34  ;;  %v1064_v49 = vadd.f32 %v5195_v22, %v989_v3  ;;  %v915_v45 = vmul.f32 %v3931_v41, %v4925_v19 }
 0x212   : > { %v794_v47 = vpop.xlane.xlu1 %793  ;;  %v821_v9 = vmul.f32 0.00390625, %v743_v36  ;;  %2151 = vmatprep.subr.bf16.mxu0 %v3831_v8  ;;  %v5256_v12 = vpack.c.bf16 %v1097_v17, %v1095_v46  ;;  %v1066_v29 = vadd.f32 %v5195_v22, %v991_v54  ;;  %3944 = vrsqrt.f32 %v868_v55  ;;  %v3835_v46 = vld [vmem:[#allocation8 + $0x70] ss:$24 sps:$4 sm:$0xff]   ;;  %v3846_v55 = vld [vmem:[#allocation8 + $0xcc] ss:$24 sps:$4 sm:$0xff]  }
 0x213   : > { %v838_v10 = vmul.f32 0.00390625, %v794_v47  ;;  %v852_v52 = vadd.f32 1e-05, %v820_v28  ;;  %v988_v15 = vmul.f32 %v5192_v61, %v913_v14  ;;  %v950_v62 = vmul.f32 %v5242_v13, %v4942_v11  ;;  %v3843_v47 = vld [vmem:[#allocation8 + $0xa4] ss:$24 sps:$4 sm:$0xff]  }
 0x214   : > { %1961 = vmatpush1.bf16.msra.mxu1 %v3832_v53  ;;  %v853_v31 = vadd.f32 1e-05, %v821_v9  ;;  %2152 = vmatpush1.bf16.msra.mxu0 %v3829_v6  ;;  %v5265_v37 = vpack.c.bf16 %v1066_v29, %v1064_v49  ;;  %v990_v19 = vmul.f32 %v5192_v61, %v915_v45  ;;  %v952_v41 = vmul.f32 %v3935_v7, %v4948_v48  ;;  %v3937_v28 = vpop.eup %3936  ;;  %v3844_v9 = vld [vmem:[#allocation8 + $0xc8] ss:$24 sps:$4 sm:$0xff]  }
 0x215   : > { %1886 = vmatmul.mubr.bf16.gmra.mrb[4].mxu1 %v5256_v12  ;;  %v797_v8 = vpop.xlane.xlu0 %796  ;;  %3946 = vrsqrt.f32 %v869_v58  ;;  %v870_v53 = vadd.f32 1e-05, %v838_v10  ;;  %2153 = vmatprep.subr.bf16.mxu0 %v3837_v5  ;;  %v1063_v6 = vadd.f32 %v5198_v16, %v988_v15  ;;  %v1025_v54 = vmul.f32 %v5188_v59, %v950_v62  ;;  %v3841_v15 = vld [vmem:[#allocation8 + $0xa0] ss:$24 sps:$4 sm:$0xff]  }
 0x216   : > { %v746_v3 = vpop.xlane.xlu1 %745  ;;  %v839_v36 = vmul.f32 0.00390625, %v797_v8  ;;  %1962 = vmatprep.subr.bf16.mxu1 %v3840_v1  ;;  %1805 = vmatprep.mubr.bf16.mxu0 %v5265_v37  ;;  %v1065_v17 = vadd.f32 %v5198_v16, %v990_v19  ;;  %v1027_v14 = vmul.f32 %v5188_v59, %v952_v41  ;;  %3948 = vrsqrt.f32 %v852_v52 }
 0x217   : > { %v822_v11 = vmul.f32 0.00390625, %v746_v3  ;;  %v949_v58 = vmul.f32 %v5242_v13, %v4939_v21  ;;  %v951_v5 = vmul.f32 %v3935_v7, %v4945_v2  ;;  %v3939_v10 = vpop.eup %3938  ;;  %3950 = vrsqrt.f32 %v853_v31  ;;  %v3852_v13 = vld [vmem:[#allocation8 + $0xfc] ss:$24 sps:$4 sm:$0xff]  }
 0x218   : > { %v871_v48 = vadd.f32 1e-05, %v839_v36  ;;  %1963 = vmatpush1.bf16.msra.mxu1 %v3838_v60  ;;  %v5277_v1 = vpack.c.bf16 %v1065_v17, %v1063_v6  ;;  %2154 = vmatpush1.bf16.msra.mxu0 %v3835_v46  ;;  %v1100_v29 = vadd.f32 %v5195_v22, %v1025_v54  ;;  %v1102_v45 = vadd.f32 %v5195_v22, %v1027_v14  ;;  %v3849_v60 = vld [vmem:[#allocation8 + $0xd4] ss:$24 sps:$4 sm:$0xff]  }
 0x219   : > { %v749_v49 = vpop.xlane.xlu0 %748  ;;  %1964 = vmatprep.subr.bf16.mxu1 %v3846_v55  ;;  %v854_v62 = vadd.f32 1e-05, %v822_v11  ;;  %2155 = vmatprep.subr.bf16.mxu0 %v3843_v47  ;;  %v1024_v2 = vmul.f32 %v5192_v61, %v949_v58  ;;  %3952 = vrsqrt.f32 %v870_v53  ;;  %v1026_v46 = vmul.f32 %v5192_v61, %v951_v5  ;;  %v3850_v11 = vld [vmem:[#allocation8 + $0xf8] ss:$24 sps:$4 sm:$0xff]   ;;  %v6225_v14 = vld [vmem:[#allocation39_spill] sm:$0xff] }
 0x21a   : > { %v800_v52 = vpop.xlane.xlu1 %799  ;;  %v823_v8 = vmul.f32 0.00390625, %v749_v49  ;;  %v5282_v7 = vpop.eup %3940  ;;  %1806 = vmatmul.mubr.bf16.gmra.mrb[4].mxu0 %v5277_v1  ;;  %v5285_v31 = vpack.c.bf16 %v1102_v45, %v1100_v29  ;;  %v918_v3 = vmul.f32 %v3937_v28, %v4962_v18  ;;  %3954 = vrsqrt.f32 %v871_v48  ;;  %v3847_v18 = vld [vmem:[#allocation8 + $0xd0] ss:$24 sps:$4 sm:$0xff]   ;;  %v3855_v49 = vld [vmem:[#allocation8 + $0x104] ss:$24 sps:$4 sm:$0xff]  }
 0x21b   : > { %v840_v21 = vmul.f32 0.00390625, %v800_v52  ;;  %v5289_v19 = vpop.eup %3942  ;;  %v1099_v55 = vadd.f32 %v5198_v16, %v1024_v2  ;;  %v920_v36 = vmul.f32 %v3939_v10, %v4968_v20  ;;  %v1101_v47 = vadd.f32 %v5198_v16, %v1026_v46  ;;  %v3858_v29 = vld [vmem:[#allocation8 + $0x12c] ss:$24 sps:$4 sm:$0xff]   ;;  %v3853_v46 = vld [vmem:[#allocation8 + $0x100] ss:$24 sps:$4 sm:$0xff]  }
 0x21c   : > { %v855_v41 = vadd.f32 1e-05, %v823_v8  ;;  %1965 = vmatpush1.bf16.msra.mxu1 %v3844_v9  ;;  %1895 = vmatprep.mubr.bf16.mxu1 %v5285_v31  ;;  %v993_v17 = vmul.f32 %v5188_v59, %v918_v3  ;;  %v917_v48 = vmul.f32 %v3937_v28, %v6225_v14  ;;  %v3945_v58 = vpop.eup %3944  ;;  %3956 = vrsqrt.f32 %v854_v62 }
 0x21d   : > { %v872_v53 = vadd.f32 1e-05, %v840_v21  ;;  %2156 = vmatpush1.bf16.msra.mxu0 %v3841_v15  ;;  %v803_v6 = vpop.xlane.xlu0 %802  ;;  %v995_v9 = vmul.f32 %v5188_v59, %v920_v36  ;;  %1966 = vmatprep.subr.bf16.mxu1 %v3852_v13  ;;  %v5298_v45 = vpack.c.bf16 %v1101_v47, %v1099_v55  ;;  %v919_v15 = vmul.f32 %v3939_v10, %v4965_v57  ;;  %v3864_v47 = vld [vmem:[#allocation8 + $0x15c] ss:$24 sps:$4 sm:$0xff]  }
 0x21e   : > { %v752_v54 = vpop.xlane.xlu1 %751  ;;  %v841_v5 = vmul.f32 0.00390625, %v803_v6  ;;  %2157 = vmatprep.subr.bf16.mxu0 %v3849_v60  ;;  %3958 = vrsqrt.f32 %v855_v41  ;;  %v1068_v28 = vadd.f32 %v5195_v22, %v993_v17  ;;  %v992_v21 = vmul.f32 %v5192_v61, %v917_v48  ;;  %v3856_v60 = vld [vmem:[#allocation8 + $0x128] ss:$24 sps:$4 sm:$0xff]   ;;  %v3861_v41 = vld [vmem:[#allocation8 + $0x134] ss:$24 sps:$4 sm:$0xff]  }
 0x21f   : > { %v824_v20 = vmul.f32 0.00390625, %v752_v54  ;;  %v5301_v52 = vpop.eup %3946  ;;  %v1070_v62 = vadd.f32 %v5195_v22, %v995_v9  ;;  %3960 = vrsqrt.f32 %v872_v53  ;;  %1896 = vmatmul.mubr.bf16.gmra.mrb[8].mxu1 %v5298_v45  ;;  %v994_v2 = vmul.f32 %v5192_v61, %v919_v15  ;;  %v3862_v9 = vld [vmem:[#allocation8 + $0x158] ss:$24 sps:$4 sm:$0xff]  }
 0x220   : > { %v873_v8 = vadd.f32 1e-05, %v841_v5  ;;  %1967 = vmatpush1.bf16.msra.mxu1 %v3850_v11  ;;  %v954_v57 = vmul.f32 %v5282_v7, %v4982_v24  ;;  %v956_v10 = vmul.f32 %v3945_v58, %v4988_v26  ;;  %v5311_v55 = vpop.eup %3948  ;;  %v1067_v17 = vadd.f32 %v5198_v16, %v992_v21 }
 0x221   : > { %2158 = vmatpush1.bf16.msra.mxu0 %v3847_v18  ;;  %v755_v13 = vpop.xlane.xlu0 %754  ;;  %v5313_v36 = vpack.c.bf16 %v1070_v62, %v1068_v28  ;;  %v856_v11 = vadd.f32 1e-05, %v824_v20  ;;  %1968 = vmatprep.subr.bf16.mxu1 %v3858_v29  ;;  %v5315_v6 = vpop.eup %3950  ;;  %v1069_v24 = vadd.f32 %v5198_v16, %v994_v2  ;;  %v953_v48 = vmul.f32 %v5282_v7, %v4979_v63  ;;  %v3859_v62 = vld [vmem:[#allocation8 + $0x130] ss:$24 sps:$4 sm:$0xff]   ;;  %v3870_v2 = vld [vmem:[#allocation8 + $0x18c] ss:$24 sps:$4 sm:$0xff]  }
 0x222   : > { %v806_v3 = vpop.xlane.xlu1 %805  ;;  %3962 = vrsqrt.f32 %v873_v8  ;;  %v825_v53 = vmul.f32 0.00390625, %v755_v13  ;;  %2159 = vmatprep.subr.bf16.mxu0 %v3855_v49  ;;  %v1029_v26 = vmul.f32 %v5188_v59, %v954_v57  ;;  %v1031_v18 = vmul.f32 %v5188_v59, %v956_v10 }
 0x223   : > { %1815 = vmatprep.mubr.bf16.mxu0 %v5313_v36  ;;  %v842_v14 = vmul.f32 0.00390625, %v806_v3  ;;  %v955_v5 = vmul.f32 %v3945_v58, %v4985_v25  ;;  %v5325_v20 = vpop.eup %3952  ;;  %v5327_v49 = vpack.c.bf16 %v1069_v24, %v1067_v17  ;;  %v922_v28 = vmul.f32 %v5289_v19, %v5002_v23 }
 0x224   : > { %v857_v54 = vadd.f32 1e-05, %v825_v53  ;;  %1969 = vmatpush1.bf16.msra.mxu1 %v3856_v60  ;;  %v1104_v29 = vadd.f32 %v5195_v22, %v1029_v26  ;;  %v1106_v15 = vadd.f32 %v5195_v22, %v1031_v18  ;;  %v5333_v63 = vpop.eup %3954  ;;  %3964 = vrsqrt.f32 %v856_v11  ;;  %v3867_v60 = vld [vmem:[#allocation8 + $0x164] ss:$24 sps:$4 sm:$0xff]   ;;  %v3865_v53 = vld [vmem:[#allocation8 + $0x160] ss:$24 sps:$4 sm:$0xff]  }
 0x225   : > { %2160 = vmatpush1.bf16.msra.mxu0 %v3853_v46  ;;  %v809_v8 = vpop.xlane.xlu0 %808  ;;  %v874_v25 = vadd.f32 1e-05, %v842_v14  ;;  %v1028_v7 = vmul.f32 %v5192_v61, %v953_v48  ;;  %v1030_v58 = vmul.f32 %v5192_v61, %v955_v5  ;;  %1970 = vmatprep.subr.bf16.mxu1 %v3864_v47  ;;  %v924_v23 = vmul.f32 %v5311_v55, %v5008_v33  ;;  %v3873_v14 = vld [vmem:[#allocation8 + $0x194] ss:$24 sps:$4 sm:$0xff]  }
 0x226   : > { %v758_v21 = vpop.xlane.xlu1 %757  ;;  %2161 = vmatprep.subr.bf16.mxu0 %v3861_v41  ;;  %1816 = vmatmul.mubr.bf16.gmra.mrb[8].mxu0 %v5327_v49  ;;  %v5338_v13 = vpack.c.bf16 %v1106_v15, %v1104_v29  ;;  %v843_v57 = vmul.f32 0.00390625, %v809_v8  ;;  %v997_v10 = vmul.f32 %v5188_v59, %v922_v28  ;;  %v5343_v46 = vpop.eup %3956  ;;  %3966 = vrsqrt.f32 %v857_v54  ;;  %v3868_v54 = vld [vmem:[#allocation8 + $0x188] ss:$24 sps:$4 sm:$0xff]   ;;  %v3876_v15 = vld [vmem:[#allocation8 + $0x1bc] ss:$24 sps:$4 sm:$0xff]  }
 0x227   : > { %v1103_v3 = vadd.f32 %v5198_v16, %v1028_v7  ;;  %v1105_v41 = vadd.f32 %v5198_v16, %v1030_v58  ;;  %v826_v11 = vmul.f32 0.00390625, %v758_v21  ;;  %3968 = vrsqrt.f32 %v874_v25 }
 0x228   : > { %1971 = vmatpush1.bf16.msra.mxu1 %v3862_v9  ;;  %v5347_v47 = vpop.eup %3958  ;;  %1905 = vmatprep.mubr.bf16.mxu1 %v5338_v13  ;;  %v875_v17 = vadd.f32 1e-05, %v843_v57  ;;  %v999_v33 = vmul.f32 %v5188_v59, %v924_v23  ;;  %v921_v24 = vmul.f32 %v5289_v19, %v4999_v0  ;;  %v923_v9 = vmul.f32 %v5311_v55, %v5005_v32  ;;  %v3874_v57 = vld [vmem:[#allocation8 + $0x1b8] ss:$24 sps:$4 sm:$0xff]  }
 0x229   : > { %2162 = vmatpush1.bf16.msra.mxu0 %v3859_v62  ;;  %v761_v26 = vpop.xlane.xlu0 %760  ;;  %v5353_v48 = vpack.c.bf16 %v1105_v41, %v1103_v3  ;;  %v858_v5 = vadd.f32 1e-05, %v826_v11  ;;  %1972 = vmatprep.subr.bf16.mxu1 %v3870_v2  ;;  %v5357_v8 = vpop.eup %3960  ;;  %v1072_v28 = vadd.f32 %v5195_v22, %v997_v10  ;;  %v958_v62 = vmul.f32 %v5301_v52, %v5022_v30  ;;  %v3871_v30 = vld [vmem:[#allocation8 + $0x190] ss:$24 sps:$4 sm:$0xff]  }
 0x22a   : > { %v812_v18 = vpop.xlane.xlu1 %811  ;;  %v827_v29 = vmul.f32 0.00390625, %v761_v26  ;;  %2163 = vmatprep.subr.bf16.mxu0 %v3867_v60  ;;  %v1074_v0 = vadd.f32 %v5195_v22, %v999_v33  ;;  %v996_v19 = vmul.f32 %v5192_v61, %v921_v24  ;;  %3970 = vrsqrt.f32 %v875_v17  ;;  %v3879_v33 = vld [vmem:[#allocation8 + $0x1c4] ss:$24 sps:$4 sm:$0xff]  }
 0x22b   : > { %1906 = vmatmul.mubr.bf16.gmra.mrb[12].mxu1 %v5353_v48  ;;  %v998_v32 = vmul.f32 %v5192_v61, %v923_v9  ;;  %v960_v25 = vmul.f32 %v5325_v20, %v5028_v39  ;;  %v1033_v60 = vmul.f32 %v5188_v59, %v958_v62  ;;  %v844_v2 = vmul.f32 0.00390625, %v812_v18  ;;  %v3882_v24 = vld [vmem:[#allocation8 + $0x1ec] ss:$24 sps:$4 sm:$0xff]  }
 0x22c   : > { %v5364_v21 = vpop.eup %3962  ;;  %v859_v55 = vadd.f32 1e-05, %v827_v29  ;;  %v5370_v7 = vpack.c.bf16 %v1074_v0, %v1072_v28  ;;  %v1071_v58 = vadd.f32 %v5198_v16, %v996_v19  ;;  %1973 = vmatpush1.bf16.msra.mxu1 %v3868_v54  ;;  %3972 = vrsqrt.f32 %v858_v5  ;;  %v3880_v5 = vld [vmem:[#allocation8 + $0x1e8] ss:$24 sps:$4 sm:$0xff]   ;;  %v3885_v0 = vld [vmem:[#allocation8 + $0x1f4] ss:$24 sps:$4 sm:$0xff]  }
 0x22d   : > { %2164 = vmatpush1.bf16.msra.mxu0 %v3865_v53  ;;  %v1073_v23 = vadd.f32 %v5198_v16, %v998_v32  ;;  %v1035_v10 = vmul.f32 %v5188_v59, %v960_v25  ;;  %v957_v3 = vmul.f32 %v5301_v52, %v5019_v4  ;;  %1974 = vmatprep.subr.bf16.mxu1 %v3876_v15  ;;  %v876_v11 = vadd.f32 1e-05, %v844_v2 }
 0x22e   : > { %2165 = vmatprep.subr.bf16.mxu0 %v3873_v14  ;;  %v764_v39 = vpop.xlane.xlu1 %763  ;;  %1825 = vmatprep.mubr.bf16.mxu0 %v5370_v7  ;;  %v1108_v41 = vadd.f32 %v5195_v22, %v1033_v60  ;;  %v959_v53 = vmul.f32 %v5325_v20, %v5025_v38  ;;  %v926_v17 = vmul.f32 %v5315_v6, %v5042_v35  ;;  %v5384_v26 = vpop.eup %3964  ;;  %3974 = vrsqrt.f32 %v859_v55  ;;  %v3877_v35 = vld [vmem:[#allocation8 + $0x1c0] ss:$24 sps:$4 sm:$0xff]  }
 0x22f   : > { %v5386_v18 = vpack.c.bf16 %v1073_v23, %v1071_v58  ;;  %v1110_v4 = vadd.f32 %v5195_v22, %v1035_v10  ;;  %v1032_v52 = vmul.f32 %v5192_v61, %v957_v3  ;;  %v928_v54 = vmul.f32 %v5343_v46, %v5048_v44 }
 0x230   : > { %v1034_v14 = vmul.f32 %v5192_v61, %v959_v53  ;;  %v1001_v38 = vmul.f32 %v5188_v59, %v926_v17  ;;  %v828_v20 = vmul.f32 0.00390625, %v764_v39  ;;  %1975 = vmatpush1.bf16.msra.mxu1 %v3874_v57  ;;  %v5394_v9 = vpop.eup %3966  ;;  %v925_v28 = vmul.f32 %v5315_v6, %v5039_v27  ;;  %v3888_v57 = vld [vmem:[#allocation8 + $0x21c] ss:$24 sps:$4 sm:$0xff]   ;;  %v3883_v39 = vld [vmem:[#allocation8 + $0x1f0] ss:$24 sps:$4 sm:$0xff]  }
 0x231   : > { %2166 = vmatpush1.bf16.msra.mxu0 %v3871_v30  ;;  %v5397_v29 = vpack.c.bf16 %v1110_v4, %v1108_v41  ;;  %v1107_v15 = vadd.f32 %v5198_v16, %v1032_v52  ;;  %v1003_v44 = vmul.f32 %v5188_v59, %v928_v54  ;;  %v5403_v19 = vpop.eup %3968  ;;  %3976 = vrsqrt.f32 %v876_v11  ;;  %1976 = vmatprep.subr.bf16.mxu1 %v3882_v24  ;;  %v6228_v17 = vld [vmem:[#allocation43_spill] sm:$0xff]  ;;  %v3886_v24 = vld [vmem:[#allocation8 + $0x218] ss:$24 sps:$4 sm:$0xff]  }
 0x232   : > { %1826 = vmatmul.mubr.bf16.gmra.mrb[12].mxu0 %v5386_v18  ;;  %v1109_v62 = vadd.f32 %v5198_v16, %v1034_v14  ;;  %v1076_v32 = vadd.f32 %v5195_v22, %v1001_v38  ;;  %v927_v55 = vmul.f32 %v5343_v46, %v5045_v43  ;;  %2167 = vmatprep.subr.bf16.mxu0 %v3879_v33  ;;  %v860_v2 = vadd.f32 1e-05, %v828_v20  ;;  %v6226_v43 = vld [vmem:[#allocation40_spill] sm:$0xff]  ;;  %v6229_v14 = vld [vmem:[#allocation45_spill] sm:$0xff]  ;;  %v6230_v20 = vld [vmem:[#allocation42_spill] sm:$0xff] }
 0x233   : > { %1915 = vmatprep.mubr.bf16.mxu1 %v5397_v29  ;;  %v1078_v25 = vadd.f32 %v5195_v22, %v1003_v44  ;;  %v1000_v58 = vmul.f32 %v5192_v61, %v925_v28  ;;  %v962_v27 = vmul.f32 %v5333_v63, %v5062_v40  ;;  %v964_v6 = vmul.f32 %v5357_v8, %v5068_v50  ;;  %v3891_v28 = vld [vmem:[#allocation8 + $0x224] ss:$24 sps:$4 sm:$0xff]  }
 0x234   : > { %v5416_v60 = vpack.c.bf16 %v1109_v62, %v1107_v15  ;;  %v1002_v30 = vmul.f32 %v5192_v61, %v927_v55  ;;  %v961_v46 = vmul.f32 %v5333_v63, %v6226_v43  ;;  %1977 = vmatpush1.bf16.msra.mxu1 %v3880_v5  ;;  %v5421_v23 = vpop.eup %3970  ;;  %v6227_v63 = vld [vmem:[#allocation41_spill] sm:$0xff]  ;;  %v930_v33 = vmul.f32 %v5347_v47, %v6228_v17  ;;  %v6232_v43 = vld [vmem:[#allocation23_spill] sm:$0xff]  ;;  %v6235_v17 = vld [vmem:[#allocation24_spill] sm:$0xff] }
 0x235   : > { %2168 = vmatpush1.bf16.msra.mxu0 %v3877_v35  ;;  %v5423_v10 = vpack.c.bf16 %v1078_v25, %v1076_v32  ;;  %v1075_v40 = vadd.f32 %v5198_v16, %v1000_v58  ;;  %v1037_v3 = vmul.f32 %v5188_v59, %v962_v27  ;;  %v1039_v50 = vmul.f32 %v5188_v59, %v964_v6  ;;  %v6231_v32 = vld [vmem:[#allocation44_spill] sm:$0xff] }
 0x236   : > { %2169 = vmatprep.subr.bf16.mxu0 %v3885_v0  ;;  %1916 = vmatmul.mubr.bf16.gmra.mrb[16].mxu1 %v5416_v60  ;;  %v1077_v41 = vadd.f32 %v5198_v16, %v1002_v30  ;;  %v963_v11 = vmul.f32 %v5357_v8, %v6227_v63  ;;  %v1036_v53 = vmul.f32 %v5192_v61, %v961_v46  ;;  %v5435_v4 = vpop.eup %3972  ;;  %v3894_v58 = vld [vmem:[#allocation8 + $0x24c] ss:$24 sps:$4 sm:$0xff]   ;;  %3978 = vrsqrt.f32 %v860_v2 }
 0x237   : > { %1835 = vmatprep.mubr.bf16.mxu0 %v5423_v10  ;;  %v1112_v52 = vadd.f32 %v5195_v22, %v1037_v3  ;;  %v1114_v54 = vadd.f32 %v5195_v22, %v1039_v50  ;;  %v932_v38 = vmul.f32 %v5384_v26, %v6229_v14  ;;  %v929_v8 = vmul.f32 %v5347_v47, %v6230_v20  ;;  %v3889_v47 = vld [vmem:[#allocation8 + $0x220] ss:$24 sps:$4 sm:$0xff]   ;;  %v3900_v20 = vld [vmem:[#allocation8 + $0x27c] ss:$24 sps:$4 sm:$0xff]  }
 0x238   : > { %v5444_v35 = vpack.c.bf16 %v1077_v41, %v1075_v40  ;;  %v1038_v5 = vmul.f32 %v5192_v61, %v963_v11  ;;  %v1111_v15 = vadd.f32 %v5198_v16, %v1036_v53  ;;  %v1005_v44 = vmul.f32 %v5188_v59, %v930_v33  ;;  %1978 = vmatprep.subr.bf16.mxu1 %v3888_v57  ;;  %v5455_v27 = vpop.eup %3974  ;;  %v6233_v3 = vld [vmem:[#allocation25_spill] sm:$0xff]  ;;  %v3892_v50 = vld [vmem:[#allocation8 + $0x248] ss:$24 sps:$4 sm:$0xff]  }
 0x239   : > { %v5449_v0 = vpack.c.bf16 %v1114_v54, %v1112_v52  ;;  %v1007_v62 = vmul.f32 %v5188_v59, %v932_v38  ;;  %v931_v55 = vmul.f32 %v5384_v26, %v6231_v32  ;;  %v1004_v25 = vmul.f32 %v5192_v61, %v929_v8  ;;  %2170 = vmatpush1.bf16.msra.mxu0 %v3883_v39  ;;  %v6234_v11 = vld [vmem:[#allocation46_spill] sm:$0xff]  ;;  %v3895_v38 = vld [vmem:[#allocation8 + $0x250] ss:$24 sps:$4 sm:$0xff]  }
 0x23a   : > { %1836 = vmatmul.mubr.bf16.gmra.mrb[16].mxu0 %v5444_v35  ;;  %v1113_v6 = vadd.f32 %v5198_v16, %v1038_v5  ;;  %v1080_v30 = vadd.f32 %v5195_v22, %v1005_v44  ;;  %1979 = vmatpush1.bf16.msra.mxu1 %v3886_v24  ;;  %v966_v46 = vmul.f32 %v5364_v21, %v6232_v43  ;;  %v3897_v24 = vld [vmem:[#allocation8 + $0x254] ss:$24 sps:$4 sm:$0xff]   ;;  %v3903_v43 = vld [vmem:[#allocation8 + $0x284] ss:$24 sps:$4 sm:$0xff]  }
 0x23b   : > { %1925 = vmatprep.mubr.bf16.mxu1 %v5449_v0  ;;  %v1082_v26 = vadd.f32 %v5195_v22, %v1007_v62  ;;  %v1006_v57 = vmul.f32 %v5192_v61, %v931_v55  ;;  %v1079_v40 = vadd.f32 %v5198_v16, %v1004_v25  ;;  %v968_v2 = vmul.f32 %v5403_v19, %v6233_v3  ;;  %v3977_v39 = vpop.eup %3976  ;;  %v6237_v62 = vld [vmem:[#allocation27_spill] sm:$0xff]  ;;  %v3898_v55 = vld [vmem:[#allocation8 + $0x278] ss:$24 sps:$4 sm:$0xff]  }
 0x23c   : > { %v5468_v41 = vpack.c.bf16 %v1113_v6, %v1111_v15  ;;  %v1041_v63 = vmul.f32 %v5188_v59, %v966_v46  ;;  %2171 = vmatprep.subr.bf16.mxu0 %v3891_v28  ;;  %v965_v53 = vmul.f32 %v5364_v21, %v6234_v11  ;;  %v967_v33 = vmul.f32 %v5403_v19, %v6235_v17  ;;  %v6236_v19 = vld [vmem:[#allocation26_spill] sm:$0xff]  ;;  %v6238_v6 = vld [vmem:[#allocation47_spill] sm:$0xff]  ;;  %v6240_v11 = vld [vmem:[#allocation29_spill] sm:$0xff] }
 0x23d   : > { %v5475_v52 = vpack.c.bf16 %v1082_v26, %v1080_v30  ;;  %v1081_v54 = vadd.f32 %v5198_v16, %v1006_v57  ;;  %v1043_v14 = vmul.f32 %v5188_v59, %v968_v2  ;;  %1980 = vmatprep.subr.bf16.mxu1 %v3894_v58  ;;  %2172 = vmatpush1.bf16.msra.mxu0 %v3889_v47  ;;  %v6239_v57 = vld [vmem:[#allocation48_spill] sm:$0xff]  ;;  %v3901_v3 = vld [vmem:[#allocation8 + $0x280] ss:$24 sps:$4 sm:$0xff]  }
 0x23e   : > { %1926 = vmatmul.mubr.bf16.gmra.mrb[20].mxu1 %v5468_v41  ;;  %v1116_v8 = vadd.f32 %v5195_v22, %v1041_v63  ;;  %v1040_v21 = vmul.f32 %v5192_v61, %v965_v53  ;;  %v1042_v5 = vmul.f32 %v5192_v61, %v967_v33  ;;  %v934_v15 = vmul.f32 %v5394_v9, %v6236_v19  ;;  %v3906_v2 = vld [vmem:[#allocation8 + $0x2ac] ss:$24 sps:$4 sm:$0xff]  }
 0x23f   : > { %1845 = vmatprep.mubr.bf16.mxu0 %v5475_v52  ;;  %v5486_v44 = vpack.c.bf16 %v1081_v54, %v1079_v40  ;;  %v1118_v28 = vadd.f32 %v5195_v22, %v1043_v14  ;;  %1981 = vmatpush1.bf16.msra.mxu1 %v3892_v50  ;;  %v936_v32 = vmul.f32 %v5435_v4, %v6237_v62  ;;  %v6241_v33 = vld [vmem:[#allocation30_spill] sm:$0xff] }
 0x240   : > { %v1115_v25 = vadd.f32 %v5198_v16, %v1040_v21  ;;  %v1117_v47 = vadd.f32 %v5198_v16, %v1042_v5  ;;  %v1009_v58 = vmul.f32 %v5188_v59, %v934_v15  ;;  %2173 = vmatprep.subr.bf16.mxu0 %v3897_v24  ;;  %v933_v30 = vmul.f32 %v5394_v9, %v6238_v6  ;;  %v3904_v54 = vld [vmem:[#allocation8 + $0x2a8] ss:$24 sps:$4 sm:$0xff]   ;;  %v3979_v14 = vpop.eup %3978  ;;  %v6243_v5 = vld [vmem:[#allocation49_spill] sm:$0xff] }
 0x241   : > { %v5496_v46 = vpack.c.bf16 %v1118_v28, %v1116_v8  ;;  %v1011_v26 = vmul.f32 %v5188_v59, %v936_v32  ;;  %v935_v40 = vmul.f32 %v5435_v4, %v6239_v57  ;;  %1982 = vmatprep.subr.bf16.mxu1 %v3900_v20  ;;  %2174 = vmatpush1.bf16.msra.mxu0 %v3895_v38  ;;  %v6242_v8 = vld [vmem:[#allocation28_spill] sm:$0xff]  ;;  %v6245_v57 = vld [vmem:[#allocation34_spill] sm:$0xff] }
 0x242   : > { %1846 = vmatmul.mubr.bf16.gmra.mrb[20].mxu0 %v5486_v44  ;;  %v5502_v50 = vpack.c.bf16 %v1117_v47, %v1115_v25  ;;  %v1084_v63 = vadd.f32 %v5195_v22, %v1009_v58  ;;  %v1008_v9 = vmul.f32 %v5192_v61, %v933_v30  ;;  %v970_v53 = vmul.f32 %v5421_v23, %v6240_v11  ;;  %v3909_v15 = vld [vmem:[#allocation8 + $0x2b4] ss:$24 sps:$4 sm:$0xff]   ;;  %v3915_v30 = vld [vmem:[#allocation8 + $0x2e4] ss:$24 sps:$4 sm:$0xff]  }
 0x243   : > { %1935 = vmatprep.mubr.bf16.mxu1 %v5496_v46  ;;  %v1086_v17 = vadd.f32 %v5195_v22, %v1011_v26  ;;  %v1010_v4 = vmul.f32 %v5192_v61, %v935_v40  ;;  %1983 = vmatpush1.bf16.msra.mxu1 %v3898_v55  ;;  %v972_v24 = vmul.f32 %v3977_v39, %v6241_v33  ;;  %v3907_v55 = vld [vmem:[#allocation8 + $0x2b0] ss:$24 sps:$4 sm:$0xff]   ;;  %v3912_v25 = vld [vmem:[#allocation8 + $0x2dc] ss:$24 sps:$4 sm:$0xff]  }
 0x244   : > { %v1083_v38 = vadd.f32 %v5198_v16, %v1008_v9  ;;  %v1045_v20 = vmul.f32 %v5188_v59, %v970_v53  ;;  %2175 = vmatprep.subr.bf16.mxu0 %v3903_v43  ;;  %v969_v21 = vmul.f32 %v5421_v23, %v6242_v8  ;;  %v971_v19 = vmul.f32 %v3977_v39, %v6243_v5  ;;  %v6244_v39 = vld [vmem:[#allocation32_spill] sm:$0xff]  ;;  %v6246_v11 = vld [vmem:[#allocation31_spill] sm:$0xff]  ;;  %v6247_v33 = vld [vmem:[#allocation33_spill] sm:$0xff] }
 0x245   : > { %v5517_v28 = vpack.c.bf16 %v1086_v17, %v1084_v63  ;;  %v1085_v62 = vadd.f32 %v5198_v16, %v1010_v4  ;;  %v1047_v32 = vmul.f32 %v5188_v59, %v972_v24  ;;  %1984 = vmatprep.subr.bf16.mxu1 %v3906_v2  ;;  %2176 = vmatpush1.bf16.msra.mxu0 %v3901_v3  ;;  %v3910_v3 = vld [vmem:[#allocation8 + $0x2d8] ss:$24 sps:$4 sm:$0xff]  }
 0x246   : > { %1936 = vmatmul.mubr.bf16.gmra.mrb[24].mxu1 %v5502_v50  ;;  %v1120_v47 = vadd.f32 %v5195_v22, %v1045_v20  ;;  %v1044_v58 = vmul.f32 %v5192_v61, %v969_v21  ;;  %v1046_v23 = vmul.f32 %v5192_v61, %v971_v19  ;;  %v938_v6 = vmul.f32 %v5455_v27, %v6244_v39 }
 0x247   : > { %1855 = vmatprep.mubr.bf16.mxu0 %v5517_v28  ;;  %v1135_v43 = vpack.c.bf16 %v1085_v62, %v1083_v38  ;;  %v1122_v26 = vadd.f32 %v5195_v22, %v1047_v32  ;;  %1985 = vmatpush1.bf16.msra.mxu1 %v3904_v54  ;;  %v940_v40 = vmul.f32 %v3979_v14, %v6245_v57  ;;  %v3913_v54 = vld [vmem:[#allocation8 + $0x2e0] ss:$24 sps:$4 sm:$0xff]  }
 0x248   : > { %v1119_v2 = vadd.f32 %v5198_v16, %v1044_v58  ;;  %v1121_v63 = vadd.f32 %v5198_v16, %v1046_v23  ;;  %v1013_v9 = vmul.f32 %v5188_v59, %v938_v6  ;;  %2177 = vmatprep.subr.bf16.mxu0 %v3909_v15  ;;  %v937_v53 = vmul.f32 %v5455_v27, %v6246_v11 }
 0x249   : > { %v5535_v17 = vpack.c.bf16 %v1122_v26, %v1120_v47  ;;  %v1015_v4 = vmul.f32 %v5188_v59, %v940_v40  ;;  %v939_v24 = vmul.f32 %v3979_v14, %v6247_v33  ;;  %1986 = vmatprep.subr.bf16.mxu1 %v3912_v25  ;;  %2178 = vmatpush1.bf16.msra.mxu0 %v3907_v55 }
 0x24a   : > { %1856 = vmatmul.mubr.bf16.gmra.mrb[24].mxu0 %v1135_v43  ;;  %v5539_v38 = vpack.c.bf16 %v1121_v63, %v1119_v2  ;;  %v1012_v20 = vmul.f32 %v5192_v61, %v937_v53  ;;  %2179 = vmatprep.subr.bf16.mxu0 %v3915_v30  ;;  %v1088_v8 = vadd.f32 %v5195_v22, %v1013_v9 }
 0x24b   : > { %1945 = vmatprep.mubr.bf16.mxu1 %v5535_v17  ;;  %v1090_v27 = vadd.f32 %v5195_v22, %v1015_v4  ;;  %v1014_v21 = vmul.f32 %v5192_v61, %v939_v24  ;;  %1987 = vmatpush1.bf16.msra.mxu1 %v3910_v3  ;;  %v6248_v61 = vld [vmem:[#allocation36_spill] sm:$0xff]  ;;  %v5607_v22 = vld [vmem:[#allocation10] sm:$0x3f] }
 0x24c   : > { %v1087_v14 = vadd.f32 %v5198_v16, %v1012_v20 }
 0x24d   : > { %v1138_v59 = vpack.c.bf16 %v1090_v27, %v1088_v8  ;;  %v1089_v5 = vadd.f32 %v5198_v16, %v1014_v21  ;;  %2180 = vmatpush1.bf16.msra.mxu0 %v3913_v54  ;;  %v6249_v16 = vld [vmem:[#allocation52_spill] sm:$0xff] }
 0x24e   : > { %1946 = vmatmul.mubr.bf16.gmra.mrb[28].mxu1 %v5539_v38 }
 0x24f   : > { %1988 = vmatprep.mubr.bf16.mxu1 %v5234_v42  ;;  %1865 = vmatprep.mubr.bf16.mxu0 %v1138_v59  ;;  %v1137_v19 = vpack.c.bf16 %v1089_v5, %v1087_v14 }
 0x252   : > { %1866 = vmatmul.mubr.bf16.gmra.mrb[28].mxu0 %v1137_v19 }
 0x253   : > { %2181 = vmatprep.mubr.bf16.mxu0 %v5234_v42  ;;  %v6250_v42 = vld [vmem:[#allocation51_spill] sm:$0xff] }
 0x256   : > { %1989 = vmatmul.mubr.bf16.vlgmr.msra.gmra.mrb[32].mxu1 %v5236_v51 }
 0x257   : > { %1998 = vmatprep.mubr.bf16.mxu1 %v5265_v37 }
 0x25a   : > { %2182 = vmatmul.mubr.bf16.vlgmr.msra.gmra.mrb[32].mxu0 %v5236_v51  ;;  %v5615_v51 = vrot.slane %v5607_v22, %v6250_v42 }
 0x25b   : > { %2191 = vmatprep.mubr.bf16.mxu0 %v5265_v37 }
 0x25e   : > { %1999 = vmatmul.mubr.bf16.gmra.mrb[36].mxu1 %v5277_v1 }
 0x25f   : > { %2008 = vmatprep.mubr.bf16.mxu1 %v5313_v36 }
 0x262   : > { %2192 = vmatmul.mubr.bf16.gmra.mrb[36].mxu0 %v5277_v1 }
 0x263   : > { %2201 = vmatprep.mubr.bf16.mxu0 %v5313_v36 }
 0x266   : > { %2009 = vmatmul.mubr.bf16.gmra.mrb[40].mxu1 %v5327_v49 }
 0x267   : > { %2018 = vmatprep.mubr.bf16.mxu1 %v5370_v7 }
 0x26a   : > { %2202 = vmatmul.mubr.bf16.gmra.mrb[40].mxu0 %v5327_v49 }
 0x26b   : > { %2211 = vmatprep.mubr.bf16.mxu0 %v5370_v7 }
 0x26e   : > { %2019 = vmatmul.mubr.bf16.gmra.mrb[44].mxu1 %v5386_v18 }
 0x26f   : > { %2028 = vmatprep.mubr.bf16.mxu1 %v5423_v10 }
 0x272   : > { %2212 = vmatmul.mubr.bf16.gmra.mrb[44].mxu0 %v5386_v18 }
 0x273   : > { %2221 = vmatprep.mubr.bf16.mxu0 %v5423_v10 }
 0x276   : > { %2029 = vmatmul.mubr.bf16.gmra.mrb[48].mxu1 %v5444_v35 }
 0x277   : > { %2038 = vmatprep.mubr.bf16.mxu1 %v5475_v52 }
 0x27a   : > { %2222 = vmatmul.mubr.bf16.gmra.mrb[48].mxu0 %v5444_v35 }
 0x27b   : > { %2231 = vmatprep.mubr.bf16.mxu0 %v5475_v52 }
 0x27e   : > { %2039 = vmatmul.mubr.bf16.gmra.mrb[52].mxu1 %v5486_v44 }
 0x27f   : > { %2048 = vmatprep.mubr.bf16.mxu1 %v5517_v28 }
 0x282   : > { %2232 = vmatmul.mubr.bf16.gmra.mrb[52].mxu0 %v5486_v44 }
 0x283   : > { %2241 = vmatprep.mubr.bf16.mxu0 %v5517_v28 }
 0x286   : > { %2049 = vmatmul.mubr.bf16.gmra.mrb[56].mxu1 %v1135_v43 }
 0x287   : > { %2058 = vmatprep.mubr.bf16.mxu1 %v1138_v59 }
 0x28a   : > { %2242 = vmatmul.mubr.bf16.gmra.mrb[56].mxu0 %v1135_v43 }
 0x28b   : > { %2251 = vmatprep.mubr.bf16.mxu0 %v1138_v59 }
 0x28e   : > { %2059 = vmatmul.mubr.bf16.gmra.mrb[60].mxu1 %v1137_v19 }
 0x28f   : > { %2068 = vmatprep.mubr.bf16.mxu1 %v5217_v56 }
 0x292   : > { %2252 = vmatmul.mubr.bf16.gmra.mrb[60].mxu0 %v1137_v19 }
 0x293   : > { %2261 = vmatprep.mubr.bf16.mxu0 %v5217_v56  ;;  %v5611_v56 = vrot.slane %v5607_v22, %v6249_v16 }
 0x296   : > { %2069 = vmatmul.mubr.bf16.gmra.mrb[64].mxu1 %v6248_v61 }
 0x297   : > { %2078 = vmatprep.mubr.bf16.mxu1 %v5248_v34 }
 0x29a   : > { %2262 = vmatmul.mubr.bf16.gmra.mrb[64].mxu0 %v6248_v61 }
 0x29b   : > { %2271 = vmatprep.mubr.bf16.mxu0 %v5248_v34 }
 0x29e   : > { %2079 = vmatmul.mubr.bf16.gmra.mrb[68].mxu1 %v5256_v12 }
 0x29f   : > { %2088 = vmatprep.mubr.bf16.mxu1 %v5285_v31 }
 0x2a2   : > { %2272 = vmatmul.mubr.bf16.gmra.mrb[68].mxu0 %v5256_v12 }
 0x2a3   : > { %2281 = vmatprep.mubr.bf16.mxu0 %v5285_v31 }
 0x2a6   : > { %2089 = vmatmul.mubr.bf16.gmra.mrb[72].mxu1 %v5298_v45 }
 0x2a7   : > { %2098 = vmatprep.mubr.bf16.mxu1 %v5338_v13 }
 0x2aa   : > { %2282 = vmatmul.mubr.bf16.gmra.mrb[72].mxu0 %v5298_v45 }
 0x2ab   : > { %2291 = vmatprep.mubr.bf16.mxu0 %v5338_v13 }
 0x2ae   : > { %2099 = vmatmul.mubr.bf16.gmra.mrb[76].mxu1 %v5353_v48 }
 0x2af   : > { %2108 = vmatprep.mubr.bf16.mxu1 %v5397_v29 }
 0x2b2   : > { %2292 = vmatmul.mubr.bf16.gmra.mrb[76].mxu0 %v5353_v48 }
 0x2b3   : > { %2301 = vmatprep.mubr.bf16.mxu0 %v5397_v29 }
 0x2b6   : > { %2109 = vmatmul.mubr.bf16.gmra.mrb[80].mxu1 %v5416_v60 }
 0x2b7   : > { %2118 = vmatprep.mubr.bf16.mxu1 %v5449_v0 }
 0x2ba   : > { %2302 = vmatmul.mubr.bf16.gmra.mrb[80].mxu0 %v5416_v60 }
 0x2bb   : > { %2311 = vmatprep.mubr.bf16.mxu0 %v5449_v0 }
 0x2be   : > { %2119 = vmatmul.mubr.bf16.gmra.mrb[84].mxu1 %v5468_v41 }
 0x2bf   : > { %2128 = vmatprep.mubr.bf16.mxu1 %v5496_v46 }
 0x2c2   : > { %2312 = vmatmul.mubr.bf16.gmra.mrb[84].mxu0 %v5468_v41 }
 0x2c3   : > { %2321 = vmatprep.mubr.bf16.mxu0 %v5496_v46 }
 0x2c6   : > { %2129 = vmatmul.mubr.bf16.gmra.mrb[88].mxu1 %v5502_v50 }
 0x2c7   : > { %2138 = vmatprep.mubr.bf16.mxu1 %v5535_v17 }
 0x2ca   : > { %2322 = vmatmul.mubr.bf16.gmra.mrb[88].mxu0 %v5502_v50 }
 0x2cb   : > { %2331 = vmatprep.mubr.bf16.mxu0 %v5535_v17 }
 0x2ce   : > { %2139 = vmatmul.mubr.bf16.gmra.mrb[92].mxu1 %v5539_v38 }
 0x2d2   : > { %2332 = vmatmul.mubr.bf16.gmra.mrb[92].mxu0 %v5539_v38 }
 0x2de   : > { %v1877_v34 = vpop.f32.mrb[0].mxu1 }
 0x2df   : > { %v1878_v12 = vadd.f32 %v1877_v34, %v5611_v56  ;;  %v1879_v37 = vpop.f32.mrb[1].mxu1 }
 0x2e0   : > { %v1880_v1 = vadd.f32 %v1879_v37, %v5615_v51  ;;  %v1881_v31 = vpop.f32.mrb[2].mxu1 }
 0x2e1   : > { %v1882_v45 = vadd.f32 %v1881_v31, %v5611_v56  ;;  %v1883_v36 = vpop.f32.mrb[3].mxu1 }
 0x2e2   : > { %v3522_v49 = vpack.c.bf16 %v1880_v1, %v1878_v12  ;;  %v1884_v13 = vadd.f32 %v1883_v36, %v5615_v51  ;;  %v1797_v48 = vpop.f32.mrb[0].mxu0 }
 0x2e3   : > { %v1798_v18 = vadd.f32 %v1797_v48, %v5611_v56  ;;  %v1799_v29 = vpop.f32.mrb[1].mxu0 }
 0x2e4   : > { %2614 = vst [vmem:[%s5625_s11 + $0x80] sm:$0xff] %v3522_v49  ;;  %v3523_v7 = vpack.c.bf16 %v1884_v13, %v1882_v45  ;;  %v1800_v60 = vadd.f32 %v1799_v29, %v5615_v51  ;;  %v1801_v10 = vpop.f32.mrb[2].mxu0 }
 0x2e5   : > { %v1802_v35 = vadd.f32 %v1801_v10, %v5611_v56  ;;  %v1803_v0 = vpop.f32.mrb[3].mxu0 }
 0x2e6   : > { %2615 = vst [vmem:[%s5625_s11 + $0x88] sm:$0xff] %v3523_v7  ;;  %v3506_v41 = vpack.c.bf16 %v1800_v60, %v1798_v18  ;;  %v1804_v52 = vadd.f32 %v1803_v0, %v5615_v51 }
 0x2e8   : > { %v1887_v44 = vpop.f32.mrb[4].mxu1  ;;  %2598 = vst [vmem:[%s5625_s11] sm:$0xff] %v3506_v41  ;;  %v3507_v46 = vpack.c.bf16 %v1804_v52, %v1802_v35 }
 0x2e9   : > { %v1888_v50 = vadd.f32 %v1887_v44, %v5611_v56  ;;  %v1889_v15 = vpop.f32.mrb[5].mxu1 }
 0x2ea   : > { %v1890_v28 = vadd.f32 %v1889_v15, %v5615_v51  ;;  %v1891_v62 = vpop.f32.mrb[6].mxu1  ;;  %2599 = vst [vmem:[%s5625_s11 + $0x8] sm:$0xff] %v3507_v46 }
 0x2eb   : > { %v1892_v32 = vadd.f32 %v1891_v62, %v5611_v56  ;;  %v1893_v55 = vpop.f32.mrb[7].mxu1 }
 0x2ec   : > { %v3524_v25 = vpack.c.bf16 %v1890_v28, %v1888_v50  ;;  %v1894_v47 = vadd.f32 %v1893_v55, %v5615_v51 }
 0x2ed   : > { %v1807_v23 = vpop.f32.mrb[4].mxu0 }
 0x2ee   : > { %2616 = vst [vmem:[%s5625_s11 + $0x90] sm:$0xff] %v3524_v25  ;;  %v3525_v58 = vpack.c.bf16 %v1894_v47, %v1892_v32  ;;  %v1808_v39 = vadd.f32 %v1807_v23, %v5611_v56  ;;  %v1809_v6 = vpop.f32.mrb[5].mxu0 }
 0x2ef   : > { %v1810_v30 = vadd.f32 %v1809_v6, %v5615_v51  ;;  %v1811_v43 = vpop.f32.mrb[6].mxu0 }
 0x2f0   : > { %2617 = vst [vmem:[%s5625_s11 + $0x98] sm:$0xff] %v3525_v58  ;;  %v1812_v26 = vadd.f32 %v1811_v43, %v5611_v56  ;;  %v1813_v57 = vpop.f32.mrb[7].mxu0 }
 0x2f1   : > { %v3508_v40 = vpack.c.bf16 %v1810_v30, %v1808_v39  ;;  %v1814_v3 = vadd.f32 %v1813_v57, %v5615_v51 }
 0x2f2   : > { %v1897_v63 = vpop.f32.mrb[8].mxu1 }
 0x2f3   : > { %2600 = vst [vmem:[%s5625_s11 + $0x10] sm:$0xff] %v3508_v40  ;;  %v3509_v2 = vpack.c.bf16 %v1814_v3, %v1812_v26  ;;  %v1898_v9 = vadd.f32 %v1897_v63, %v5611_v56  ;;  %v1899_v11 = vpop.f32.mrb[9].mxu1 }
 0x2f4   : > { %v1900_v53 = vadd.f32 %v1899_v11, %v5615_v51  ;;  %v1901_v17 = vpop.f32.mrb[10].mxu1 }
 0x2f5   : > { %2601 = vst [vmem:[%s5625_s11 + $0x18] sm:$0xff] %v3509_v2  ;;  %v1902_v4 = vadd.f32 %v1901_v17, %v5611_v56  ;;  %v1903_v33 = vpop.f32.mrb[11].mxu1 }
 0x2f6   : > { %v3526_v24 = vpack.c.bf16 %v1900_v53, %v1898_v9  ;;  %v1904_v54 = vadd.f32 %v1903_v33, %v5615_v51 }
 0x2f8   : > { %2618 = vst [vmem:[%s5625_s11 + $0xa0] sm:$0xff] %v3526_v24  ;;  %v3527_v38 = vpack.c.bf16 %v1904_v54, %v1902_v4 }
 0x2f9   : > { %v1817_v20 = vpop.f32.mrb[8].mxu0 }
 0x2fa   : > { %v1818_v8 = vadd.f32 %v1817_v20, %v5611_v56  ;;  %v1819_v27 = vpop.f32.mrb[9].mxu0  ;;  %2619 = vst [vmem:[%s5625_s11 + $0xa8] sm:$0xff] %v3527_v38 }
 0x2fb   : > { %v1820_v21 = vadd.f32 %v1819_v27, %v5615_v51  ;;  %v1821_v59 = vpop.f32.mrb[10].mxu0 }
 0x2fc   : > { %v1822_v14 = vadd.f32 %v1821_v59, %v5611_v56  ;;  %v1823_v5 = vpop.f32.mrb[11].mxu0 }
 0x2fd   : > { %v3510_v19 = vpack.c.bf16 %v1820_v21, %v1818_v8  ;;  %v1824_v61 = vadd.f32 %v1823_v5, %v5615_v51 }
 0x2fe   : > { %v1907_v16 = vpop.f32.mrb[12].mxu1 }
 0x2ff   : > { %2602 = vst [vmem:[%s5625_s11 + $0x20] sm:$0xff] %v3510_v19  ;;  %v3511_v42 = vpack.c.bf16 %v1824_v61, %v1822_v14  ;;  %v1908_v34 = vadd.f32 %v1907_v16, %v5611_v56  ;;  %v1909_v12 = vpop.f32.mrb[13].mxu1 }
 0x300   : > { %v1910_v37 = vadd.f32 %v1909_v12, %v5615_v51  ;;  %v1911_v1 = vpop.f32.mrb[14].mxu1 }
 0x301   : > { %2603 = vst [vmem:[%s5625_s11 + $0x28] sm:$0xff] %v3511_v42  ;;  %v1912_v31 = vadd.f32 %v1911_v1, %v5611_v56  ;;  %v1913_v45 = vpop.f32.mrb[15].mxu1 }
 0x302   : > { %v3528_v36 = vpack.c.bf16 %v1910_v37, %v1908_v34  ;;  %v1914_v49 = vadd.f32 %v1913_v45, %v5615_v51 }
 0x304   : > { %2620 = vst [vmem:[%s5625_s11 + $0xb0] sm:$0xff] %v3528_v36  ;;  %v3529_v13 = vpack.c.bf16 %v1914_v49, %v1912_v31 }
 0x305   : > { %v1827_v48 = vpop.f32.mrb[12].mxu0 }
 0x306   : > { %v1828_v7 = vadd.f32 %v1827_v48, %v5611_v56  ;;  %v1829_v18 = vpop.f32.mrb[13].mxu0  ;;  %2621 = vst [vmem:[%s5625_s11 + $0xb8] sm:$0xff] %v3529_v13 }
 0x307   : > { %v1830_v29 = vadd.f32 %v1829_v18, %v5615_v51  ;;  %v1831_v60 = vpop.f32.mrb[14].mxu0 }
 0x308   : > { %v1832_v10 = vadd.f32 %v1831_v60, %v5611_v56  ;;  %v1833_v35 = vpop.f32.mrb[15].mxu0 }
 0x309   : > { %v3512_v0 = vpack.c.bf16 %v1830_v29, %v1828_v7  ;;  %v1834_v41 = vadd.f32 %v1833_v35, %v5615_v51  ;;  %v1917_v52 = vpop.f32.mrb[16].mxu1 }
 0x30a   : > { %v1918_v46 = vadd.f32 %v1917_v52, %v5611_v56  ;;  %v1919_v50 = vpop.f32.mrb[17].mxu1  ;;  %v6251_v52 = vld [vmem:[#allocation50_spill] sm:$0xff] }
 0x30b   : > { %2604 = vst [vmem:[%s5625_s11 + $0x30] sm:$0xff] %v3512_v0  ;;  %v3513_v44 = vpack.c.bf16 %v1834_v41, %v1832_v10  ;;  %v1920_v15 = vadd.f32 %v1919_v50, %v5615_v51  ;;  %v1921_v28 = vpop.f32.mrb[18].mxu1 }
 0x30c   : > { %v1922_v62 = vadd.f32 %v1921_v28, %v5611_v56  ;;  %v1923_v32 = vpop.f32.mrb[19].mxu1 }
 0x30d   : > { %2605 = vst [vmem:[%s5625_s11 + $0x38] sm:$0xff] %v3513_v44  ;;  %v3530_v55 = vpack.c.bf16 %v1920_v15, %v1918_v46  ;;  %v1924_v25 = vadd.f32 %v1923_v32, %v5615_v51  ;;  %v1837_v47 = vpop.f32.mrb[16].mxu0  ;;  %v1263_v44 = vsub.s32 2, %v6251_v52  ;;  %v1267_v15 = vsub.s32 3, %v6251_v52 }
 0x30e   : > { %v1838_v58 = vadd.f32 %v1837_v47, %v5611_v56  ;;  %v1839_v23 = vpop.f32.mrb[17].mxu0 }
 0x30f   : > { %2622 = vst [vmem:[%s5625_s11 + $0xc0] sm:$0xff] %v3530_v55  ;;  %v3531_v39 = vpack.c.bf16 %v1924_v25, %v1922_v62  ;;  %v1840_v6 = vadd.f32 %v1839_v23, %v5615_v51  ;;  %v1841_v30 = vpop.f32.mrb[18].mxu0 }
 0x310   : > { %v1842_v43 = vadd.f32 %v1841_v30, %v5611_v56  ;;  %v1843_v26 = vpop.f32.mrb[19].mxu0 }
 0x311   : > { %2623 = vst [vmem:[%s5625_s11 + $0xc8] sm:$0xff] %v3531_v39  ;;  %v3514_v57 = vpack.c.bf16 %v1840_v6, %v1838_v58  ;;  %v1844_v40 = vadd.f32 %v1843_v26, %v5615_v51  ;;  %v1927_v3 = vpop.f32.mrb[20].mxu1  ;;  %v1271_v39 = vsub.s32 4, %v6251_v52  ;;  %v1275_v26 = vsub.s32 5, %v6251_v52 }
 0x312   : > { %v1928_v2 = vadd.f32 %v1927_v3, %v5611_v56  ;;  %v1929_v63 = vpop.f32.mrb[21].mxu1 }
 0x313   : > { %2606 = vst [vmem:[%s5625_s11 + $0x40] sm:$0xff] %v3514_v57  ;;  %v3515_v9 = vpack.c.bf16 %v1844_v40, %v1842_v43  ;;  %v1930_v11 = vadd.f32 %v1929_v63, %v5615_v51  ;;  %v1931_v53 = vpop.f32.mrb[22].mxu1  ;;  %v5716_v43 = vrot.slane %v5607_v22, %v1263_v44 }
 0x314   : > { %v1932_v17 = vadd.f32 %v1931_v53, %v5611_v56  ;;  %v1933_v4 = vpop.f32.mrb[23].mxu1 }
 0x315   : > { %2607 = vst [vmem:[%s5625_s11 + $0x48] sm:$0xff] %v3515_v9  ;;  %v3532_v33 = vpack.c.bf16 %v1930_v11, %v1928_v2  ;;  %v1934_v24 = vadd.f32 %v1933_v4, %v5615_v51  ;;  %v1847_v54 = vpop.f32.mrb[20].mxu0  ;;  %v5722_v2 = vrot.slane %v5607_v22, %v1267_v15 }
 0x316   : > { %v1848_v38 = vadd.f32 %v1847_v54, %v5611_v56  ;;  %v1849_v20 = vpop.f32.mrb[21].mxu0 }
 0x317   : > { %2624 = vst [vmem:[%s5625_s11 + $0xd0] sm:$0xff] %v3532_v33  ;;  %v3533_v8 = vpack.c.bf16 %v1934_v24, %v1932_v17  ;;  %v1850_v27 = vadd.f32 %v1849_v20, %v5615_v51  ;;  %v1851_v21 = vpop.f32.mrb[22].mxu0  ;;  %v5729_v24 = vrot.slane %v5607_v22, %v1271_v39  ;;  %v5734_v20 = vrot.slane %v5607_v22, %v1275_v26 }
 0x318   : > { %v1852_v59 = vadd.f32 %v1851_v21, %v5611_v56  ;;  %v1853_v14 = vpop.f32.mrb[23].mxu0 }
 0x319   : > { %2625 = vst [vmem:[%s5625_s11 + $0xd8] sm:$0xff] %v3533_v8  ;;  %v3516_v5 = vpack.c.bf16 %v1850_v27, %v1848_v38  ;;  %v1854_v19 = vadd.f32 %v1853_v14, %v5615_v51  ;;  %v1937_v61 = vpop.f32.mrb[24].mxu1 }
 0x31a   : > { %v1938_v16 = vadd.f32 %v1937_v61, %v5611_v56  ;;  %v1939_v42 = vpop.f32.mrb[25].mxu1 }
 0x31b   : > { %2608 = vst [vmem:[%s5625_s11 + $0x50] sm:$0xff] %v3516_v5  ;;  %v3517_v34 = vpack.c.bf16 %v1854_v19, %v1852_v59  ;;  %v1940_v12 = vadd.f32 %v1939_v42, %v5615_v51  ;;  %v1941_v37 = vpop.f32.mrb[26].mxu1 }
 0x31c   : > { %v1942_v1 = vadd.f32 %v1941_v37, %v5611_v56  ;;  %v1943_v31 = vpop.f32.mrb[27].mxu1 }
 0x31d   : > { %2609 = vst [vmem:[%s5625_s11 + $0x58] sm:$0xff] %v3517_v34  ;;  %v3534_v45 = vpack.c.bf16 %v1940_v12, %v1938_v16  ;;  %v1944_v36 = vadd.f32 %v1943_v31, %v5615_v51  ;;  %v1857_v49 = vpop.f32.mrb[24].mxu0 }
 0x31e   : > { %v1858_v13 = vadd.f32 %v1857_v49, %v5611_v56  ;;  %v1859_v48 = vpop.f32.mrb[25].mxu0 }
 0x31f   : > { %2626 = vst [vmem:[%s5625_s11 + $0xe0] sm:$0xff] %v3534_v45  ;;  %v3535_v7 = vpack.c.bf16 %v1944_v36, %v1942_v1  ;;  %v1860_v18 = vadd.f32 %v1859_v48, %v5615_v51  ;;  %v1861_v29 = vpop.f32.mrb[26].mxu0 }
 0x320   : > { %v1862_v60 = vadd.f32 %v1861_v29, %v5611_v56  ;;  %v1863_v10 = vpop.f32.mrb[27].mxu0 }
 0x321   : > { %2627 = vst [vmem:[%s5625_s11 + $0xe8] sm:$0xff] %v3535_v7  ;;  %v3518_v35 = vpack.c.bf16 %v1860_v18, %v1858_v13  ;;  %v1864_v0 = vadd.f32 %v1863_v10, %v5615_v51  ;;  %v1947_v41 = vpop.f32.mrb[28].mxu1 }
 0x322   : > { %v1948_v46 = vadd.f32 %v1947_v41, %v5611_v56  ;;  %v1949_v50 = vpop.f32.mrb[29].mxu1 }
 0x323   : > { %2610 = vst [vmem:[%s5625_s11 + $0x60] sm:$0xff] %v3518_v35  ;;  %v3519_v28 = vpack.c.bf16 %v1864_v0, %v1862_v60  ;;  %v1950_v62 = vadd.f32 %v1949_v50, %v5615_v51  ;;  %v1951_v32 = vpop.f32.mrb[30].mxu1 }
 0x324   : > { %v1952_v55 = vadd.f32 %v1951_v32, %v5611_v56  ;;  %v1953_v25 = vpop.f32.mrb[31].mxu1 }
 0x325   : > { %2611 = vst [vmem:[%s5625_s11 + $0x68] sm:$0xff] %v3519_v28  ;;  %v3536_v47 = vpack.c.bf16 %v1950_v62, %v1948_v46  ;;  %v1954_v58 = vadd.f32 %v1953_v25, %v5615_v51  ;;  %v1867_v23 = vpop.f32.mrb[28].mxu0 }
 0x326   : > { %v1868_v6 = vadd.f32 %v1867_v23, %v5611_v56  ;;  %v1869_v30 = vpop.f32.mrb[29].mxu0 }
 0x327   : > { %2628 = vst [vmem:[%s5625_s11 + $0xf0] sm:$0xff] %v3536_v47  ;;  %v3537_v57 = vpack.c.bf16 %v1954_v58, %v1952_v55  ;;  %v1870_v40 = vadd.f32 %v1869_v30, %v5615_v51  ;;  %v1871_v3 = vpop.f32.mrb[30].mxu0 }
 0x328   : > { %v1872_v63 = vadd.f32 %v1871_v3, %v5611_v56  ;;  %v1873_v9 = vpop.f32.mrb[31].mxu0 }
 0x329   : > { %2629 = vst [vmem:[%s5625_s11 + $0xf8] sm:$0xff] %v3537_v57  ;;  %v3520_v11 = vpack.c.bf16 %v1870_v40, %v1868_v6  ;;  %v1874_v53 = vadd.f32 %v1873_v9, %v5615_v51  ;;  %v1990_v17 = vpop.f32.mrb[32].mxu1 }
 0x32a   : > { %v1991_v4 = vadd.f32 %v1990_v17, %v5716_v43  ;;  %v1992_v33 = vpop.f32.mrb[33].mxu1 }
 0x32b   : > { %2612 = vst [vmem:[%s5625_s11 + $0x70] sm:$0xff] %v3520_v11  ;;  %v3521_v54 = vpack.c.bf16 %v1874_v53, %v1872_v63  ;;  %v1993_v56 = vadd.f32 %v1992_v33, %v5722_v2  ;;  %v1994_v38 = vpop.f32.mrb[34].mxu1 }
 0x32c   : > { %v1995_v51 = vadd.f32 %v1994_v38, %v5716_v43  ;;  %v1996_v8 = vpop.f32.mrb[35].mxu1 }
 0x32d   : > { %2613 = vst [vmem:[%s5625_s11 + $0x78] sm:$0xff] %v3521_v54  ;;  %v3538_v27 = vpack.c.bf16 %v1993_v56, %v1991_v4  ;;  %v1997_v21 = vadd.f32 %v1996_v8, %v5722_v2  ;;  %v2183_v59 = vpop.f32.mrb[32].mxu0 }
 0x32e   : > { %v2184_v14 = vadd.f32 %v2183_v59, %v5729_v24  ;;  %v2185_v5 = vpop.f32.mrb[33].mxu0 }
 0x32f   : > { %2790 = vst [vmem:[%s5743_s1] sm:$0xff] %v3538_v27  ;;  %v3539_v22 = vpack.c.bf16 %v1997_v21, %v1995_v51  ;;  %v2186_v19 = vadd.f32 %v2185_v5, %v5734_v20  ;;  %v2187_v61 = vpop.f32.mrb[34].mxu0 }
 0x330   : > { %v2188_v16 = vadd.f32 %v2187_v61, %v5729_v24  ;;  %v2189_v42 = vpop.f32.mrb[35].mxu0 }
 0x331   : > { %2791 = vst [vmem:[%s5743_s1 + $0x8] sm:$0xff] %v3539_v22  ;;  %v3570_v34 = vpack.c.bf16 %v2186_v19, %v2184_v14  ;;  %v2190_v12 = vadd.f32 %v2189_v42, %v5734_v20  ;;  %v2000_v37 = vpop.f32.mrb[36].mxu1 }
 0x332   : > { %v2001_v1 = vadd.f32 %v2000_v37, %v5716_v43  ;;  %v2002_v31 = vpop.f32.mrb[37].mxu1 }
 0x333   : > { %2982 = vst [vmem:[%s5754_s28] sm:$0xff] %v3570_v34  ;;  %v3571_v45 = vpack.c.bf16 %v2190_v12, %v2188_v16  ;;  %v2003_v36 = vadd.f32 %v2002_v31, %v5722_v2  ;;  %v2004_v49 = vpop.f32.mrb[38].mxu1 }
 0x334   : > { %v2005_v13 = vadd.f32 %v2004_v49, %v5716_v43  ;;  %v2006_v48 = vpop.f32.mrb[39].mxu1 }
 0x335   : > { %2983 = vst [vmem:[%s5754_s28 + $0x8] sm:$0xff] %v3571_v45  ;;  %v3540_v7 = vpack.c.bf16 %v2003_v36, %v2001_v1  ;;  %v2007_v18 = vadd.f32 %v2006_v48, %v5722_v2  ;;  %v2193_v29 = vpop.f32.mrb[36].mxu0 }
 0x336   : > { %v2194_v60 = vadd.f32 %v2193_v29, %v5729_v24  ;;  %v2195_v10 = vpop.f32.mrb[37].mxu0 }
 0x337   : > { %4135 = shalt.err (!%p4132_p13)
}
 0x338   : > { %s4136_s4 = scalar_lea.hbm %s5762_s12, 4096  ;;  %s4140_s11 = scalar_lea.hbm %s6081_s5, 16384 }
 0x339   : > { %p4137_p5 = scmp.ne.s32.totalorder %s5762_s12, %s4136_s4  ;;  %p4141_p2 = scmp.lt.u32.totalorder %s5762_s12, %s6081_s5 }
 0x33a   : > { %p4142_p10 = scmp.lt.u32.totalorder %s4140_s11, %s4136_s4  ;;  %p4144_p6 = scmp.lt.u32.totalorder %s4136_s4, %s5762_s12 }
 0x33b   : > { %p4138_p9 = pnand %p4137_p5, %p4523_p4 }
 0x33c   : > { %p4143_p1 = por %p4142_p10, %p4141_p2 }
 0x33d   : > { %p4139_p0 = pneg %p4138_p9 }
 0x33e   : > { %p4145_p8 = por %p4144_p6, %p4143_p1 }
 0x340   : > { %p4146_p3 = pnand %p4145_p8, %p4139_p0 }
 0x342   : > { %4149 = shalt.err (!%p4146_p3)
}
 0x343   : > { %s4300_s18 = smov 128   ;;  %s4301_s22 = smov 8   ;;  %2792 = vst [vmem:[%s5743_s1 + $0x10] sm:$0xff] %v3540_v7  ;;  %v3541_v35 = vpack.c.bf16 %v2007_v18, %v2005_v13  ;;  %v2196_v0 = vadd.f32 %v2195_v10, %v5734_v20  ;;  %v2197_v41 = vpop.f32.mrb[38].mxu0  ;;  %v2010_v15 = vpop.f32.mrb[40].mxu1 }
 0x344   : > { %3655 = dma.vmem_to_hbm [thread:$0]  (%p4523_p4), %s5768_s19, 4096, %s5762_s12, %s3015_s21, %s4300_s18, %s4300_s18, %s4301_s22   ;;  %v2198_v52 = vadd.f32 %v2197_v41, %v5729_v24  ;;  %v2199_v44 = vpop.f32.mrb[39].mxu0  ;;  %v2011_v28 = vadd.f32 %v2010_v15, %v5716_v43  ;;  %v2012_v62 = vpop.f32.mrb[41].mxu1 }
 0x345   : > { %2793 = vst [vmem:[%s5743_s1 + $0x18] sm:$0xff] %v3541_v35  ;;  %v3572_v46 = vpack.c.bf16 %v2196_v0, %v2194_v60  ;;  %v2200_v50 = vadd.f32 %v2199_v44, %v5734_v20  ;;  %v2013_v55 = vadd.f32 %v2012_v62, %v5722_v2  ;;  %v2014_v25 = vpop.f32.mrb[42].mxu1  ;;  %v2203_v6 = vpop.f32.mrb[40].mxu0  ;;  %s3019_s23 = sand.u32 1, %s4385_s9   ;;  %s3060_s14 = sshll.u32 %s5743_s1, 4  ;;  %s5976_s14 = int_to_ptr.vmem [resolvable:$true] %s3060_s14 }
 0x346   : > { %v2015_v47 = vadd.f32 %v2014_v25, %v5716_v43  ;;  %v2016_v58 = vpop.f32.mrb[43].mxu1  ;;  %v2204_v30 = vadd.f32 %v2203_v6, %v5729_v24  ;;  %v2205_v26 = vpop.f32.mrb[41].mxu0  ;;  %s6252_s19 = sld [smem:[#allocation57_spill]]  ;;  %s3079_s15 = sshll.u32 %s5754_s28, 4  ;;  %s6018_s15 = int_to_ptr.vmem [resolvable:$true] %s3079_s15 }
 0x347   : > { %2984 = vst [vmem:[%s5754_s28 + $0x10] sm:$0xff] %v3572_v46  ;;  %v3573_v32 = vpack.c.bf16 %v2200_v50, %v2198_v52  ;;  %v3542_v23 = vpack.c.bf16 %v2013_v55, %v2011_v28  ;;  %v2017_v39 = vadd.f32 %v2016_v58, %v5722_v2  ;;  %v2206_v40 = vadd.f32 %v2205_v26, %v5734_v20  ;;  %v2207_v3 = vpop.f32.mrb[42].mxu0  ;;  %v2020_v17 = vpop.f32.mrb[44].mxu1  ;;  %s5982_s20 = scalar_lea.sflag [#allocation13], %s3019_s23  ;;  %s4150_s10 = scalar_lea.vmem %s5976_s14, 4096 }
 0x348   : > { %v2208_v63 = vadd.f32 %v2207_v3, %v5729_v24  ;;  %v2209_v9 = vpop.f32.mrb[43].mxu0  ;;  %v2021_v4 = vadd.f32 %v2020_v17, %v5716_v43  ;;  %v2022_v33 = vpop.f32.mrb[45].mxu1  ;;  %p4151_p7 = scmp.ne.s32.totalorder %s5976_s14, %s4150_s10  ;;  %s4302_s3 = smov [#allocation12]  }
 0x349   : > { %2985 = vst [vmem:[%s5754_s28 + $0x18] sm:$0xff] %v3573_v32  ;;  %2794 = vst [vmem:[%s5743_s1 + $0x20] sm:$0xff] %v3542_v23  ;;  %v3543_v57 = vpack.c.bf16 %v2017_v39, %v2015_v47  ;;  %v3574_v11 = vpack.c.bf16 %v2206_v40, %v2204_v30  ;;  %v2210_v53 = vadd.f32 %v2209_v9, %v5734_v20  ;;  %v2024_v38 = vpop.f32.mrb[46].mxu1  ;;  %v2213_v59 = vpop.f32.mrb[44].mxu0  ;;  %s4154_s4 = sshll.u32 %s4302_s3, 4  ;;  %s4155_s4 = int_to_ptr.vmem [resolvable:$false] %s4154_s4 }
 0x34a   : > { %v2023_v56 = vadd.f32 %v2022_v33, %v5722_v2  ;;  %v2025_v51 = vadd.f32 %v2024_v38, %v5716_v43  ;;  %v2026_v8 = vpop.f32.mrb[47].mxu1  ;;  %v2214_v14 = vadd.f32 %v2213_v59, %v5729_v24  ;;  %v2215_v5 = vpop.f32.mrb[45].mxu0  ;;  %p4152_p12 = pnand %p4151_p7, %p4523_p4  ;;  %s4156_s16 = scalar_lea.vmem %s4155_s4, 8192 }
 0x34b   : > { %2795 = vst [vmem:[%s5743_s1 + $0x28] sm:$0xff] %v3543_v57  ;;  %2986 = vst [vmem:[%s5754_s28 + $0x20] sm:$0xff] %v3574_v11  ;;  %v3575_v54 = vpack.c.bf16 %v2210_v53, %v2208_v63  ;;  %v2027_v21 = vadd.f32 %v2026_v8, %v5722_v2  ;;  %v2216_v19 = vadd.f32 %v2215_v5, %v5734_v20  ;;  %v2217_v61 = vpop.f32.mrb[46].mxu0  ;;  %v2030_v37 = vpop.f32.mrb[48].mxu1  ;;  %p4157_p13 = scmp.lt.s32.totalorder %s5976_s14, %s4155_s4  ;;  %p4158_p5 = scmp.lt.s32.totalorder %s4156_s16, %s4150_s10 }
 0x34c   : > { %v3544_v27 = vpack.c.bf16 %v2023_v56, %v2021_v4  ;;  %v2218_v16 = vadd.f32 %v2217_v61, %v5729_v24  ;;  %v2219_v42 = vpop.f32.mrb[47].mxu0  ;;  %v2031_v1 = vadd.f32 %v2030_v37, %v5716_v43  ;;  %v2032_v31 = vpop.f32.mrb[49].mxu1  ;;  %s5974_s21 = scalar_lea.hbm %s6252_s19, %s5748_s27  ;;  %p4153_p11 = pneg %p4152_p12 }
 0x34d   : > { %2987 = vst [vmem:[%s5754_s28 + $0x28] sm:$0xff] %v3575_v54  ;;  %v3545_v22 = vpack.c.bf16 %v2027_v21, %v2025_v51  ;;  %v3576_v34 = vpack.c.bf16 %v2216_v19, %v2214_v14  ;;  %v2220_v12 = vadd.f32 %v2219_v42, %v5734_v20  ;;  %v2033_v36 = vadd.f32 %v2032_v31, %v5722_v2  ;;  %v2034_v49 = vpop.f32.mrb[50].mxu1  ;;  %v2223_v29 = vpop.f32.mrb[48].mxu0  ;;  %p4159_p9 = por %p4158_p5, %p4157_p13 }
 0x34e   : > { %2796 = vst [vmem:[%s5743_s1 + $0x30] sm:$0xff] %v3544_v27  ;;  %v2035_v13 = vadd.f32 %v2034_v49, %v5716_v43  ;;  %v2036_v48 = vpop.f32.mrb[51].mxu1  ;;  %v2224_v60 = vadd.f32 %v2223_v29, %v5729_v24  ;;  %v2225_v10 = vpop.f32.mrb[49].mxu0 }
 0x34f   : > { %2797 = vst [vmem:[%s5743_s1 + $0x38] sm:$0xff] %v3545_v22  ;;  %2988 = vst [vmem:[%s5754_s28 + $0x30] sm:$0xff] %v3576_v34  ;;  %v3577_v45 = vpack.c.bf16 %v2220_v12, %v2218_v16  ;;  %v3546_v7 = vpack.c.bf16 %v2033_v36, %v2031_v1  ;;  %v2037_v18 = vadd.f32 %v2036_v48, %v5722_v2  ;;  %v2227_v41 = vpop.f32.mrb[50].mxu0  ;;  %p4160_p0 = pnand %p4159_p9, %p4153_p11 }
 0x350   : > { %v2226_v0 = vadd.f32 %v2225_v10, %v5734_v20  ;;  %v2228_v52 = vadd.f32 %v2227_v41, %v5729_v24  ;;  %v2229_v44 = vpop.f32.mrb[51].mxu0 }
 0x351   : > { %2989 = vst [vmem:[%s5754_s28 + $0x38] sm:$0xff] %v3577_v45  ;;  %2798 = vst [vmem:[%s5743_s1 + $0x40] sm:$0xff] %v3546_v7  ;;  %v3547_v35 = vpack.c.bf16 %v2037_v18, %v2035_v13  ;;  %v2230_v50 = vadd.f32 %v2229_v44, %v5734_v20  ;;  %v2040_v15 = vpop.f32.mrb[52].mxu1 }
 0x352   : > { %v3578_v46 = vpack.c.bf16 %v2226_v0, %v2224_v60  ;;  %v2041_v28 = vadd.f32 %v2040_v15, %v5716_v43  ;;  %v2042_v62 = vpop.f32.mrb[53].mxu1 }
 0x353   : > { %2799 = vst [vmem:[%s5743_s1 + $0x48] sm:$0xff] %v3547_v35  ;;  %v3579_v32 = vpack.c.bf16 %v2230_v50, %v2228_v52  ;;  %v2043_v55 = vadd.f32 %v2042_v62, %v5722_v2  ;;  %v2044_v25 = vpop.f32.mrb[54].mxu1 }
 0x354   : > { %2990 = vst [vmem:[%s5754_s28 + $0x40] sm:$0xff] %v3578_v46  ;;  %v2045_v47 = vadd.f32 %v2044_v25, %v5716_v43  ;;  %v2046_v58 = vpop.f32.mrb[55].mxu1 }
 0x355   : > { %2991 = vst [vmem:[%s5754_s28 + $0x48] sm:$0xff] %v3579_v32  ;;  %v3548_v23 = vpack.c.bf16 %v2043_v55, %v2041_v28  ;;  %v2047_v39 = vadd.f32 %v2046_v58, %v5722_v2  ;;  %v2233_v6 = vpop.f32.mrb[52].mxu0 }
 0x356   : > { %v2234_v30 = vadd.f32 %v2233_v6, %v5729_v24  ;;  %v2235_v26 = vpop.f32.mrb[53].mxu0 }
 0x357   : > { %2800 = vst [vmem:[%s5743_s1 + $0x50] sm:$0xff] %v3548_v23  ;;  %v3549_v57 = vpack.c.bf16 %v2047_v39, %v2045_v47  ;;  %v2236_v40 = vadd.f32 %v2235_v26, %v5734_v20  ;;  %v2237_v3 = vpop.f32.mrb[54].mxu0 }
 0x358   : > { %v2238_v63 = vadd.f32 %v2237_v3, %v5729_v24  ;;  %v2239_v9 = vpop.f32.mrb[55].mxu0 }
 0x359   : > { %2801 = vst [vmem:[%s5743_s1 + $0x58] sm:$0xff] %v3549_v57  ;;  %v3580_v11 = vpack.c.bf16 %v2236_v40, %v2234_v30  ;;  %v2240_v53 = vadd.f32 %v2239_v9, %v5734_v20  ;;  %v2050_v17 = vpop.f32.mrb[56].mxu1 }
 0x35a   : > { %v2051_v4 = vadd.f32 %v2050_v17, %v5716_v43  ;;  %v2052_v33 = vpop.f32.mrb[57].mxu1 }
 0x35b   : > { %2992 = vst [vmem:[%s5754_s28 + $0x50] sm:$0xff] %v3580_v11  ;;  %v3581_v54 = vpack.c.bf16 %v2240_v53, %v2238_v63  ;;  %v2053_v56 = vadd.f32 %v2052_v33, %v5722_v2  ;;  %v2054_v38 = vpop.f32.mrb[58].mxu1 }
 0x35c   : > { %v2055_v51 = vadd.f32 %v2054_v38, %v5716_v43  ;;  %v2056_v8 = vpop.f32.mrb[59].mxu1 }
 0x35d   : > { %2993 = vst [vmem:[%s5754_s28 + $0x58] sm:$0xff] %v3581_v54  ;;  %v3550_v27 = vpack.c.bf16 %v2053_v56, %v2051_v4  ;;  %v2057_v21 = vadd.f32 %v2056_v8, %v5722_v2  ;;  %v2243_v59 = vpop.f32.mrb[56].mxu0 }
 0x35e   : > { %v2244_v14 = vadd.f32 %v2243_v59, %v5729_v24  ;;  %v2245_v5 = vpop.f32.mrb[57].mxu0 }
 0x35f   : > { %2802 = vst [vmem:[%s5743_s1 + $0x60] sm:$0xff] %v3550_v27  ;;  %v3551_v22 = vpack.c.bf16 %v2057_v21, %v2055_v51  ;;  %v2246_v19 = vadd.f32 %v2245_v5, %v5734_v20  ;;  %v2247_v61 = vpop.f32.mrb[58].mxu0 }
 0x360   : > { %v2248_v16 = vadd.f32 %v2247_v61, %v5729_v24  ;;  %v2249_v42 = vpop.f32.mrb[59].mxu0 }
 0x361   : > { %2803 = vst [vmem:[%s5743_s1 + $0x68] sm:$0xff] %v3551_v22  ;;  %v3582_v34 = vpack.c.bf16 %v2246_v19, %v2244_v14  ;;  %v2250_v12 = vadd.f32 %v2249_v42, %v5734_v20  ;;  %v2060_v37 = vpop.f32.mrb[60].mxu1 }
 0x362   : > { %v2061_v1 = vadd.f32 %v2060_v37, %v5716_v43  ;;  %v2062_v31 = vpop.f32.mrb[61].mxu1 }
 0x363   : > { %2994 = vst [vmem:[%s5754_s28 + $0x60] sm:$0xff] %v3582_v34  ;;  %v3583_v45 = vpack.c.bf16 %v2250_v12, %v2248_v16  ;;  %v2063_v36 = vadd.f32 %v2062_v31, %v5722_v2  ;;  %v2064_v49 = vpop.f32.mrb[62].mxu1 }
 0x364   : > { %v2065_v13 = vadd.f32 %v2064_v49, %v5716_v43  ;;  %v2066_v48 = vpop.f32.mrb[63].mxu1 }
 0x365   : > { %2995 = vst [vmem:[%s5754_s28 + $0x68] sm:$0xff] %v3583_v45  ;;  %v3552_v7 = vpack.c.bf16 %v2063_v36, %v2061_v1  ;;  %v2067_v18 = vadd.f32 %v2066_v48, %v5722_v2  ;;  %v2253_v29 = vpop.f32.mrb[60].mxu0 }
 0x366   : > { %v2254_v60 = vadd.f32 %v2253_v29, %v5729_v24  ;;  %v2255_v10 = vpop.f32.mrb[61].mxu0 }
 0x367   : > { %2804 = vst [vmem:[%s5743_s1 + $0x70] sm:$0xff] %v3552_v7  ;;  %v3553_v35 = vpack.c.bf16 %v2067_v18, %v2065_v13  ;;  %v2256_v0 = vadd.f32 %v2255_v10, %v5734_v20  ;;  %v2257_v41 = vpop.f32.mrb[62].mxu0 }
 0x368   : > { %v2258_v52 = vadd.f32 %v2257_v41, %v5729_v24  ;;  %v2259_v44 = vpop.f32.mrb[63].mxu0 }
 0x369   : > { %2805 = vst [vmem:[%s5743_s1 + $0x78] sm:$0xff] %v3553_v35  ;;  %v3584_v46 = vpack.c.bf16 %v2256_v0, %v2254_v60  ;;  %v2260_v50 = vadd.f32 %v2259_v44, %v5734_v20  ;;  %v2070_v15 = vpop.f32.mrb[64].mxu1 }
 0x36a   : > { %v2071_v28 = vadd.f32 %v2070_v15, %v5716_v43  ;;  %v2072_v62 = vpop.f32.mrb[65].mxu1 }
 0x36b   : > { %2996 = vst [vmem:[%s5754_s28 + $0x70] sm:$0xff] %v3584_v46  ;;  %v3585_v32 = vpack.c.bf16 %v2260_v50, %v2258_v52  ;;  %v2073_v55 = vadd.f32 %v2072_v62, %v5722_v2  ;;  %v2074_v25 = vpop.f32.mrb[66].mxu1 }
 0x36c   : > { %v2075_v47 = vadd.f32 %v2074_v25, %v5716_v43  ;;  %v2076_v58 = vpop.f32.mrb[67].mxu1 }
 0x36d   : > { %2997 = vst [vmem:[%s5754_s28 + $0x78] sm:$0xff] %v3585_v32  ;;  %v3554_v23 = vpack.c.bf16 %v2073_v55, %v2071_v28  ;;  %v2077_v39 = vadd.f32 %v2076_v58, %v5722_v2  ;;  %v2263_v6 = vpop.f32.mrb[64].mxu0 }
 0x36e   : > { %v2264_v30 = vadd.f32 %v2263_v6, %v5729_v24  ;;  %v2265_v26 = vpop.f32.mrb[65].mxu0 }
 0x36f   : > { %2806 = vst [vmem:[%s5743_s1 + $0x80] sm:$0xff] %v3554_v23  ;;  %v3555_v57 = vpack.c.bf16 %v2077_v39, %v2075_v47  ;;  %v2266_v40 = vadd.f32 %v2265_v26, %v5734_v20  ;;  %v2267_v3 = vpop.f32.mrb[66].mxu0 }
 0x370   : > { %v2268_v63 = vadd.f32 %v2267_v3, %v5729_v24  ;;  %v2269_v9 = vpop.f32.mrb[67].mxu0 }
 0x371   : > { %2807 = vst [vmem:[%s5743_s1 + $0x88] sm:$0xff] %v3555_v57  ;;  %v3586_v11 = vpack.c.bf16 %v2266_v40, %v2264_v30  ;;  %v2270_v53 = vadd.f32 %v2269_v9, %v5734_v20  ;;  %v2080_v17 = vpop.f32.mrb[68].mxu1 }
 0x372   : > { %v2081_v4 = vadd.f32 %v2080_v17, %v5716_v43  ;;  %v2082_v33 = vpop.f32.mrb[69].mxu1 }
 0x373   : > { %2998 = vst [vmem:[%s5754_s28 + $0x80] sm:$0xff] %v3586_v11  ;;  %v3587_v54 = vpack.c.bf16 %v2270_v53, %v2268_v63  ;;  %v2083_v56 = vadd.f32 %v2082_v33, %v5722_v2  ;;  %v2084_v38 = vpop.f32.mrb[70].mxu1 }
 0x374   : > { %v2085_v51 = vadd.f32 %v2084_v38, %v5716_v43  ;;  %v2086_v8 = vpop.f32.mrb[71].mxu1 }
 0x375   : > { %2999 = vst [vmem:[%s5754_s28 + $0x88] sm:$0xff] %v3587_v54  ;;  %v3556_v27 = vpack.c.bf16 %v2083_v56, %v2081_v4  ;;  %v2087_v21 = vadd.f32 %v2086_v8, %v5722_v2  ;;  %v2273_v59 = vpop.f32.mrb[68].mxu0 }
 0x376   : > { %v2274_v14 = vadd.f32 %v2273_v59, %v5729_v24  ;;  %v2275_v5 = vpop.f32.mrb[69].mxu0 }
 0x377   : > { %2808 = vst [vmem:[%s5743_s1 + $0x90] sm:$0xff] %v3556_v27  ;;  %v3557_v22 = vpack.c.bf16 %v2087_v21, %v2085_v51  ;;  %v2276_v19 = vadd.f32 %v2275_v5, %v5734_v20  ;;  %v2277_v61 = vpop.f32.mrb[70].mxu0 }
 0x378   : > { %v2278_v16 = vadd.f32 %v2277_v61, %v5729_v24  ;;  %v2279_v42 = vpop.f32.mrb[71].mxu0 }
 0x379   : > { %2809 = vst [vmem:[%s5743_s1 + $0x98] sm:$0xff] %v3557_v22  ;;  %v3588_v34 = vpack.c.bf16 %v2276_v19, %v2274_v14  ;;  %v2280_v12 = vadd.f32 %v2279_v42, %v5734_v20  ;;  %v2090_v37 = vpop.f32.mrb[72].mxu1 }
 0x37a   : > { %v2091_v1 = vadd.f32 %v2090_v37, %v5716_v43  ;;  %v2092_v31 = vpop.f32.mrb[73].mxu1 }
 0x37b   : > { %3000 = vst [vmem:[%s5754_s28 + $0x90] sm:$0xff] %v3588_v34  ;;  %v3589_v45 = vpack.c.bf16 %v2280_v12, %v2278_v16  ;;  %v2093_v36 = vadd.f32 %v2092_v31, %v5722_v2  ;;  %v2094_v49 = vpop.f32.mrb[74].mxu1 }
 0x37c   : > { %v2095_v13 = vadd.f32 %v2094_v49, %v5716_v43  ;;  %v2096_v48 = vpop.f32.mrb[75].mxu1 }
 0x37d   : > { %3001 = vst [vmem:[%s5754_s28 + $0x98] sm:$0xff] %v3589_v45  ;;  %v3558_v7 = vpack.c.bf16 %v2093_v36, %v2091_v1  ;;  %v2097_v18 = vadd.f32 %v2096_v48, %v5722_v2  ;;  %v2283_v29 = vpop.f32.mrb[72].mxu0 }
 0x37e   : > { %v2284_v60 = vadd.f32 %v2283_v29, %v5729_v24  ;;  %v2285_v10 = vpop.f32.mrb[73].mxu0 }
 0x37f   : > { %2810 = vst [vmem:[%s5743_s1 + $0xa0] sm:$0xff] %v3558_v7  ;;  %v3559_v35 = vpack.c.bf16 %v2097_v18, %v2095_v13  ;;  %v2286_v0 = vadd.f32 %v2285_v10, %v5734_v20  ;;  %v2287_v41 = vpop.f32.mrb[74].mxu0 }
 0x380   : > { %v2288_v52 = vadd.f32 %v2287_v41, %v5729_v24  ;;  %v2289_v44 = vpop.f32.mrb[75].mxu0 }
 0x381   : > { %2811 = vst [vmem:[%s5743_s1 + $0xa8] sm:$0xff] %v3559_v35  ;;  %v3590_v46 = vpack.c.bf16 %v2286_v0, %v2284_v60  ;;  %v2290_v50 = vadd.f32 %v2289_v44, %v5734_v20  ;;  %v2100_v15 = vpop.f32.mrb[76].mxu1 }
 0x382   : > { %v2101_v28 = vadd.f32 %v2100_v15, %v5716_v43  ;;  %v2102_v62 = vpop.f32.mrb[77].mxu1 }
 0x383   : > { %3002 = vst [vmem:[%s5754_s28 + $0xa0] sm:$0xff] %v3590_v46  ;;  %v3591_v32 = vpack.c.bf16 %v2290_v50, %v2288_v52  ;;  %v2103_v55 = vadd.f32 %v2102_v62, %v5722_v2  ;;  %v2104_v25 = vpop.f32.mrb[78].mxu1 }
 0x384   : > { %v2105_v47 = vadd.f32 %v2104_v25, %v5716_v43  ;;  %v2106_v58 = vpop.f32.mrb[79].mxu1 }
 0x385   : > { %3003 = vst [vmem:[%s5754_s28 + $0xa8] sm:$0xff] %v3591_v32  ;;  %v3560_v23 = vpack.c.bf16 %v2103_v55, %v2101_v28  ;;  %v2107_v39 = vadd.f32 %v2106_v58, %v5722_v2  ;;  %v2293_v6 = vpop.f32.mrb[76].mxu0 }
 0x386   : > { %v2294_v30 = vadd.f32 %v2293_v6, %v5729_v24  ;;  %v2295_v26 = vpop.f32.mrb[77].mxu0 }
 0x387   : > { %2812 = vst [vmem:[%s5743_s1 + $0xb0] sm:$0xff] %v3560_v23  ;;  %v3561_v57 = vpack.c.bf16 %v2107_v39, %v2105_v47  ;;  %v2296_v40 = vadd.f32 %v2295_v26, %v5734_v20  ;;  %v2297_v3 = vpop.f32.mrb[78].mxu0 }
 0x388   : > { %v2298_v63 = vadd.f32 %v2297_v3, %v5729_v24  ;;  %v2299_v9 = vpop.f32.mrb[79].mxu0 }
 0x389   : > { %2813 = vst [vmem:[%s5743_s1 + $0xb8] sm:$0xff] %v3561_v57  ;;  %v3592_v11 = vpack.c.bf16 %v2296_v40, %v2294_v30  ;;  %v2300_v53 = vadd.f32 %v2299_v9, %v5734_v20  ;;  %v2110_v17 = vpop.f32.mrb[80].mxu1 }
 0x38a   : > { %v2111_v4 = vadd.f32 %v2110_v17, %v5716_v43  ;;  %v2112_v33 = vpop.f32.mrb[81].mxu1 }
 0x38b   : > { %3004 = vst [vmem:[%s5754_s28 + $0xb0] sm:$0xff] %v3592_v11  ;;  %v3593_v54 = vpack.c.bf16 %v2300_v53, %v2298_v63  ;;  %v2113_v56 = vadd.f32 %v2112_v33, %v5722_v2  ;;  %v2114_v38 = vpop.f32.mrb[82].mxu1 }
 0x38c   : > { %v2115_v51 = vadd.f32 %v2114_v38, %v5716_v43  ;;  %v2116_v8 = vpop.f32.mrb[83].mxu1 }
 0x38d   : > { %3005 = vst [vmem:[%s5754_s28 + $0xb8] sm:$0xff] %v3593_v54  ;;  %v3562_v27 = vpack.c.bf16 %v2113_v56, %v2111_v4  ;;  %v2117_v21 = vadd.f32 %v2116_v8, %v5722_v2  ;;  %v2303_v59 = vpop.f32.mrb[80].mxu0 }
 0x38e   : > { %v2304_v14 = vadd.f32 %v2303_v59, %v5729_v24  ;;  %v2305_v5 = vpop.f32.mrb[81].mxu0 }
 0x38f   : > { %2814 = vst [vmem:[%s5743_s1 + $0xc0] sm:$0xff] %v3562_v27  ;;  %v3563_v22 = vpack.c.bf16 %v2117_v21, %v2115_v51  ;;  %v2306_v19 = vadd.f32 %v2305_v5, %v5734_v20  ;;  %v2307_v61 = vpop.f32.mrb[82].mxu0 }
 0x390   : > { %v2308_v16 = vadd.f32 %v2307_v61, %v5729_v24  ;;  %v2309_v42 = vpop.f32.mrb[83].mxu0 }
 0x391   : > { %2815 = vst [vmem:[%s5743_s1 + $0xc8] sm:$0xff] %v3563_v22  ;;  %v3594_v34 = vpack.c.bf16 %v2306_v19, %v2304_v14  ;;  %v2310_v12 = vadd.f32 %v2309_v42, %v5734_v20  ;;  %v2120_v37 = vpop.f32.mrb[84].mxu1 }
 0x392   : > { %v2121_v1 = vadd.f32 %v2120_v37, %v5716_v43  ;;  %v2122_v31 = vpop.f32.mrb[85].mxu1 }
 0x393   : > { %3006 = vst [vmem:[%s5754_s28 + $0xc0] sm:$0xff] %v3594_v34  ;;  %v3595_v45 = vpack.c.bf16 %v2310_v12, %v2308_v16  ;;  %v2123_v36 = vadd.f32 %v2122_v31, %v5722_v2  ;;  %v2124_v49 = vpop.f32.mrb[86].mxu1 }
 0x394   : > { %v2125_v13 = vadd.f32 %v2124_v49, %v5716_v43  ;;  %v2126_v48 = vpop.f32.mrb[87].mxu1 }
 0x395   : > { %3007 = vst [vmem:[%s5754_s28 + $0xc8] sm:$0xff] %v3595_v45  ;;  %v3564_v7 = vpack.c.bf16 %v2123_v36, %v2121_v1  ;;  %v2127_v18 = vadd.f32 %v2126_v48, %v5722_v2  ;;  %v2313_v29 = vpop.f32.mrb[84].mxu0 }
 0x396   : > { %v2314_v60 = vadd.f32 %v2313_v29, %v5729_v24  ;;  %v2315_v10 = vpop.f32.mrb[85].mxu0 }
 0x397   : > { %2816 = vst [vmem:[%s5743_s1 + $0xd0] sm:$0xff] %v3564_v7  ;;  %v3565_v35 = vpack.c.bf16 %v2127_v18, %v2125_v13  ;;  %v2316_v0 = vadd.f32 %v2315_v10, %v5734_v20  ;;  %v2317_v41 = vpop.f32.mrb[86].mxu0 }
 0x398   : > { %v2318_v52 = vadd.f32 %v2317_v41, %v5729_v24  ;;  %v2319_v44 = vpop.f32.mrb[87].mxu0 }
 0x399   : > { %2817 = vst [vmem:[%s5743_s1 + $0xd8] sm:$0xff] %v3565_v35  ;;  %v3596_v46 = vpack.c.bf16 %v2316_v0, %v2314_v60  ;;  %v2320_v50 = vadd.f32 %v2319_v44, %v5734_v20  ;;  %v2130_v15 = vpop.f32.mrb[88].mxu1 }
 0x39a   : > { %v2131_v28 = vadd.f32 %v2130_v15, %v5716_v43  ;;  %v2132_v62 = vpop.f32.mrb[89].mxu1 }
 0x39b   : > { %3008 = vst [vmem:[%s5754_s28 + $0xd0] sm:$0xff] %v3596_v46  ;;  %v3597_v32 = vpack.c.bf16 %v2320_v50, %v2318_v52  ;;  %v2133_v55 = vadd.f32 %v2132_v62, %v5722_v2  ;;  %v2134_v25 = vpop.f32.mrb[90].mxu1 }
 0x39c   : > { %v2135_v47 = vadd.f32 %v2134_v25, %v5716_v43  ;;  %v2136_v58 = vpop.f32.mrb[91].mxu1 }
 0x39d   : > { %3009 = vst [vmem:[%s5754_s28 + $0xd8] sm:$0xff] %v3597_v32  ;;  %v3566_v23 = vpack.c.bf16 %v2133_v55, %v2131_v28  ;;  %v2137_v39 = vadd.f32 %v2136_v58, %v5722_v2  ;;  %v2323_v6 = vpop.f32.mrb[88].mxu0 }
 0x39e   : > { %v2324_v30 = vadd.f32 %v2323_v6, %v5729_v24  ;;  %v2325_v26 = vpop.f32.mrb[89].mxu0 }
 0x39f   : > { %2818 = vst [vmem:[%s5743_s1 + $0xe0] sm:$0xff] %v3566_v23  ;;  %v3567_v57 = vpack.c.bf16 %v2137_v39, %v2135_v47  ;;  %v2326_v40 = vadd.f32 %v2325_v26, %v5734_v20  ;;  %v2327_v3 = vpop.f32.mrb[90].mxu0 }
 0x3a0   : > { %v2328_v63 = vadd.f32 %v2327_v3, %v5729_v24  ;;  %v2329_v9 = vpop.f32.mrb[91].mxu0 }
 0x3a1   : > { %2819 = vst [vmem:[%s5743_s1 + $0xe8] sm:$0xff] %v3567_v57  ;;  %v3598_v11 = vpack.c.bf16 %v2326_v40, %v2324_v30  ;;  %v2330_v53 = vadd.f32 %v2329_v9, %v5734_v20  ;;  %v2140_v17 = vpop.f32.mrb[92].mxu1 }
 0x3a2   : > { %v2141_v4 = vadd.f32 %v2140_v17, %v5716_v43  ;;  %v2142_v33 = vpop.f32.mrb[93].mxu1 }
 0x3a3   : > { %3010 = vst [vmem:[%s5754_s28 + $0xe0] sm:$0xff] %v3598_v11  ;;  %v3599_v54 = vpack.c.bf16 %v2330_v53, %v2328_v63  ;;  %v2143_v56 = vadd.f32 %v2142_v33, %v5722_v2  ;;  %v2144_v38 = vpop.f32.mrb[94].mxu1 }
 0x3a4   : > { %v2145_v51 = vadd.f32 %v2144_v38, %v5716_v43  ;;  %v2146_v8 = vpop.f32.mrb[95].mxu1 }
 0x3a5   : > { %3011 = vst [vmem:[%s5754_s28 + $0xe8] sm:$0xff] %v3599_v54  ;;  %v3568_v27 = vpack.c.bf16 %v2143_v56, %v2141_v4  ;;  %v2147_v21 = vadd.f32 %v2146_v8, %v5722_v2  ;;  %v2333_v59 = vpop.f32.mrb[92].mxu0 }
 0x3a6   : > { %v2334_v14 = vadd.f32 %v2333_v59, %v5729_v24  ;;  %v2335_v5 = vpop.f32.mrb[93].mxu0 }
 0x3a7   : > { %2820 = vst [vmem:[%s5743_s1 + $0xf0] sm:$0xff] %v3568_v27  ;;  %v3569_v22 = vpack.c.bf16 %v2147_v21, %v2145_v51  ;;  %v2336_v19 = vadd.f32 %v2335_v5, %v5734_v20  ;;  %v2337_v61 = vpop.f32.mrb[94].mxu0 }
 0x3a8   : > { %v2338_v43 = vadd.f32 %v2337_v61, %v5729_v24  ;;  %v2339_v2 = vpop.f32.mrb[95].mxu0 }
 0x3a9   : > { %2821 = vst [vmem:[%s5743_s1 + $0xf8] sm:$0xff] %v3569_v22  ;;  %v3600_v16 = vpack.c.bf16 %v2336_v19, %v2334_v14  ;;  %v2340_v42 = vadd.f32 %v2339_v2, %v5734_v20 }
 0x3aa   : > { %4163 = shalt.err (!%p4160_p0)
}
 0x3ab   : > { %s4164_s1 = scalar_lea.hbm %s5974_s21, 4096  ;;  %s4168_s13 = scalar_lea.hbm %s6252_s19, 16384 }
 0x3ac   : > { %p4165_p2 = scmp.ne.s32.totalorder %s5974_s21, %s4164_s1  ;;  %p4169_p6 = scmp.lt.u32.totalorder %s5974_s21, %s6252_s19 }
 0x3ad   : > { %p4170_p8 = scmp.lt.u32.totalorder %s4168_s13, %s4164_s1  ;;  %p4172_p7 = scmp.lt.u32.totalorder %s4164_s1, %s5974_s21 }
 0x3ae   : > { %p4166_p10 = pnand %p4165_p2, %p4523_p4 }
 0x3af   : > { %p4171_p3 = por %p4170_p8, %p4169_p6 }
 0x3b0   : > { %p4167_p1 = pneg %p4166_p10 }
 0x3b1   : > { %p4173_p12 = por %p4172_p7, %p4171_p3 }
 0x3b3   : > { %p4174_p11 = pnand %p4173_p12, %p4167_p1 }
 0x3b5   : > { %4177 = shalt.err (!%p4174_p11)
}
 0x3b6   : > { %3656 = dma.vmem_to_hbm [thread:$0]  (%p4523_p4), %s5976_s14, 4096, %s5974_s21, %s5982_s20, %s4300_s18, %s4300_s18, %s4301_s22   ;;  %v3601_v24 = vpack.c.bf16 %v2340_v42, %v2338_v43 }
 0x3b7   : > { %3012 = vst [vmem:[%s5754_s28 + $0xf0] sm:$0xff] %v3600_v16  ;;  %s6253_s10 = sld [smem:[#allocation58_spill]]  ;;  %s4178_s4 = scalar_lea.vmem %s6018_s15, 4096 }
 0x3b8   : > { %3013 = vst [vmem:[%s5754_s28 + $0xf8] sm:$0xff] %v3601_v24  ;;  %p4179_p13 = scmp.ne.s32.totalorder %s6018_s15, %s4178_s4  ;;  %s4303_s14 = smov [#allocation14]  }
 0x3b9   : > { %s4182_s21 = sshll.u32 %s4303_s14, 4  ;;  %s4183_s21 = int_to_ptr.vmem [resolvable:$false] %s4182_s21 }
 0x3ba   : > { %p4180_p5 = pnand %p4179_p13, %p4523_p4  ;;  %s4184_s16 = scalar_lea.vmem %s4183_s21, 8192 }
 0x3bb   : > { %p4185_p0 = scmp.lt.s32.totalorder %s6018_s15, %s4183_s21  ;;  %p4186_p2 = scmp.lt.s32.totalorder %s4184_s16, %s4178_s4 }
 0x3bc   : > { %p4181_p9 = pneg %p4180_p5 }
 0x3bd   : > { %s6014_s3 = scalar_lea.hbm %s6253_s10, %s5748_s27  ;;  %p4187_p10 = por %p4186_p2, %p4185_p0 }
 0x3bf   : > { %p4188_p1 = pnand %p4187_p10, %p4181_p9 }
 0x3c1   : > { %4191 = shalt.err (!%p4188_p1)
}
 0x3c2   : > { %s4192_s27 = scalar_lea.hbm %s6014_s3, 4096  ;;  %s4196_s6 = scalar_lea.hbm %s6253_s10, 16384 }
 0x3c3   : > { %p4193_p6 = scmp.ne.s32.totalorder %s6014_s3, %s4192_s27  ;;  %p4197_p7 = scmp.lt.u32.totalorder %s6014_s3, %s6253_s10 }
 0x3c4   : > { %p4198_p12 = scmp.lt.u32.totalorder %s4196_s6, %s4192_s27  ;;  %p4200_p13 = scmp.lt.u32.totalorder %s4192_s27, %s6014_s3 }
 0x3c5   : > { %p4194_p8 = pnand %p4193_p6, %p4523_p4 }
 0x3c6   : > { %p4199_p11 = por %p4198_p12, %p4197_p7 }
 0x3c7   : > { %p4195_p3 = pneg %p4194_p8 }
 0x3c8   : > { %p4201_p5 = por %p4200_p13, %p4199_p11 }
 0x3ca   : > { %p4202_p9 = pnand %p4201_p5, %p4195_p3 }
 0x3cc   : > { %4205 = shalt.err (!%p4202_p9)
}
 0x3cd   : > { %3657 = dma.vmem_to_hbm [thread:$0]  (%p4523_p4), %s6018_s15, 4096, %s6014_s3, %s5982_s20, %s4300_s18, %s4300_s18, %s4301_s22  }
 0x3ce PF: > { %s6254_s17 = sld [smem:[#allocation20_spill]]  ;;  %s6255_s23 = sld [smem:[#allocation21_spill]] }
 0x3cf   : > { %p3697_p0 = scmp.ge.s32.totalorder %s4288_s8, 2 }
 0x3d4   : > { %s3094_s9 = sand.u32 1, %s6254_s17   ;;  %p6256_p2 = scmp.ne.s32.totalorder %s6255_s23, 0 }
 0x3d5   : > { %s3095_s12 = scalar_lea.sflag [#allocation4], %s3094_s9 }
 0x3d6   : > { %p3679_p10 = pnand %p3697_p0, %p6256_p2 }
 0x3d8   : > { %4251 = dma.done.wait (!%p3679_p10), %s3095_s12, 4096  }
 0x3d9   : > { %4253 = vsyncadd (!%p3679_p10), %s3095_s12, 4294963200  ;;  %s6257_s7 = sadd.s32 4294967294, %s4288_s8  }
 0x3da   : > { %s3103_s4 = sand.u32 1, %s6257_s7  }
 0x3db   : > { %s3104_s14 = scalar_lea.sflag [#allocation13], %s3103_s4 }
 0x3dc   : > { %4255 = dma.done.wait (!%p3679_p10), %s3104_s14, 8192  }
 0x3dd   : > { %4257 = vsyncadd (!%p3679_p10), %s3104_s14, 4294959104  ;;  %s29_s8 = sadd.s32 1, %s4288_s8   ;;  %s6258_s18 = sld [smem:[#allocation22_spill]] }
 0x3de   : > { %p26_p4 = scmp.ge.s32.totalorder %s29_s8, 6   ;;  %s6259_s22 = smov %s6272_s24 }
 0x3df   : > { %s6260_s24 = smov %s4264_s25  ;;  %s6261_s25 = smov %s4268_s26 }
 0x3e0   : > { %s6262_s26 = smov %s4536_s2  ;;  %s6263_s27 = smov %s4280_s29 }
 0x3e1   : > { %s6264_s28 = smov %s4284_s30  ;;  %s6266_s30 = smov %s6259_s22 }
 0x3e2   :  { %28 = sbr.rel (!%p26_p4) target bundleno = 18 (0x12), region = 133 }
 0x3e3   : > { %s6265_s29 = smov %s6258_s18 }
 0x3e9   :  { %3118 = vsyncpa [#allocation3], 1 }
 0x3ea   :  { %3120 = vsyncpa [#allocation3 + $0x1], 1 }
 0x3eb   :  { %3121 = vsyncpa [#allocation6], 1 }
 0x3ec   :  { %3122 = vsyncpa [#allocation9], 1 }
 0x3ed   :  { %3123 = vsyncpa [#allocation4], 1 }
 0x3ee   :  { %3125 = vsyncpa [#allocation4 + $0x1], 1 }
 0x3ef   :  { %3126 = vsyncpa [#allocation13], 1 }
 0x3f0   :  { %3128 = vsyncpa [#allocation13 + $0x1], 1 }

</bundles_post_ra>
